<compile_context>
chip_gen: v5e
topology: v5e:2x2
jax: 0.10.0
libtpu: 0.0.40
codegen_flags: <defaults>
</compile_context>

<pallas_src>
import math
from functools import partial

import numpy as np
import jax
import jax.numpy as jnp
from jax.experimental import pallas as pl
from jax.experimental.pallas import tpu as pltpu


# ---------------------------------------------------------------------------
# Fused TransformerBlock kernel: grid = (batch, num_window_blocks)
# ---------------------------------------------------------------------------
def _block_kernel(qp_ref, qres_ref, kslab_ref, vslab_ref, mask_ref,
                  wfc_ref, bfc_ref, g1_ref, beta1_ref,
                  w1_ref, b1_ref, w2_ref, b2_ref, g2_ref, beta2_ref,
                  out_ref, ctx_sc,
                  *, window_size, overlap, seq_len, heads, head_dim,
                  windows_per_block, slab_len):
    W, ov, L = window_size, overlap, seq_len
    H, D, WB, SP = heads, head_dim, windows_per_block, slab_len
    S = W + 2 * ov                         # true (unpadded) slab length
    mm = wfc_ref.dtype                     # matmul input dtype (bf16)
    g = pl.program_id(1)

    qp = qp_ref[0]                         # (WB*W, E) bf16, pre-scaled by 1/sqrt(D)

    # ---- overlapping local attention, one window at a time (static loop) ----
    for j in range(WB):
        i0 = (g * WB + j) * W
        s_true = jnp.maximum(i0 - ov, 0)
        e_true = jnp.minimum(i0 + W + ov, L)
        start = jnp.clip(i0 - ov, 0, L - S)             # matches wrapper slab start
        key_idx = start + jax.lax.broadcasted_iota(jnp.int32, (1, SP), 1)
        key_invalid = (key_idx < s_true) | (key_idx >= e_true)        # (1, SP)
        # masked query rows -> uniform softmax over the *valid* keys (torch masked_fill
        # semantics); clamp/pad keys get exactly zero weight.
        fill = jnp.where(key_invalid, -1e30, -1e10)                    # (1, SP) f32
        row_masked = mask_ref[0, j * W:(j + 1) * W, :] == 0.0          # (W, 1)
        cond = row_masked | key_invalid                                # (W, SP)

        q_w = qp[j * W:(j + 1) * W, :]                                 # (W, E) bf16
        k_slab = kslab_ref[0, j]                                       # (SP, E) bf16
        v_slab = vslab_ref[0, j]                                       # (SP, E) bf16

        for h in range(H):
            sl = slice(h * D, (h + 1) * D)
            e_h = jax.lax.dot_general(q_w[:, sl], k_slab[:, sl],
                                      (((1,), (1,)), ((), ())),
                                      preferred_element_type=jnp.float32)   # (W, SP)
            e_h = jnp.where(cond, fill, e_h)                  # single select per head
            e_h = e_h - jnp.max(e_h, axis=-1, keepdims=True)
            p = jnp.exp(e_h)
            att = p * pl.reciprocal(jnp.sum(p, axis=-1, keepdims=True), approx=True)
            ctx_sc[j * W:(j + 1) * W, sl] = jnp.dot(
                att.astype(mm), v_slab[:, sl], preferred_element_type=jnp.float32)

    # ---- fc_out + residual + LayerNorm1 (dropout = identity in eval) ---------
    x = jnp.dot(ctx_sc[...].astype(mm), wfc_ref[...],
                preferred_element_type=jnp.float32) + bfc_ref[...]
    x = x + qres_ref[0]
    mu = jnp.mean(x, axis=-1, keepdims=True)
    var = jnp.mean((x - mu) ** 2, axis=-1, keepdims=True)
    x = (x - mu) * jax.lax.rsqrt(var + 1e-5) * g1_ref[...] + beta1_ref[...]

    # ---- FFN (Linear -> GELU tanh -> Linear) + residual + LayerNorm2 ---------
    h1 = jnp.dot(x.astype(mm), w1_ref[...],
                 preferred_element_type=jnp.float32) + b1_ref[...]
    c = math.sqrt(2.0 / math.pi)
    h1 = 0.5 * h1 * (1.0 + jnp.tanh(c * (h1 + 0.044715 * h1 * h1 * h1)))
    y = jnp.dot(h1.astype(mm), w2_ref[...],
                preferred_element_type=jnp.float32) + b2_ref[...]
    y = y + x
    mu = jnp.mean(y, axis=-1, keepdims=True)
    var = jnp.mean((y - mu) ** 2, axis=-1, keepdims=True)
    out_ref[0] = ((y - mu) * jax.lax.rsqrt(var + 1e-5) * g2_ref[...]
                  + beta2_ref[...]).astype(out_ref.dtype)


# ---------------------------------------------------------------------------
# Wrapper
# ---------------------------------------------------------------------------
def _per_head_linear(x, w, heads):
    """torch y = x.view(n,L,H,D) @ w.T, in f32 (shared per-head Linear, no bias)."""
    n, L, E = x.shape
    D = E // heads
    y = jnp.einsum('nlhd,ed->nlhe',
                   x.reshape(n, L, heads, D).astype(jnp.float32),
                   w.astype(jnp.float32))
    return y.reshape(n, L, E)


def _pick_windows_per_block(num_windows, W, L, target_rows=256):
    best = 1
    for wb in range(1, num_windows + 1):
        if num_windows % wb:
            continue
        rows = wb * W
        if rows > max(target_rows, W):
            break
        if rows % 8 == 0 or rows == L:
            best = wb
    return best


def transformer_block(value, key, query, mask, params, *, heads, window_size,
                      forward_expansion, matmul_dtype=jnp.bfloat16,
                      out_dtype=jnp.float32, slab_align=128,
                      windows_per_block=None):
    n, L, E = query.shape
    assert E % heads == 0
    D = E // heads
    F = forward_expansion
    W = window_size
    ov = W // 8
    S = W + 2 * ov
    assert L % W == 0, "kernel requires seq_len % window_size == 0"
    assert L >= S, "kernel requires seq_len >= window_size + 2*overlap"
    num_windows = L // W

    # MXU-aligned slab length (128 is enough on v5e; pass slab_align=256 on v6e/v7x).
    SP = slab_align * ((S + slab_align - 1) // slab_align) if slab_align else S
    SP = max(SP, S)

    WB = windows_per_block or _pick_windows_per_block(num_windows, W, L)
    assert num_windows % WB == 0
    num_blocks = num_windows // WB
    RB = WB * W                              # query rows processed per grid step

    mm = matmul_dtype
    inv_scale = 1.0 / math.sqrt(D)

    # --- pre-project Q/K/V with the shared per-head weights (outside the kernel) ---
    q_proj = _per_head_linear(query, params["wq"] * inv_scale, heads).astype(mm)
    k_proj = _per_head_linear(key, params["wk"], heads).astype(mm)
    v_proj = _per_head_linear(value, params["wv"], heads).astype(mm)

    # --- per-window overlapping K/V slabs (bf16), padded to SP with masked rows ---
    starts = np.clip(np.arange(num_windows) * W - ov, 0, L - S)
    gather_idx = np.clip(starts[:, None] + np.arange(SP)[None, :], 0, L - 1)
    k_slabs = k_proj[:, gather_idx, :]       # (n, num_windows, SP, E)
    v_slabs = v_proj[:, gather_idx, :]

    wfc_t = params["wfc"].T.astype(mm)                 # (E, E)
    w1_t = params["w1"].T.astype(mm)                   # (E, F*E)
    w2_t = params["w2"].T.astype(mm)                   # (F*E, E)
    bfc = params["bfc"].reshape(1, E).astype(jnp.float32)
    b1 = params["b1"].reshape(1, F * E).astype(jnp.float32)
    b2 = params["b2"].reshape(1, E).astype(jnp.float32)
    g1 = params["g1"].reshape(1, E).astype(jnp.float32)
    beta1 = params["beta1"].reshape(1, E).astype(jnp.float32)
    g2 = params["g2"].reshape(1, E).astype(jnp.float32)
    beta2 = params["beta2"].reshape(1, E).astype(jnp.float32)
    mask3 = mask.reshape(n, L, 1).astype(jnp.float32)

    kernel = partial(_block_kernel, window_size=W, overlap=ov, seq_len=L,
                     heads=heads, head_dim=D, windows_per_block=WB, slab_len=SP)

    # --- VMEM budget (double-buffered activations, weights counted at 2x for safety) ---
    def nbytes(shape, dt):
        return int(np.prod(shape)) * np.dtype(dt).itemsize
    est = (2 * nbytes((RB, E), mm) + 2 * nbytes((RB, E), jnp.float32)
           + 4 * nbytes((WB, SP, E), mm) + 2 * nbytes((RB, 1), jnp.float32)
           + 2 * nbytes((RB, E), out_dtype)
           + 2 * (nbytes((E, E), mm) + nbytes((E, F * E), mm) + nbytes((F * E, E), mm))
           + 2 * 7 * nbytes((1, max(E, F * E)), jnp.float32)
           + nbytes((RB, E), jnp.float32))
    vmem_limit = int(min(64 << 20, max(16 << 20, 2 * est)))

    def build_call(single_buffer_weights):
        def const_spec(shape):
            idx = lambda b, g, _r=len(shape): (0,) * _r
            if single_buffer_weights:
                try:
                    return pl.BlockSpec(shape, idx, pipeline_mode=pl.Buffered(1))
                except TypeError:          # older jax without pipeline_mode kwarg
                    pass
            return pl.BlockSpec(shape, idx)

        in_specs = [
            pl.BlockSpec((1, RB, E), lambda b, g: (b, g, 0)),          # projected Q (bf16)
            pl.BlockSpec((1, RB, E), lambda b, g: (b, g, 0)),          # original Q (residual)
            pl.BlockSpec((1, WB, SP, E), lambda b, g: (b, g, 0, 0)),   # K slabs
            pl.BlockSpec((1, WB, SP, E), lambda b, g: (b, g, 0, 0)),   # V slabs
            pl.BlockSpec((1, RB, 1), lambda b, g: (b, g, 0)),          # query-row mask
            const_spec((E, E)),            # fc_out weight (transposed)
            const_spec((1, E)),            # fc_out bias
            const_spec((1, E)),            # LN1 gamma
            const_spec((1, E)),            # LN1 beta
            const_spec((E, F * E)),        # FFN W1 (transposed)
            const_spec((1, F * E)),        # FFN b1
            const_spec((F * E, E)),        # FFN W2 (transposed)
            const_spec((1, E)),            # FFN b2
            const_spec((1, E)),            # LN2 gamma
            const_spec((1, E)),            # LN2 beta
        ]
        return pl.pallas_call(
            kernel,
            out_shape=jax.ShapeDtypeStruct((n, L, E), out_dtype),
            grid=(n, num_blocks),
            in_specs=in_specs,
            out_specs=pl.BlockSpec((1, RB, E), lambda b, g: (b, g, 0)),
            scratch_shapes=[pltpu.VMEM((RB, E), jnp.float32)],         # head-context scratch
            compiler_params=pltpu.CompilerParams(
                dimension_semantics=("parallel", "parallel"),
                vmem_limit_bytes=vmem_limit),
        )

    args = (q_proj, query.astype(jnp.float32), k_slabs, v_slabs, mask3,
            wfc_t, bfc, g1, beta1, w1_t, b1, w2_t, b2, g2, beta2)
    try:
        return build_call(True)(*args)
    except Exception:
        # Fallback: retry with default (double-buffered) weight blocks.
        return build_call(False)(*args)


# ---------------------------------------------------------------------------
# Pure-JAX f32 reference (mirrors the PyTorch forward, eval mode)
# ---------------------------------------------------------------------------
def reference(value, key, query, mask, p, *, heads, window_size):
    n, L, E = query.shape
    D = E // heads
    ov = window_size // 8
    v = value.reshape(n, L, heads, D) @ p["wv"].T
    k = key.reshape(n, L, heads, D) @ p["wk"].T
    q = query.reshape(n, L, heads, D) @ p["wq"].T
    full = jnp.zeros((n, L, heads, D), jnp.float32)
    for i in range(0, L, window_size):
        we = min(i + window_size, L)
        s, e = max(0, i - ov), min(L, we + ov)
        lq, lk, lv = q[:, i:we], k[:, s:e], v[:, s:e]
        en = jnp.einsum("nqhd,nkhd->nhqk", lq, lk)
        lm = mask[:, i:we].astype(jnp.float32)[:, None, :, None]
        en = jnp.where(lm == 0.0, -1e10, en)
        att = jax.nn.softmax(en / math.sqrt(D), axis=3)
        full = full.at[:, i:we].set(jnp.einsum("nhql,nlhd->nqhd", att, lv))

    def ln(x, g, b):
        m = jnp.mean(x, -1, keepdims=True)
        var = jnp.mean((x - m) ** 2, -1, keepdims=True)
        return (x - m) / jnp.sqrt(var + 1e-5) * g + b

    x = full.reshape(n, L, E) @ p["wfc"].T + p["bfc"]
    x = ln(x + query, p["g1"], p["beta1"])
    h = x @ p["w1"].T + p["b1"]
    c = math.sqrt(2.0 / math.pi)
    h = 0.5 * h * (1.0 + jnp.tanh(c * (h + 0.044715 * h ** 3)))
    y = h @ p["w2"].T + p["b2"] + x
    return ln(y, p["g2"], p["beta2"])


# ---------------------------------------------------------------------------
if __name__ == "__main__":
    N, L, E, H, W, F = 2, 16, 32, 4, 8, 2       # batch, seq, embed, heads, window, expansion
    D = E // H

    key0 = jax.random.PRNGKey(0)
    ks = jax.random.split(key0, 12)

    params = {
        "wv":    jax.random.normal(ks[0], (D, D), jnp.float32) * 0.1,
        "wk":    jax.random.normal(ks[1], (D, D), jnp.float32) * 0.1,
        "wq":    jax.random.normal(ks[2], (D, D), jnp.float32) * 0.1,
        "wfc":   jax.random.normal(ks[3], (E, H * D), jnp.float32) * 0.1,
        "bfc":   jax.random.normal(ks[4], (E,), jnp.float32) * 0.1,
        "g1":    jnp.ones((E,), jnp.float32),
        "beta1": jnp.zeros((E,), jnp.float32),
        "w1":    jax.random.normal(ks[5], (F * E, E), jnp.float32) * 0.1,
        "b1":    jax.random.normal(ks[6], (F * E,), jnp.float32) * 0.1,
        "w2":    jax.random.normal(ks[7], (E, F * E), jnp.float32) * 0.1,
        "b2":    jax.random.normal(ks[8], (E,), jnp.float32) * 0.1,
        "g2":    jnp.ones((E,), jnp.float32),
        "beta2": jnp.zeros((E,), jnp.float32),
    }

    value = jax.random.normal(ks[9], (N, L, E), jnp.float32)
    keyt = jax.random.normal(ks[10], (N, L, E), jnp.float32)
    query = jax.random.normal(ks[11], (N, L, E), jnp.float32)
    mask = jnp.ones((N, L), jnp.int32).at[:, L - 3:].set(0)   # exercise masking path

    out = transformer_block(value, keyt, query, mask, params,
                            heads=H, window_size=W, forward_expansion=F)
    out = jax.block_until_ready(out)

    ref = reference(value, keyt, query, mask, params, heads=H, window_size=W)
    assert out.shape == (N, L, E)
    err = float(jnp.max(jnp.abs(out - ref)))
    # bf16 matmul inputs (f32 accumulation / statistics) vs a pure-f32 reference.
    assert jnp.allclose(out, ref, atol=3e-2, rtol=3e-2), f"max abs err {err}"

    print("KERNEL_OK")
</pallas_src>

<mosaic_0001>
module attributes {stable_mosaic.version = 11 : i64} {
  func.func @_block_kernel(%arg0: i32, %arg1: i32, %arg2: memref<1x16x32xbf16, #tpu.memory_space<vmem>>, %arg3: memref<1x16x32xf32, #tpu.memory_space<vmem>>, %arg4: memref<1x2x128x32xbf16, #tpu.memory_space<vmem>>, %arg5: memref<1x2x128x32xbf16, #tpu.memory_space<vmem>>, %arg6: memref<1x16x1xf32, #tpu.memory_space<vmem>>, %arg7: memref<32x32xbf16, #tpu.memory_space<vmem>>, %arg8: memref<1x32xf32, #tpu.memory_space<vmem>>, %arg9: memref<1x32xf32, #tpu.memory_space<vmem>>, %arg10: memref<1x32xf32, #tpu.memory_space<vmem>>, %arg11: memref<32x64xbf16, #tpu.memory_space<vmem>>, %arg12: memref<1x64xf32, #tpu.memory_space<vmem>>, %arg13: memref<64x32xbf16, #tpu.memory_space<vmem>>, %arg14: memref<1x32xf32, #tpu.memory_space<vmem>>, %arg15: memref<1x32xf32, #tpu.memory_space<vmem>>, %arg16: memref<1x32xf32, #tpu.memory_space<vmem>>, %arg17: memref<1x16x32xf32, #tpu.memory_space<vmem>>, %arg18: memref<16x32xf32, #tpu.memory_space<vmem>>) attributes {dimension_semantics = [#tpu.dimension_semantics<parallel>, #tpu.dimension_semantics<parallel>], iteration_bounds = array<i64: 2, 1>, scalar_prefetch = 0 : i64, scratch_operands = 1 : i64, tpu.core_type = #tpu.core_type<tc>, window_params = [{transform_indices = @transform_0, window_bounds = array<i64: 1, 16, 32>}, {transform_indices = @transform_1, window_bounds = array<i64: 1, 16, 32>}, {transform_indices = @transform_2, window_bounds = array<i64: 1, 2, 128, 32>}, {transform_indices = @transform_3, window_bounds = array<i64: 1, 2, 128, 32>}, {transform_indices = @transform_4, window_bounds = array<i64: 1, 16, 1>}, {pipeline_mode = #tpu.pipeline_mode<synchronous>, transform_indices = @transform_5, window_bounds = array<i64: 32, 32>}, {pipeline_mode = #tpu.pipeline_mode<synchronous>, transform_indices = @transform_6, window_bounds = array<i64: 1, 32>}, {pipeline_mode = #tpu.pipeline_mode<synchronous>, transform_indices = @transform_7, window_bounds = array<i64: 1, 32>}, {pipeline_mode = #tpu.pipeline_mode<synchronous>, transform_indices = @transform_8, window_bounds = array<i64: 1, 32>}, {pipeline_mode = #tpu.pipeline_mode<synchronous>, transform_indices = @transform_9, window_bounds = array<i64: 32, 64>}, {pipeline_mode = #tpu.pipeline_mode<synchronous>, transform_indices = @transform_10, window_bounds = array<i64: 1, 64>}, {pipeline_mode = #tpu.pipeline_mode<synchronous>, transform_indices = @transform_11, window_bounds = array<i64: 64, 32>}, {pipeline_mode = #tpu.pipeline_mode<synchronous>, transform_indices = @transform_12, window_bounds = array<i64: 1, 32>}, {pipeline_mode = #tpu.pipeline_mode<synchronous>, transform_indices = @transform_13, window_bounds = array<i64: 1, 32>}, {pipeline_mode = #tpu.pipeline_mode<synchronous>, transform_indices = @transform_14, window_bounds = array<i64: 1, 32>}, {transform_indices = @transform_15, window_bounds = array<i64: 1, 16, 32>}]} {
    %c0 = arith.constant 0 : index
    %c0_0 = arith.constant 0 : index
    %c0_1 = arith.constant 0 : index
    %0 = vector.load %arg2[%c0, %c0_0, %c0_1] : memref<1x16x32xbf16, #tpu.memory_space<vmem>>, vector<1x16x32xbf16>
    %1 = vector.shape_cast %0 : vector<1x16x32xbf16> to vector<16x32xbf16>
    %c2_i32 = arith.constant 2 : i32
    %2 = arith.muli %arg1, %c2_i32 : i32
    %c0_i32 = arith.constant 0 : i32
    %3 = arith.addi %2, %c0_i32 : i32
    %c8_i32 = arith.constant 8 : i32
    %4 = arith.muli %3, %c8_i32 : i32
    %c1_i32 = arith.constant 1 : i32
    %5 = arith.subi %4, %c1_i32 : i32
    %c0_i32_2 = arith.constant 0 : i32
    %6 = arith.maxsi %5, %c0_i32_2 : i32
    %c8_i32_3 = arith.constant 8 : i32
    %7 = arith.addi %4, %c8_i32_3 : i32
    %c1_i32_4 = arith.constant 1 : i32
    %8 = arith.addi %7, %c1_i32_4 : i32
    %c16_i32 = arith.constant 16 : i32
    %9 = arith.minsi %8, %c16_i32 : i32
    %c1_i32_5 = arith.constant 1 : i32
    %10 = arith.subi %4, %c1_i32_5 : i32
    %c0_i32_6 = arith.constant 0 : i32
    %c6_i32 = arith.constant 6 : i32
    %11 = arith.maxsi %c0_i32_6, %10 : i32
    %12 = arith.minsi %c6_i32, %11 : i32
    %13 = tpu.iota {dimensions = array<i32: 1>} : vector<1x128xi32>
    %14 = vector.broadcast %12 : i32 to vector<1x128xi32>
    %15 = arith.addi %14, %13 : vector<1x128xi32>
    %16 = vector.broadcast %6 : i32 to vector<1x128xi32>
    %17 = arith.cmpi slt, %15, %16 : vector<1x128xi32>
    %18 = vector.broadcast %9 : i32 to vector<1x128xi32>
    %19 = arith.cmpi sge, %15, %18 : vector<1x128xi32>
    %20 = arith.ori %17, %19 : vector<1x128xi1>
    %cst = arith.constant -1.000000e+30 : f32
    %cst_7 = arith.constant -1.000000e+10 : f32
    %21 = vector.broadcast %cst : f32 to vector<1x128xf32>
    %22 = vector.broadcast %cst_7 : f32 to vector<1x128xf32>
    %23 = arith.select %20, %21, %22 : vector<1x128xi1>, vector<1x128xf32>
    %c0_8 = arith.constant 0 : index
    %c0_9 = arith.constant 0 : index
    %c0_10 = arith.constant 0 : index
    %24 = vector.load %arg6[%c0_8, %c0_9, %c0_10] : memref<1x16x1xf32, #tpu.memory_space<vmem>>, vector<1x8x1xf32>
    %25 = vector.shape_cast %24 : vector<1x8x1xf32> to vector<8x1xf32>
    %cst_11 = arith.constant 0.000000e+00 : f32
    %26 = vector.broadcast %cst_11 : f32 to vector<8x1xf32>
    %27 = arith.cmpf oeq, %25, %26 : vector<8x1xf32>
    %28 = vector.broadcast %27 : vector<8x1xi1> to vector<8x128xi1>
    %29 = vector.broadcast %20 : vector<1x128xi1> to vector<8x128xi1>
    %30 = arith.ori %28, %29 : vector<8x128xi1>
    %31 = vector.extract_strided_slice %1 {offsets = [0, 0], sizes = [8, 32], strides = [1, 1]} : vector<16x32xbf16> to vector<8x32xbf16>
    %c0_12 = arith.constant 0 : index
    %c0_13 = arith.constant 0 : index
    %c0_14 = arith.constant 0 : index
    %c0_15 = arith.constant 0 : index
    %32 = vector.load %arg4[%c0_12, %c0_13, %c0_14, %c0_15] : memref<1x2x128x32xbf16, #tpu.memory_space<vmem>>, vector<1x1x128x32xbf16>
    %33 = vector.shape_cast %32 : vector<1x1x128x32xbf16> to vector<128x32xbf16>
    %c0_16 = arith.constant 0 : index
    %c0_17 = arith.constant 0 : index
    %c0_18 = arith.constant 0 : index
    %c0_19 = arith.constant 0 : index
    %34 = vector.load %arg5[%c0_16, %c0_17, %c0_18, %c0_19] : memref<1x2x128x32xbf16, #tpu.memory_space<vmem>>, vector<1x1x128x32xbf16>
    %35 = vector.shape_cast %34 : vector<1x1x128x32xbf16> to vector<128x32xbf16>
    %36 = vector.extract_strided_slice %31 {offsets = [0, 0], sizes = [8, 8], strides = [1, 1]} : vector<8x32xbf16> to vector<8x8xbf16>
    %37 = vector.extract_strided_slice %33 {offsets = [0, 0], sizes = [128, 8], strides = [1, 1]} : vector<128x32xbf16> to vector<128x8xbf16>
    %cst_20 = arith.constant dense<0.000000e+00> : vector<8x128xf32>
    %38 = tpu.matmul %36, %37, %cst_20 {dimension_numbers = #tpu.dot_dimension_numbers<[1], [1], [0], [0], [0, 0, 1, 0], [], []>} : vector<8x8xbf16>, vector<128x8xbf16>, vector<8x128xf32> -> vector<8x128xf32>
    %39 = vector.shape_cast %23 : vector<1x128xf32> to vector<1x128xf32>
    %40 = vector.broadcast %39 : vector<1x128xf32> to vector<8x128xf32>
    %41 = arith.select %30, %40, %38 : vector<8x128xi1>, vector<8x128xf32>
    %cst_21 = arith.constant dense<0xFF800000> : vector<8xf32>
    %42 = vector.multi_reduction <maximumf>, %41, %cst_21 [1] : vector<8x128xf32> to vector<8xf32>
    %43 = vector.shape_cast %42 : vector<8xf32> to vector<8x1xf32>
    %44 = vector.broadcast %43 : vector<8x1xf32> to vector<8x128xf32>
    %45 = arith.subf %41, %44 : vector<8x128xf32>
    %46 = math.exp %45 : vector<8x128xf32>
    %cst_22 = arith.constant dense<0.000000e+00> : vector<8xf32>
    %47 = vector.multi_reduction <add>, %46, %cst_22 [1] : vector<8x128xf32> to vector<8xf32>
    %48 = vector.shape_cast %47 : vector<8xf32> to vector<8x1xf32>
    %49 = tpu.reciprocal %48 {approx = true} : vector<8x1xf32> -> vector<8x1xf32>
    %50 = vector.broadcast %49 : vector<8x1xf32> to vector<8x128xf32>
    %51 = arith.mulf %46, %50 : vector<8x128xf32>
    %52 = arith.truncf %51 : vector<8x128xf32> to vector<8x128xbf16>
    %53 = vector.extract_strided_slice %35 {offsets = [0, 0], sizes = [128, 8], strides = [1, 1]} : vector<128x32xbf16> to vector<128x8xbf16>
    %cst_23 = arith.constant dense<0.000000e+00> : vector<8x8xf32>
    %54 = tpu.matmul %52, %53, %cst_23 {dimension_numbers = #tpu.dot_dimension_numbers<[1], [0], [0], [1], [0, 0, 1, 1], [], []>} : vector<8x128xbf16>, vector<128x8xbf16>, vector<8x8xf32> -> vector<8x8xf32>
    %c0_24 = arith.constant 0 : index
    %c0_25 = arith.constant 0 : index
    %55 = vector.load %arg18[%c0_24, %c0_25] : memref<16x32xf32, #tpu.memory_space<vmem>>, vector<8x8xf32>
    tpu.vector_store %arg18[%c0_24, %c0_25], %54 {strides = array<i32>} : memref<16x32xf32, #tpu.memory_space<vmem>>, vector<8x8xf32>,
    %56 = vector.extract_strided_slice %31 {offsets = [0, 8], sizes = [8, 8], strides = [1, 1]} : vector<8x32xbf16> to vector<8x8xbf16>
    %57 = vector.extract_strided_slice %33 {offsets = [0, 8], sizes = [128, 8], strides = [1, 1]} : vector<128x32xbf16> to vector<128x8xbf16>
    %cst_26 = arith.constant dense<0.000000e+00> : vector<8x128xf32>
    %58 = tpu.matmul %56, %57, %cst_26 {dimension_numbers = #tpu.dot_dimension_numbers<[1], [1], [0], [0], [0, 0, 1, 0], [], []>} : vector<8x8xbf16>, vector<128x8xbf16>, vector<8x128xf32> -> vector<8x128xf32>
    %59 = vector.shape_cast %23 : vector<1x128xf32> to vector<1x128xf32>
    %60 = vector.broadcast %59 : vector<1x128xf32> to vector<8x128xf32>
    %61 = arith.select %30, %60, %58 : vector<8x128xi1>, vector<8x128xf32>
    %cst_27 = arith.constant dense<0xFF800000> : vector<8xf32>
    %62 = vector.multi_reduction <maximumf>, %61, %cst_27 [1] : vector<8x128xf32> to vector<8xf32>
    %63 = vector.shape_cast %62 : vector<8xf32> to vector<8x1xf32>
    %64 = vector.broadcast %63 : vector<8x1xf32> to vector<8x128xf32>
    %65 = arith.subf %61, %64 : vector<8x128xf32>
    %66 = math.exp %65 : vector<8x128xf32>
    %cst_28 = arith.constant dense<0.000000e+00> : vector<8xf32>
    %67 = vector.multi_reduction <add>, %66, %cst_28 [1] : vector<8x128xf32> to vector<8xf32>
    %68 = vector.shape_cast %67 : vector<8xf32> to vector<8x1xf32>
    %69 = tpu.reciprocal %68 {approx = true} : vector<8x1xf32> -> vector<8x1xf32>
    %70 = vector.broadcast %69 : vector<8x1xf32> to vector<8x128xf32>
    %71 = arith.mulf %66, %70 : vector<8x128xf32>
    %72 = arith.truncf %71 : vector<8x128xf32> to vector<8x128xbf16>
    %73 = vector.extract_strided_slice %35 {offsets = [0, 8], sizes = [128, 8], strides = [1, 1]} : vector<128x32xbf16> to vector<128x8xbf16>
    %cst_29 = arith.constant dense<0.000000e+00> : vector<8x8xf32>
    %74 = tpu.matmul %72, %73, %cst_29 {dimension_numbers = #tpu.dot_dimension_numbers<[1], [0], [0], [1], [0, 0, 1, 1], [], []>} : vector<8x128xbf16>, vector<128x8xbf16>, vector<8x8xf32> -> vector<8x8xf32>
    %c0_30 = arith.constant 0 : index
    %c8 = arith.constant 8 : index
    %75 = vector.load %arg18[%c0_30, %c8] : memref<16x32xf32, #tpu.memory_space<vmem>>, vector<8x8xf32>
    tpu.vector_store %arg18[%c0_30, %c8], %74 {strides = array<i32>} : memref<16x32xf32, #tpu.memory_space<vmem>>, vector<8x8xf32>,
    %76 = vector.extract_strided_slice %31 {offsets = [0, 16], sizes = [8, 8], strides = [1, 1]} : vector<8x32xbf16> to vector<8x8xbf16>
    %77 = vector.extract_strided_slice %33 {offsets = [0, 16], sizes = [128, 8], strides = [1, 1]} : vector<128x32xbf16> to vector<128x8xbf16>
    %cst_31 = arith.constant dense<0.000000e+00> : vector<8x128xf32>
    %78 = tpu.matmul %76, %77, %cst_31 {dimension_numbers = #tpu.dot_dimension_numbers<[1], [1], [0], [0], [0, 0, 1, 0], [], []>} : vector<8x8xbf16>, vector<128x8xbf16>, vector<8x128xf32> -> vector<8x128xf32>
    %79 = vector.shape_cast %23 : vector<1x128xf32> to vector<1x128xf32>
    %80 = vector.broadcast %79 : vector<1x128xf32> to vector<8x128xf32>
    %81 = arith.select %30, %80, %78 : vector<8x128xi1>, vector<8x128xf32>
    %cst_32 = arith.constant dense<0xFF800000> : vector<8xf32>
    %82 = vector.multi_reduction <maximumf>, %81, %cst_32 [1] : vector<8x128xf32> to vector<8xf32>
    %83 = vector.shape_cast %82 : vector<8xf32> to vector<8x1xf32>
    %84 = vector.broadcast %83 : vector<8x1xf32> to vector<8x128xf32>
    %85 = arith.subf %81, %84 : vector<8x128xf32>
    %86 = math.exp %85 : vector<8x128xf32>
    %cst_33 = arith.constant dense<0.000000e+00> : vector<8xf32>
    %87 = vector.multi_reduction <add>, %86, %cst_33 [1] : vector<8x128xf32> to vector<8xf32>
    %88 = vector.shape_cast %87 : vector<8xf32> to vector<8x1xf32>
    %89 = tpu.reciprocal %88 {approx = true} : vector<8x1xf32> -> vector<8x1xf32>
    %90 = vector.broadcast %89 : vector<8x1xf32> to vector<8x128xf32>
    %91 = arith.mulf %86, %90 : vector<8x128xf32>
    %92 = arith.truncf %91 : vector<8x128xf32> to vector<8x128xbf16>
    %93 = vector.extract_strided_slice %35 {offsets = [0, 16], sizes = [128, 8], strides = [1, 1]} : vector<128x32xbf16> to vector<128x8xbf16>
    %cst_34 = arith.constant dense<0.000000e+00> : vector<8x8xf32>
    %94 = tpu.matmul %92, %93, %cst_34 {dimension_numbers = #tpu.dot_dimension_numbers<[1], [0], [0], [1], [0, 0, 1, 1], [], []>} : vector<8x128xbf16>, vector<128x8xbf16>, vector<8x8xf32> -> vector<8x8xf32>
    %c0_35 = arith.constant 0 : index
    %c16 = arith.constant 16 : index
    %95 = vector.load %arg18[%c0_35, %c16] : memref<16x32xf32, #tpu.memory_space<vmem>>, vector<8x8xf32>
    tpu.vector_store %arg18[%c0_35, %c16], %94 {strides = array<i32>} : memref<16x32xf32, #tpu.memory_space<vmem>>, vector<8x8xf32>,
    %96 = vector.extract_strided_slice %31 {offsets = [0, 24], sizes = [8, 8], strides = [1, 1]} : vector<8x32xbf16> to vector<8x8xbf16>
    %97 = vector.extract_strided_slice %33 {offsets = [0, 24], sizes = [128, 8], strides = [1, 1]} : vector<128x32xbf16> to vector<128x8xbf16>
    %cst_36 = arith.constant dense<0.000000e+00> : vector<8x128xf32>
    %98 = tpu.matmul %96, %97, %cst_36 {dimension_numbers = #tpu.dot_dimension_numbers<[1], [1], [0], [0], [0, 0, 1, 0], [], []>} : vector<8x8xbf16>, vector<128x8xbf16>, vector<8x128xf32> -> vector<8x128xf32>
    %99 = vector.shape_cast %23 : vector<1x128xf32> to vector<1x128xf32>
    %100 = vector.broadcast %99 : vector<1x128xf32> to vector<8x128xf32>
    %101 = arith.select %30, %100, %98 : vector<8x128xi1>, vector<8x128xf32>
    %cst_37 = arith.constant dense<0xFF800000> : vector<8xf32>
    %102 = vector.multi_reduction <maximumf>, %101, %cst_37 [1] : vector<8x128xf32> to vector<8xf32>
    %103 = vector.shape_cast %102 : vector<8xf32> to vector<8x1xf32>
    %104 = vector.broadcast %103 : vector<8x1xf32> to vector<8x128xf32>
    %105 = arith.subf %101, %104 : vector<8x128xf32>
    %106 = math.exp %105 : vector<8x128xf32>
    %cst_38 = arith.constant dense<0.000000e+00> : vector<8xf32>
    %107 = vector.multi_reduction <add>, %106, %cst_38 [1] : vector<8x128xf32> to vector<8xf32>
    %108 = vector.shape_cast %107 : vector<8xf32> to vector<8x1xf32>
    %109 = tpu.reciprocal %108 {approx = true} : vector<8x1xf32> -> vector<8x1xf32>
    %110 = vector.broadcast %109 : vector<8x1xf32> to vector<8x128xf32>
    %111 = arith.mulf %106, %110 : vector<8x128xf32>
    %112 = arith.truncf %111 : vector<8x128xf32> to vector<8x128xbf16>
    %113 = vector.extract_strided_slice %35 {offsets = [0, 24], sizes = [128, 8], strides = [1, 1]} : vector<128x32xbf16> to vector<128x8xbf16>
    %cst_39 = arith.constant dense<0.000000e+00> : vector<8x8xf32>
    %114 = tpu.matmul %112, %113, %cst_39 {dimension_numbers = #tpu.dot_dimension_numbers<[1], [0], [0], [1], [0, 0, 1, 1], [], []>} : vector<8x128xbf16>, vector<128x8xbf16>, vector<8x8xf32> -> vector<8x8xf32>
    %c0_40 = arith.constant 0 : index
    %c24 = arith.constant 24 : index
    %115 = vector.load %arg18[%c0_40, %c24] : memref<16x32xf32, #tpu.memory_space<vmem>>, vector<8x8xf32>
    tpu.vector_store %arg18[%c0_40, %c24], %114 {strides = array<i32>} : memref<16x32xf32, #tpu.memory_space<vmem>>, vector<8x8xf32>,
    %c2_i32_41 = arith.constant 2 : i32
    %116 = arith.muli %arg1, %c2_i32_41 : i32
    %c1_i32_42 = arith.constant 1 : i32
    %117 = arith.addi %116, %c1_i32_42 : i32
    %c8_i32_43 = arith.constant 8 : i32
    %118 = arith.muli %117, %c8_i32_43 : i32
    %c1_i32_44 = arith.constant 1 : i32
    %119 = arith.subi %118, %c1_i32_44 : i32
    %c0_i32_45 = arith.constant 0 : i32
    %120 = arith.maxsi %119, %c0_i32_45 : i32
    %c8_i32_46 = arith.constant 8 : i32
    %121 = arith.addi %118, %c8_i32_46 : i32
    %c1_i32_47 = arith.constant 1 : i32
    %122 = arith.addi %121, %c1_i32_47 : i32
    %c16_i32_48 = arith.constant 16 : i32
    %123 = arith.minsi %122, %c16_i32_48 : i32
    %c1_i32_49 = arith.constant 1 : i32
    %124 = arith.subi %118, %c1_i32_49 : i32
    %c0_i32_50 = arith.constant 0 : i32
    %c6_i32_51 = arith.constant 6 : i32
    %125 = arith.maxsi %c0_i32_50, %124 : i32
    %126 = arith.minsi %c6_i32_51, %125 : i32
    %127 = tpu.iota {dimensions = array<i32: 1>} : vector<1x128xi32>
    %128 = vector.broadcast %126 : i32 to vector<1x128xi32>
    %129 = arith.addi %128, %127 : vector<1x128xi32>
    %130 = vector.broadcast %120 : i32 to vector<1x128xi32>
    %131 = arith.cmpi slt, %129, %130 : vector<1x128xi32>
    %132 = vector.broadcast %123 : i32 to vector<1x128xi32>
    %133 = arith.cmpi sge, %129, %132 : vector<1x128xi32>
    %134 = arith.ori %131, %133 : vector<1x128xi1>
    %cst_52 = arith.constant -1.000000e+30 : f32
    %cst_53 = arith.constant -1.000000e+10 : f32
    %135 = vector.broadcast %cst_52 : f32 to vector<1x128xf32>
    %136 = vector.broadcast %cst_53 : f32 to vector<1x128xf32>
    %137 = arith.select %134, %135, %136 : vector<1x128xi1>, vector<1x128xf32>
    %c0_54 = arith.constant 0 : index
    %c8_55 = arith.constant 8 : index
    %c0_56 = arith.constant 0 : index
    %138 = vector.load %arg6[%c0_54, %c8_55, %c0_56] : memref<1x16x1xf32, #tpu.memory_space<vmem>>, vector<1x8x1xf32>
    %139 = vector.shape_cast %138 : vector<1x8x1xf32> to vector<8x1xf32>
    %cst_57 = arith.constant 0.000000e+00 : f32
    %140 = vector.broadcast %cst_57 : f32 to vector<8x1xf32>
    %141 = arith.cmpf oeq, %139, %140 : vector<8x1xf32>
    %142 = vector.broadcast %141 : vector<8x1xi1> to vector<8x128xi1>
    %143 = vector.broadcast %134 : vector<1x128xi1> to vector<8x128xi1>
    %144 = arith.ori %142, %143 : vector<8x128xi1>
    %145 = vector.extract_strided_slice %1 {offsets = [8, 0], sizes = [8, 32], strides = [1, 1]} : vector<16x32xbf16> to vector<8x32xbf16>
    %c0_58 = arith.constant 0 : index
    %c1 = arith.constant 1 : index
    %c0_59 = arith.constant 0 : index
    %c0_60 = arith.constant 0 : index
    %146 = vector.load %arg4[%c0_58, %c1, %c0_59, %c0_60] : memref<1x2x128x32xbf16, #tpu.memory_space<vmem>>, vector<1x1x128x32xbf16>
    %147 = vector.shape_cast %146 : vector<1x1x128x32xbf16> to vector<128x32xbf16>
    %c0_61 = arith.constant 0 : index
    %c1_62 = arith.constant 1 : index
    %c0_63 = arith.constant 0 : index
    %c0_64 = arith.constant 0 : index
    %148 = vector.load %arg5[%c0_61, %c1_62, %c0_63, %c0_64] : memref<1x2x128x32xbf16, #tpu.memory_space<vmem>>, vector<1x1x128x32xbf16>
    %149 = vector.shape_cast %148 : vector<1x1x128x32xbf16> to vector<128x32xbf16>
    %150 = vector.extract_strided_slice %145 {offsets = [0, 0], sizes = [8, 8], strides = [1, 1]} : vector<8x32xbf16> to vector<8x8xbf16>
    %151 = vector.extract_strided_slice %147 {offsets = [0, 0], sizes = [128, 8], strides = [1, 1]} : vector<128x32xbf16> to vector<128x8xbf16>
    %cst_65 = arith.constant dense<0.000000e+00> : vector<8x128xf32>
    %152 = tpu.matmul %150, %151, %cst_65 {dimension_numbers = #tpu.dot_dimension_numbers<[1], [1], [0], [0], [0, 0, 1, 0], [], []>} : vector<8x8xbf16>, vector<128x8xbf16>, vector<8x128xf32> -> vector<8x128xf32>
    %153 = vector.shape_cast %137 : vector<1x128xf32> to vector<1x128xf32>
    %154 = vector.broadcast %153 : vector<1x128xf32> to vector<8x128xf32>
    %155 = arith.select %144, %154, %152 : vector<8x128xi1>, vector<8x128xf32>
    %cst_66 = arith.constant dense<0xFF800000> : vector<8xf32>
    %156 = vector.multi_reduction <maximumf>, %155, %cst_66 [1] : vector<8x128xf32> to vector<8xf32>
    %157 = vector.shape_cast %156 : vector<8xf32> to vector<8x1xf32>
    %158 = vector.broadcast %157 : vector<8x1xf32> to vector<8x128xf32>
    %159 = arith.subf %155, %158 : vector<8x128xf32>
    %160 = math.exp %159 : vector<8x128xf32>
    %cst_67 = arith.constant dense<0.000000e+00> : vector<8xf32>
    %161 = vector.multi_reduction <add>, %160, %cst_67 [1] : vector<8x128xf32> to vector<8xf32>
    %162 = vector.shape_cast %161 : vector<8xf32> to vector<8x1xf32>
    %163 = tpu.reciprocal %162 {approx = true} : vector<8x1xf32> -> vector<8x1xf32>
    %164 = vector.broadcast %163 : vector<8x1xf32> to vector<8x128xf32>
    %165 = arith.mulf %160, %164 : vector<8x128xf32>
    %166 = arith.truncf %165 : vector<8x128xf32> to vector<8x128xbf16>
    %167 = vector.extract_strided_slice %149 {offsets = [0, 0], sizes = [128, 8], strides = [1, 1]} : vector<128x32xbf16> to vector<128x8xbf16>
    %cst_68 = arith.constant dense<0.000000e+00> : vector<8x8xf32>
    %168 = tpu.matmul %166, %167, %cst_68 {dimension_numbers = #tpu.dot_dimension_numbers<[1], [0], [0], [1], [0, 0, 1, 1], [], []>} : vector<8x128xbf16>, vector<128x8xbf16>, vector<8x8xf32> -> vector<8x8xf32>
    %c8_69 = arith.constant 8 : index
    %c0_70 = arith.constant 0 : index
    %169 = vector.load %arg18[%c8_69, %c0_70] : memref<16x32xf32, #tpu.memory_space<vmem>>, vector<8x8xf32>
    tpu.vector_store %arg18[%c8_69, %c0_70], %168 {strides = array<i32>} : memref<16x32xf32, #tpu.memory_space<vmem>>, vector<8x8xf32>,
    %170 = vector.extract_strided_slice %145 {offsets = [0, 8], sizes = [8, 8], strides = [1, 1]} : vector<8x32xbf16> to vector<8x8xbf16>
    %171 = vector.extract_strided_slice %147 {offsets = [0, 8], sizes = [128, 8], strides = [1, 1]} : vector<128x32xbf16> to vector<128x8xbf16>
    %cst_71 = arith.constant dense<0.000000e+00> : vector<8x128xf32>
    %172 = tpu.matmul %170, %171, %cst_71 {dimension_numbers = #tpu.dot_dimension_numbers<[1], [1], [0], [0], [0, 0, 1, 0], [], []>} : vector<8x8xbf16>, vector<128x8xbf16>, vector<8x128xf32> -> vector<8x128xf32>
    %173 = vector.shape_cast %137 : vector<1x128xf32> to vector<1x128xf32>
    %174 = vector.broadcast %173 : vector<1x128xf32> to vector<8x128xf32>
    %175 = arith.select %144, %174, %172 : vector<8x128xi1>, vector<8x128xf32>
    %cst_72 = arith.constant dense<0xFF800000> : vector<8xf32>
    %176 = vector.multi_reduction <maximumf>, %175, %cst_72 [1] : vector<8x128xf32> to vector<8xf32>
    %177 = vector.shape_cast %176 : vector<8xf32> to vector<8x1xf32>
    %178 = vector.broadcast %177 : vector<8x1xf32> to vector<8x128xf32>
    %179 = arith.subf %175, %178 : vector<8x128xf32>
    %180 = math.exp %179 : vector<8x128xf32>
    %cst_73 = arith.constant dense<0.000000e+00> : vector<8xf32>
    %181 = vector.multi_reduction <add>, %180, %cst_73 [1] : vector<8x128xf32> to vector<8xf32>
    %182 = vector.shape_cast %181 : vector<8xf32> to vector<8x1xf32>
    %183 = tpu.reciprocal %182 {approx = true} : vector<8x1xf32> -> vector<8x1xf32>
    %184 = vector.broadcast %183 : vector<8x1xf32> to vector<8x128xf32>
    %185 = arith.mulf %180, %184 : vector<8x128xf32>
    %186 = arith.truncf %185 : vector<8x128xf32> to vector<8x128xbf16>
    %187 = vector.extract_strided_slice %149 {offsets = [0, 8], sizes = [128, 8], strides = [1, 1]} : vector<128x32xbf16> to vector<128x8xbf16>
    %cst_74 = arith.constant dense<0.000000e+00> : vector<8x8xf32>
    %188 = tpu.matmul %186, %187, %cst_74 {dimension_numbers = #tpu.dot_dimension_numbers<[1], [0], [0], [1], [0, 0, 1, 1], [], []>} : vector<8x128xbf16>, vector<128x8xbf16>, vector<8x8xf32> -> vector<8x8xf32>
    %c8_75 = arith.constant 8 : index
    %c8_76 = arith.constant 8 : index
    %189 = vector.load %arg18[%c8_75, %c8_76] : memref<16x32xf32, #tpu.memory_space<vmem>>, vector<8x8xf32>
    tpu.vector_store %arg18[%c8_75, %c8_76], %188 {strides = array<i32>} : memref<16x32xf32, #tpu.memory_space<vmem>>, vector<8x8xf32>,
    %190 = vector.extract_strided_slice %145 {offsets = [0, 16], sizes = [8, 8], strides = [1, 1]} : vector<8x32xbf16> to vector<8x8xbf16>
    %191 = vector.extract_strided_slice %147 {offsets = [0, 16], sizes = [128, 8], strides = [1, 1]} : vector<128x32xbf16> to vector<128x8xbf16>
    %cst_77 = arith.constant dense<0.000000e+00> : vector<8x128xf32>
    %192 = tpu.matmul %190, %191, %cst_77 {dimension_numbers = #tpu.dot_dimension_numbers<[1], [1], [0], [0], [0, 0, 1, 0], [], []>} : vector<8x8xbf16>, vector<128x8xbf16>, vector<8x128xf32> -> vector<8x128xf32>
    %193 = vector.shape_cast %137 : vector<1x128xf32> to vector<1x128xf32>
    %194 = vector.broadcast %193 : vector<1x128xf32> to vector<8x128xf32>
    %195 = arith.select %144, %194, %192 : vector<8x128xi1>, vector<8x128xf32>
    %cst_78 = arith.constant dense<0xFF800000> : vector<8xf32>
    %196 = vector.multi_reduction <maximumf>, %195, %cst_78 [1] : vector<8x128xf32> to vector<8xf32>
    %197 = vector.shape_cast %196 : vector<8xf32> to vector<8x1xf32>
    %198 = vector.broadcast %197 : vector<8x1xf32> to vector<8x128xf32>
    %199 = arith.subf %195, %198 : vector<8x128xf32>
    %200 = math.exp %199 : vector<8x128xf32>
    %cst_79 = arith.constant dense<0.000000e+00> : vector<8xf32>
    %201 = vector.multi_reduction <add>, %200, %cst_79 [1] : vector<8x128xf32> to vector<8xf32>
    %202 = vector.shape_cast %201 : vector<8xf32> to vector<8x1xf32>
    %203 = tpu.reciprocal %202 {approx = true} : vector<8x1xf32> -> vector<8x1xf32>
    %204 = vector.broadcast %203 : vector<8x1xf32> to vector<8x128xf32>
    %205 = arith.mulf %200, %204 : vector<8x128xf32>
    %206 = arith.truncf %205 : vector<8x128xf32> to vector<8x128xbf16>
    %207 = vector.extract_strided_slice %149 {offsets = [0, 16], sizes = [128, 8], strides = [1, 1]} : vector<128x32xbf16> to vector<128x8xbf16>
    %cst_80 = arith.constant dense<0.000000e+00> : vector<8x8xf32>
    %208 = tpu.matmul %206, %207, %cst_80 {dimension_numbers = #tpu.dot_dimension_numbers<[1], [0], [0], [1], [0, 0, 1, 1], [], []>} : vector<8x128xbf16>, vector<128x8xbf16>, vector<8x8xf32> -> vector<8x8xf32>
    %c8_81 = arith.constant 8 : index
    %c16_82 = arith.constant 16 : index
    %209 = vector.load %arg18[%c8_81, %c16_82] : memref<16x32xf32, #tpu.memory_space<vmem>>, vector<8x8xf32>
    tpu.vector_store %arg18[%c8_81, %c16_82], %208 {strides = array<i32>} : memref<16x32xf32, #tpu.memory_space<vmem>>, vector<8x8xf32>,
    %210 = vector.extract_strided_slice %145 {offsets = [0, 24], sizes = [8, 8], strides = [1, 1]} : vector<8x32xbf16> to vector<8x8xbf16>
    %211 = vector.extract_strided_slice %147 {offsets = [0, 24], sizes = [128, 8], strides = [1, 1]} : vector<128x32xbf16> to vector<128x8xbf16>
    %cst_83 = arith.constant dense<0.000000e+00> : vector<8x128xf32>
    %212 = tpu.matmul %210, %211, %cst_83 {dimension_numbers = #tpu.dot_dimension_numbers<[1], [1], [0], [0], [0, 0, 1, 0], [], []>} : vector<8x8xbf16>, vector<128x8xbf16>, vector<8x128xf32> -> vector<8x128xf32>
    %213 = vector.shape_cast %137 : vector<1x128xf32> to vector<1x128xf32>
    %214 = vector.broadcast %213 : vector<1x128xf32> to vector<8x128xf32>
    %215 = arith.select %144, %214, %212 : vector<8x128xi1>, vector<8x128xf32>
    %cst_84 = arith.constant dense<0xFF800000> : vector<8xf32>
    %216 = vector.multi_reduction <maximumf>, %215, %cst_84 [1] : vector<8x128xf32> to vector<8xf32>
    %217 = vector.shape_cast %216 : vector<8xf32> to vector<8x1xf32>
    %218 = vector.broadcast %217 : vector<8x1xf32> to vector<8x128xf32>
    %219 = arith.subf %215, %218 : vector<8x128xf32>
    %220 = math.exp %219 : vector<8x128xf32>
    %cst_85 = arith.constant dense<0.000000e+00> : vector<8xf32>
    %221 = vector.multi_reduction <add>, %220, %cst_85 [1] : vector<8x128xf32> to vector<8xf32>
    %222 = vector.shape_cast %221 : vector<8xf32> to vector<8x1xf32>
    %223 = tpu.reciprocal %222 {approx = true} : vector<8x1xf32> -> vector<8x1xf32>
    %224 = vector.broadcast %223 : vector<8x1xf32> to vector<8x128xf32>
    %225 = arith.mulf %220, %224 : vector<8x128xf32>
    %226 = arith.truncf %225 : vector<8x128xf32> to vector<8x128xbf16>
    %227 = vector.extract_strided_slice %149 {offsets = [0, 24], sizes = [128, 8], strides = [1, 1]} : vector<128x32xbf16> to vector<128x8xbf16>
    %cst_86 = arith.constant dense<0.000000e+00> : vector<8x8xf32>
    %228 = tpu.matmul %226, %227, %cst_86 {dimension_numbers = #tpu.dot_dimension_numbers<[1], [0], [0], [1], [0, 0, 1, 1], [], []>} : vector<8x128xbf16>, vector<128x8xbf16>, vector<8x8xf32> -> vector<8x8xf32>
    %c8_87 = arith.constant 8 : index
    %c24_88 = arith.constant 24 : index
    %229 = vector.load %arg18[%c8_87, %c24_88] : memref<16x32xf32, #tpu.memory_space<vmem>>, vector<8x8xf32>
    tpu.vector_store %arg18[%c8_87, %c24_88], %228 {strides = array<i32>} : memref<16x32xf32, #tpu.memory_space<vmem>>, vector<8x8xf32>,
    %c0_89 = arith.constant 0 : index
    %c0_90 = arith.constant 0 : index
    %230 = vector.load %arg18[%c0_89, %c0_90] : memref<16x32xf32, #tpu.memory_space<vmem>>, vector<16x32xf32>
    %231 = arith.truncf %230 : vector<16x32xf32> to vector<16x32xbf16>
    %c0_91 = arith.constant 0 : index
    %c0_92 = arith.constant 0 : index
    %232 = vector.load %arg7[%c0_91, %c0_92] : memref<32x32xbf16, #tpu.memory_space<vmem>>, vector<32x32xbf16>
    %cst_93 = arith.constant dense<0.000000e+00> : vector<16x32xf32>
    %233 = tpu.matmul %231, %232, %cst_93 {dimension_numbers = #tpu.dot_dimension_numbers<[1], [0], [0], [1], [0, 0, 1, 1], [], []>} : vector<16x32xbf16>, vector<32x32xbf16>, vector<16x32xf32> -> vector<16x32xf32>
    %c0_94 = arith.constant 0 : index
    %c0_95 = arith.constant 0 : index
    %234 = vector.load %arg8[%c0_94, %c0_95] : memref<1x32xf32, #tpu.memory_space<vmem>>, vector<1x32xf32>
    %235 = vector.broadcast %234 : vector<1x32xf32> to vector<16x32xf32>
    %236 = arith.addf %233, %235 : vector<16x32xf32>
    %c0_96 = arith.constant 0 : index
    %c0_97 = arith.constant 0 : index
    %c0_98 = arith.constant 0 : index
    %237 = vector.load %arg3[%c0_96, %c0_97, %c0_98] : memref<1x16x32xf32, #tpu.memory_space<vmem>>, vector<1x16x32xf32>
    %238 = vector.shape_cast %237 : vector<1x16x32xf32> to vector<16x32xf32>
    %239 = arith.addf %236, %238 : vector<16x32xf32>
    %cst_99 = arith.constant dense<0.000000e+00> : vector<16xf32>
    %240 = vector.multi_reduction <add>, %239, %cst_99 [1] : vector<16x32xf32> to vector<16xf32>
    %241 = vector.shape_cast %240 : vector<16xf32> to vector<16x1xf32>
    %cst_100 = arith.constant 3.200000e+01 : f32
    %242 = vector.broadcast %cst_100 : f32 to vector<16x1xf32>
    %243 = arith.divf %241, %242 : vector<16x1xf32>
    %244 = vector.broadcast %243 : vector<16x1xf32> to vector<16x32xf32>
    %245 = arith.subf %239, %244 : vector<16x32xf32>
    %246 = arith.mulf %245, %245 : vector<16x32xf32>
    %cst_101 = arith.constant dense<0.000000e+00> : vector<16xf32>
    %247 = vector.multi_reduction <add>, %246, %cst_101 [1] : vector<16x32xf32> to vector<16xf32>
    %248 = vector.shape_cast %247 : vector<16xf32> to vector<16x1xf32>
    %cst_102 = arith.constant 3.200000e+01 : f32
    %249 = vector.broadcast %cst_102 : f32 to vector<16x1xf32>
    %250 = arith.divf %248, %249 : vector<16x1xf32>
    %251 = vector.broadcast %243 : vector<16x1xf32> to vector<16x32xf32>
    %252 = arith.subf %239, %251 : vector<16x32xf32>
    %cst_103 = arith.constant 9.99999974E-6 : f32
    %253 = vector.broadcast %cst_103 : f32 to vector<16x1xf32>
    %254 = arith.addf %250, %253 : vector<16x1xf32>
    %255 = math.rsqrt %254 : vector<16x1xf32>
    %256 = vector.broadcast %255 : vector<16x1xf32> to vector<16x32xf32>
    %257 = arith.mulf %252, %256 : vector<16x32xf32>
    %c0_104 = arith.constant 0 : index
    %c0_105 = arith.constant 0 : index
    %258 = vector.load %arg9[%c0_104, %c0_105] : memref<1x32xf32, #tpu.memory_space<vmem>>, vector<1x32xf32>
    %259 = vector.broadcast %258 : vector<1x32xf32> to vector<16x32xf32>
    %260 = arith.mulf %257, %259 : vector<16x32xf32>
    %c0_106 = arith.constant 0 : index
    %c0_107 = arith.constant 0 : index
    %261 = vector.load %arg10[%c0_106, %c0_107] : memref<1x32xf32, #tpu.memory_space<vmem>>, vector<1x32xf32>
    %262 = vector.broadcast %261 : vector<1x32xf32> to vector<16x32xf32>
    %263 = arith.addf %260, %262 : vector<16x32xf32>
    %264 = arith.truncf %263 : vector<16x32xf32> to vector<16x32xbf16>
    %c0_108 = arith.constant 0 : index
    %c0_109 = arith.constant 0 : index
    %265 = vector.load %arg11[%c0_108, %c0_109] : memref<32x64xbf16, #tpu.memory_space<vmem>>, vector<32x64xbf16>
    %cst_110 = arith.constant dense<0.000000e+00> : vector<16x64xf32>
    %266 = tpu.matmul %264, %265, %cst_110 {dimension_numbers = #tpu.dot_dimension_numbers<[1], [0], [0], [1], [0, 0, 1, 1], [], []>} : vector<16x32xbf16>, vector<32x64xbf16>, vector<16x64xf32> -> vector<16x64xf32>
    %c0_111 = arith.constant 0 : index
    %c0_112 = arith.constant 0 : index
    %267 = vector.load %arg12[%c0_111, %c0_112] : memref<1x64xf32, #tpu.memory_space<vmem>>, vector<1x64xf32>
    %268 = vector.broadcast %267 : vector<1x64xf32> to vector<16x64xf32>
    %269 = arith.addf %266, %268 : vector<16x64xf32>
    %cst_113 = arith.constant 5.000000e-01 : f32
    %270 = vector.broadcast %cst_113 : f32 to vector<16x64xf32>
    %271 = arith.mulf %270, %269 : vector<16x64xf32>
    %cst_114 = arith.constant 4.471500e-02 : f32
    %272 = vector.broadcast %cst_114 : f32 to vector<16x64xf32>
    %273 = arith.mulf %272, %269 : vector<16x64xf32>
    %274 = arith.mulf %273, %269 : vector<16x64xf32>
    %275 = arith.mulf %274, %269 : vector<16x64xf32>
    %276 = arith.addf %269, %275 : vector<16x64xf32>
    %cst_115 = arith.constant 0.797884583 : f32
    %277 = vector.broadcast %cst_115 : f32 to vector<16x64xf32>
    %278 = arith.mulf %277, %276 : vector<16x64xf32>
    %279 = math.tanh %278 : vector<16x64xf32>
    %cst_116 = arith.constant 1.000000e+00 : f32
    %280 = vector.broadcast %cst_116 : f32 to vector<16x64xf32>
    %281 = arith.addf %280, %279 : vector<16x64xf32>
    %282 = arith.mulf %271, %281 : vector<16x64xf32>
    %283 = arith.truncf %282 : vector<16x64xf32> to vector<16x64xbf16>
    %c0_117 = arith.constant 0 : index
    %c0_118 = arith.constant 0 : index
    %284 = vector.load %arg13[%c0_117, %c0_118] : memref<64x32xbf16, #tpu.memory_space<vmem>>, vector<64x32xbf16>
    %cst_119 = arith.constant dense<0.000000e+00> : vector<16x32xf32>
    %285 = tpu.matmul %283, %284, %cst_119 {dimension_numbers = #tpu.dot_dimension_numbers<[1], [0], [0], [1], [0, 0, 1, 1], [], []>} : vector<16x64xbf16>, vector<64x32xbf16>, vector<16x32xf32> -> vector<16x32xf32>
    %c0_120 = arith.constant 0 : index
    %c0_121 = arith.constant 0 : index
    %286 = vector.load %arg14[%c0_120, %c0_121] : memref<1x32xf32, #tpu.memory_space<vmem>>, vector<1x32xf32>
    %287 = vector.broadcast %286 : vector<1x32xf32> to vector<16x32xf32>
    %288 = arith.addf %285, %287 : vector<16x32xf32>
    %289 = arith.addf %288, %263 : vector<16x32xf32>
    %cst_122 = arith.constant dense<0.000000e+00> : vector<16xf32>
    %290 = vector.multi_reduction <add>, %289, %cst_122 [1] : vector<16x32xf32> to vector<16xf32>
    %291 = vector.shape_cast %290 : vector<16xf32> to vector<16x1xf32>
    %cst_123 = arith.constant 3.200000e+01 : f32
    %292 = vector.broadcast %cst_123 : f32 to vector<16x1xf32>
    %293 = arith.divf %291, %292 : vector<16x1xf32>
    %294 = vector.broadcast %293 : vector<16x1xf32> to vector<16x32xf32>
    %295 = arith.subf %289, %294 : vector<16x32xf32>
    %296 = arith.mulf %295, %295 : vector<16x32xf32>
    %cst_124 = arith.constant dense<0.000000e+00> : vector<16xf32>
    %297 = vector.multi_reduction <add>, %296, %cst_124 [1] : vector<16x32xf32> to vector<16xf32>
    %298 = vector.shape_cast %297 : vector<16xf32> to vector<16x1xf32>
    %cst_125 = arith.constant 3.200000e+01 : f32
    %299 = vector.broadcast %cst_125 : f32 to vector<16x1xf32>
    %300 = arith.divf %298, %299 : vector<16x1xf32>
    %301 = vector.broadcast %293 : vector<16x1xf32> to vector<16x32xf32>
    %302 = arith.subf %289, %301 : vector<16x32xf32>
    %cst_126 = arith.constant 9.99999974E-6 : f32
    %303 = vector.broadcast %cst_126 : f32 to vector<16x1xf32>
    %304 = arith.addf %300, %303 : vector<16x1xf32>
    %305 = math.rsqrt %304 : vector<16x1xf32>
    %306 = vector.broadcast %305 : vector<16x1xf32> to vector<16x32xf32>
    %307 = arith.mulf %302, %306 : vector<16x32xf32>
    %c0_127 = arith.constant 0 : index
    %c0_128 = arith.constant 0 : index
    %308 = vector.load %arg15[%c0_127, %c0_128] : memref<1x32xf32, #tpu.memory_space<vmem>>, vector<1x32xf32>
    %309 = vector.broadcast %308 : vector<1x32xf32> to vector<16x32xf32>
    %310 = arith.mulf %307, %309 : vector<16x32xf32>
    %c0_129 = arith.constant 0 : index
    %c0_130 = arith.constant 0 : index
    %311 = vector.load %arg16[%c0_129, %c0_130] : memref<1x32xf32, #tpu.memory_space<vmem>>, vector<1x32xf32>
    %312 = vector.broadcast %311 : vector<1x32xf32> to vector<16x32xf32>
    %313 = arith.addf %310, %312 : vector<16x32xf32>
    %c0_131 = arith.constant 0 : index
    %c0_132 = arith.constant 0 : index
    %c0_133 = arith.constant 0 : index
    %314 = vector.load %arg17[%c0_131, %c0_132, %c0_133] : memref<1x16x32xf32, #tpu.memory_space<vmem>>, vector<1x16x32xf32>
    %315 = vector.shape_cast %314 : vector<1x16x32xf32> to vector<16x32xf32>
    %316 = vector.shape_cast %313 : vector<16x32xf32> to vector<1x16x32xf32>
    tpu.vector_store %arg17[%c0_131, %c0_132, %c0_133], %316 {strides = array<i32>} : memref<1x16x32xf32, #tpu.memory_space<vmem>>, vector<1x16x32xf32>,
    return
  }
  func.func @transform_0(%arg0: i32, %arg1: i32) -> (i32, i32, i32) {
    %c0_i32 = arith.constant 0 : i32
    %c0_i32_0 = arith.constant 0 : i32
    return %arg0, %arg1, %c0_i32 : i32, i32, i32
  }
  func.func @transform_1(%arg0: i32, %arg1: i32) -> (i32, i32, i32) {
    %c0_i32 = arith.constant 0 : i32
    %c0_i32_0 = arith.constant 0 : i32
    return %arg0, %arg1, %c0_i32 : i32, i32, i32
  }
  func.func @transform_2(%arg0: i32, %arg1: i32) -> (i32, i32, i32, i32) {
    %c0_i32 = arith.constant 0 : i32
    %c0_i32_0 = arith.constant 0 : i32
    %c0_i32_1 = arith.constant 0 : i32
    return %arg0, %arg1, %c0_i32, %c0_i32_0 : i32, i32, i32, i32
  }
  func.func @transform_3(%arg0: i32, %arg1: i32) -> (i32, i32, i32, i32) {
    %c0_i32 = arith.constant 0 : i32
    %c0_i32_0 = arith.constant 0 : i32
    %c0_i32_1 = arith.constant 0 : i32
    return %arg0, %arg1, %c0_i32, %c0_i32_0 : i32, i32, i32, i32
  }
  func.func @transform_4(%arg0: i32, %arg1: i32) -> (i32, i32, i32) {
    %c0_i32 = arith.constant 0 : i32
    %c0_i32_0 = arith.constant 0 : i32
    return %arg0, %arg1, %c0_i32 : i32, i32, i32
  }
  func.func @transform_5(%arg0: i32, %arg1: i32) -> (i32, i32) {
    %c0_i32 = arith.constant 0 : i32
    %c0_i32_0 = arith.constant 0 : i32
    %c0_i32_1 = arith.constant 0 : i32
    return %c0_i32, %c0_i32_0 : i32, i32
  }
  func.func @transform_6(%arg0: i32, %arg1: i32) -> (i32, i32) {
    %c0_i32 = arith.constant 0 : i32
    %c0_i32_0 = arith.constant 0 : i32
    %c0_i32_1 = arith.constant 0 : i32
    return %c0_i32, %c0_i32_0 : i32, i32
  }
  func.func @transform_7(%arg0: i32, %arg1: i32) -> (i32, i32) {
    %c0_i32 = arith.constant 0 : i32
    %c0_i32_0 = arith.constant 0 : i32
    %c0_i32_1 = arith.constant 0 : i32
    return %c0_i32, %c0_i32_0 : i32, i32
  }
  func.func @transform_8(%arg0: i32, %arg1: i32) -> (i32, i32) {
    %c0_i32 = arith.constant 0 : i32
    %c0_i32_0 = arith.constant 0 : i32
    %c0_i32_1 = arith.constant 0 : i32
    return %c0_i32, %c0_i32_0 : i32, i32
  }
  func.func @transform_9(%arg0: i32, %arg1: i32) -> (i32, i32) {
    %c0_i32 = arith.constant 0 : i32
    %c0_i32_0 = arith.constant 0 : i32
    %c0_i32_1 = arith.constant 0 : i32
    return %c0_i32, %c0_i32_0 : i32, i32
  }
  func.func @transform_10(%arg0: i32, %arg1: i32) -> (i32, i32) {
    %c0_i32 = arith.constant 0 : i32
    %c0_i32_0 = arith.constant 0 : i32
    %c0_i32_1 = arith.constant 0 : i32
    return %c0_i32, %c0_i32_0 : i32, i32
  }
  func.func @transform_11(%arg0: i32, %arg1: i32) -> (i32, i32) {
    %c0_i32 = arith.constant 0 : i32
    %c0_i32_0 = arith.constant 0 : i32
    %c0_i32_1 = arith.constant 0 : i32
    return %c0_i32, %c0_i32_0 : i32, i32
  }
  func.func @transform_12(%arg0: i32, %arg1: i32) -> (i32, i32) {
    %c0_i32 = arith.constant 0 : i32
    %c0_i32_0 = arith.constant 0 : i32
    %c0_i32_1 = arith.constant 0 : i32
    return %c0_i32, %c0_i32_0 : i32, i32
  }
  func.func @transform_13(%arg0: i32, %arg1: i32) -> (i32, i32) {
    %c0_i32 = arith.constant 0 : i32
    %c0_i32_0 = arith.constant 0 : i32
    %c0_i32_1 = arith.constant 0 : i32
    return %c0_i32, %c0_i32_0 : i32, i32
  }
  func.func @transform_14(%arg0: i32, %arg1: i32) -> (i32, i32) {
    %c0_i32 = arith.constant 0 : i32
    %c0_i32_0 = arith.constant 0 : i32
    %c0_i32_1 = arith.constant 0 : i32
    return %c0_i32, %c0_i32_0 : i32, i32
  }
  func.func @transform_15(%arg0: i32, %arg1: i32) -> (i32, i32, i32) {
    %c0_i32 = arith.constant 0 : i32
    %c0_i32_0 = arith.constant 0 : i32
    return %arg0, %arg1, %c0_i32 : i32, i32, i32
  }
}

module attributes {stable_mosaic.version = 11 : i64} {
  func.func @_block_kernel(%arg0: i32, %arg1: i32, %arg2: memref<1x16x32xbf16, #tpu.memory_space<vmem>>, %arg3: memref<1x16x32xf32, #tpu.memory_space<vmem>>, %arg4: memref<1x2x128x32xbf16, #tpu.memory_space<vmem>>, %arg5: memref<1x2x128x32xbf16, #tpu.memory_space<vmem>>, %arg6: memref<1x16x1xf32, #tpu.memory_space<vmem>>, %arg7: memref<32x32xbf16, #tpu.memory_space<vmem>>, %arg8: memref<1x32xf32, #tpu.memory_space<vmem>>, %arg9: memref<1x32xf32, #tpu.memory_space<vmem>>, %arg10: memref<1x32xf32, #tpu.memory_space<vmem>>, %arg11: memref<32x64xbf16, #tpu.memory_space<vmem>>, %arg12: memref<1x64xf32, #tpu.memory_space<vmem>>, %arg13: memref<64x32xbf16, #tpu.memory_space<vmem>>, %arg14: memref<1x32xf32, #tpu.memory_space<vmem>>, %arg15: memref<1x32xf32, #tpu.memory_space<vmem>>, %arg16: memref<1x32xf32, #tpu.memory_space<vmem>>, %arg17: memref<1x16x32xf32, #tpu.memory_space<vmem>>, %arg18: memref<16x32xf32, #tpu.memory_space<vmem>>) attributes {dimension_semantics = [#tpu.dimension_semantics<parallel>, #tpu.dimension_semantics<parallel>], iteration_bounds = array<i64: 2, 1>, scalar_prefetch = 0 : i64, scratch_operands = 1 : i64, tpu.core_type = #tpu.core_type<tc>, window_params = [{transform_indices = @transform_0, window_bounds = array<i64: 1, 16, 32>}, {transform_indices = @transform_1, window_bounds = array<i64: 1, 16, 32>}, {transform_indices = @transform_2, window_bounds = array<i64: 1, 2, 128, 32>}, {transform_indices = @transform_3, window_bounds = array<i64: 1, 2, 128, 32>}, {transform_indices = @transform_4, window_bounds = array<i64: 1, 16, 1>}, {pipeline_mode = #tpu.pipeline_mode<synchronous>, transform_indices = @transform_5, window_bounds = array<i64: 32, 32>}, {pipeline_mode = #tpu.pipeline_mode<synchronous>, transform_indices = @transform_6, window_bounds = array<i64: 1, 32>}, {pipeline_mode = #tpu.pipeline_mode<synchronous>, transform_indices = @transform_7, window_bounds = array<i64: 1, 32>}, {pipeline_mode = #tpu.pipeline_mode<synchronous>, transform_indices = @transform_8, window_bounds = array<i64: 1, 32>}, {pipeline_mode = #tpu.pipeline_mode<synchronous>, transform_indices = @transform_9, window_bounds = array<i64: 32, 64>}, {pipeline_mode = #tpu.pipeline_mode<synchronous>, transform_indices = @transform_10, window_bounds = array<i64: 1, 64>}, {pipeline_mode = #tpu.pipeline_mode<synchronous>, transform_indices = @transform_11, window_bounds = array<i64: 64, 32>}, {pipeline_mode = #tpu.pipeline_mode<synchronous>, transform_indices = @transform_12, window_bounds = array<i64: 1, 32>}, {pipeline_mode = #tpu.pipeline_mode<synchronous>, transform_indices = @transform_13, window_bounds = array<i64: 1, 32>}, {pipeline_mode = #tpu.pipeline_mode<synchronous>, transform_indices = @transform_14, window_bounds = array<i64: 1, 32>}, {transform_indices = @transform_15, window_bounds = array<i64: 1, 16, 32>}]} {
    %c0 = arith.constant 0 : index
    %c0_0 = arith.constant 0 : index
    %c0_1 = arith.constant 0 : index
    %0 = vector.load %arg2[%c0, %c0_0, %c0_1] : memref<1x16x32xbf16, #tpu.memory_space<vmem>>, vector<1x16x32xbf16>
    %1 = vector.shape_cast %0 : vector<1x16x32xbf16> to vector<16x32xbf16>
    %c2_i32 = arith.constant 2 : i32
    %2 = arith.muli %arg1, %c2_i32 : i32
    %c0_i32 = arith.constant 0 : i32
    %3 = arith.addi %2, %c0_i32 : i32
    %c8_i32 = arith.constant 8 : i32
    %4 = arith.muli %3, %c8_i32 : i32
    %c1_i32 = arith.constant 1 : i32
    %5 = arith.subi %4, %c1_i32 : i32
    %c0_i32_2 = arith.constant 0 : i32
    %6 = arith.maxsi %5, %c0_i32_2 : i32
    %c8_i32_3 = arith.constant 8 : i32
    %7 = arith.addi %4, %c8_i32_3 : i32
    %c1_i32_4 = arith.constant 1 : i32
    %8 = arith.addi %7, %c1_i32_4 : i32
    %c16_i32 = arith.constant 16 : i32
    %9 = arith.minsi %8, %c16_i32 : i32
    %c1_i32_5 = arith.constant 1 : i32
    %10 = arith.subi %4, %c1_i32_5 : i32
    %c0_i32_6 = arith.constant 0 : i32
    %c6_i32 = arith.constant 6 : i32
    %11 = arith.maxsi %c0_i32_6, %10 : i32
    %12 = arith.minsi %c6_i32, %11 : i32
    %13 = tpu.iota {dimensions = array<i32: 1>} : vector<1x128xi32>
    %14 = vector.broadcast %12 : i32 to vector<1x128xi32>
    %15 = arith.addi %14, %13 : vector<1x128xi32>
    %16 = vector.broadcast %6 : i32 to vector<1x128xi32>
    %17 = arith.cmpi slt, %15, %16 : vector<1x128xi32>
    %18 = vector.broadcast %9 : i32 to vector<1x128xi32>
    %19 = arith.cmpi sge, %15, %18 : vector<1x128xi32>
    %20 = arith.ori %17, %19 : vector<1x128xi1>
    %cst = arith.constant -1.000000e+30 : f32
    %cst_7 = arith.constant -1.000000e+10 : f32
    %21 = vector.broadcast %cst : f32 to vector<1x128xf32>
    %22 = vector.broadcast %cst_7 : f32 to vector<1x128xf32>
    %23 = arith.select %20, %21, %22 : vector<1x128xi1>, vector<1x128xf32>
    %c0_8 = arith.constant 0 : index
    %c0_9 = arith.constant 0 : index
    %c0_10 = arith.constant 0 : index
    %24 = vector.load %arg6[%c0_8, %c0_9, %c0_10] : memref<1x16x1xf32, #tpu.memory_space<vmem>>, vector<1x8x1xf32>
    %25 = vector.shape_cast %24 : vector<1x8x1xf32> to vector<8x1xf32>
    %cst_11 = arith.constant 0.000000e+00 : f32
    %26 = vector.broadcast %cst_11 : f32 to vector<8x1xf32>
    %27 = arith.cmpf oeq, %25, %26 : vector<8x1xf32>
    %28 = vector.broadcast %27 : vector<8x1xi1> to vector<8x128xi1>
    %29 = vector.broadcast %20 : vector<1x128xi1> to vector<8x128xi1>
    %30 = arith.ori %28, %29 : vector<8x128xi1>
    %31 = vector.extract_strided_slice %1 {offsets = [0, 0], sizes = [8, 32], strides = [1, 1]} : vector<16x32xbf16> to vector<8x32xbf16>
    %c0_12 = arith.constant 0 : index
    %c0_13 = arith.constant 0 : index
    %c0_14 = arith.constant 0 : index
    %c0_15 = arith.constant 0 : index
    %32 = vector.load %arg4[%c0_12, %c0_13, %c0_14, %c0_15] : memref<1x2x128x32xbf16, #tpu.memory_space<vmem>>, vector<1x1x128x32xbf16>
    %33 = vector.shape_cast %32 : vector<1x1x128x32xbf16> to vector<128x32xbf16>
    %c0_16 = arith.constant 0 : index
    %c0_17 = arith.constant 0 : index
    %c0_18 = arith.constant 0 : index
    %c0_19 = arith.constant 0 : index
    %34 = vector.load %arg5[%c0_16, %c0_17, %c0_18, %c0_19] : memref<1x2x128x32xbf16, #tpu.memory_space<vmem>>, vector<1x1x128x32xbf16>
    %35 = vector.shape_cast %34 : vector<1x1x128x32xbf16> to vector<128x32xbf16>
    %36 = vector.extract_strided_slice %31 {offsets = [0, 0], sizes = [8, 8], strides = [1, 1]} : vector<8x32xbf16> to vector<8x8xbf16>
    %37 = vector.extract_strided_slice %33 {offsets = [0, 0], sizes = [128, 8], strides = [1, 1]} : vector<128x32xbf16> to vector<128x8xbf16>
    %cst_20 = arith.constant dense<0.000000e+00> : vector<8x128xf32>
    %38 = tpu.matmul %36, %37, %cst_20 {dimension_numbers = #tpu.dot_dimension_numbers<[1], [1], [0], [0], [0, 0, 1, 0], [], []>} : vector<8x8xbf16>, vector<128x8xbf16>, vector<8x128xf32> -> vector<8x128xf32>
    %39 = vector.shape_cast %23 : vector<1x128xf32> to vector<1x128xf32>
    %40 = vector.broadcast %39 : vector<1x128xf32> to vector<8x128xf32>
    %41 = arith.select %30, %40, %38 : vector<8x128xi1>, vector<8x128xf32>
    %cst_21 = arith.constant dense<0xFF800000> : vector<8xf32>
    %42 = vector.multi_reduction <maximumf>, %41, %cst_21 [1] : vector<8x128xf32> to vector<8xf32>
    %43 = vector.shape_cast %42 : vector<8xf32> to vector<8x1xf32>
    %44 = vector.broadcast %43 : vector<8x1xf32> to vector<8x128xf32>
    %45 = arith.subf %41, %44 : vector<8x128xf32>
    %46 = math.exp %45 : vector<8x128xf32>
    %cst_22 = arith.constant dense<0.000000e+00> : vector<8xf32>
    %47 = vector.multi_reduction <add>, %46, %cst_22 [1] : vector<8x128xf32> to vector<8xf32>
    %48 = vector.shape_cast %47 : vector<8xf32> to vector<8x1xf32>
    %49 = tpu.reciprocal %48 {approx = true} : vector<8x1xf32> -> vector<8x1xf32>
    %50 = vector.broadcast %49 : vector<8x1xf32> to vector<8x128xf32>
    %51 = arith.mulf %46, %50 : vector<8x128xf32>
    %52 = arith.truncf %51 : vector<8x128xf32> to vector<8x128xbf16>
    %53 = vector.extract_strided_slice %35 {offsets = [0, 0], sizes = [128, 8], strides = [1, 1]} : vector<128x32xbf16> to vector<128x8xbf16>
    %cst_23 = arith.constant dense<0.000000e+00> : vector<8x8xf32>
    %54 = tpu.matmul %52, %53, %cst_23 {dimension_numbers = #tpu.dot_dimension_numbers<[1], [0], [0], [1], [0, 0, 1, 1], [], []>} : vector<8x128xbf16>, vector<128x8xbf16>, vector<8x8xf32> -> vector<8x8xf32>
    %c0_24 = arith.constant 0 : index
    %c0_25 = arith.constant 0 : index
    %55 = vector.load %arg18[%c0_24, %c0_25] : memref<16x32xf32, #tpu.memory_space<vmem>>, vector<8x8xf32>
    tpu.vector_store %arg18[%c0_24, %c0_25], %54 {strides = array<i32>} : memref<16x32xf32, #tpu.memory_space<vmem>>, vector<8x8xf32>,
    %56 = vector.extract_strided_slice %31 {offsets = [0, 8], sizes = [8, 8], strides = [1, 1]} : vector<8x32xbf16> to vector<8x8xbf16>
    %57 = vector.extract_strided_slice %33 {offsets = [0, 8], sizes = [128, 8], strides = [1, 1]} : vector<128x32xbf16> to vector<128x8xbf16>
    %cst_26 = arith.constant dense<0.000000e+00> : vector<8x128xf32>
    %58 = tpu.matmul %56, %57, %cst_26 {dimension_numbers = #tpu.dot_dimension_numbers<[1], [1], [0], [0], [0, 0, 1, 0], [], []>} : vector<8x8xbf16>, vector<128x8xbf16>, vector<8x128xf32> -> vector<8x128xf32>
    %59 = vector.shape_cast %23 : vector<1x128xf32> to vector<1x128xf32>
    %60 = vector.broadcast %59 : vector<1x128xf32> to vector<8x128xf32>
    %61 = arith.select %30, %60, %58 : vector<8x128xi1>, vector<8x128xf32>
    %cst_27 = arith.constant dense<0xFF800000> : vector<8xf32>
    %62 = vector.multi_reduction <maximumf>, %61, %cst_27 [1] : vector<8x128xf32> to vector<8xf32>
    %63 = vector.shape_cast %62 : vector<8xf32> to vector<8x1xf32>
    %64 = vector.broadcast %63 : vector<8x1xf32> to vector<8x128xf32>
    %65 = arith.subf %61, %64 : vector<8x128xf32>
    %66 = math.exp %65 : vector<8x128xf32>
    %cst_28 = arith.constant dense<0.000000e+00> : vector<8xf32>
    %67 = vector.multi_reduction <add>, %66, %cst_28 [1] : vector<8x128xf32> to vector<8xf32>
    %68 = vector.shape_cast %67 : vector<8xf32> to vector<8x1xf32>
    %69 = tpu.reciprocal %68 {approx = true} : vector<8x1xf32> -> vector<8x1xf32>
    %70 = vector.broadcast %69 : vector<8x1xf32> to vector<8x128xf32>
    %71 = arith.mulf %66, %70 : vector<8x128xf32>
    %72 = arith.truncf %71 : vector<8x128xf32> to vector<8x128xbf16>
    %73 = vector.extract_strided_slice %35 {offsets = [0, 8], sizes = [128, 8], strides = [1, 1]} : vector<128x32xbf16> to vector<128x8xbf16>
    %cst_29 = arith.constant dense<0.000000e+00> : vector<8x8xf32>
    %74 = tpu.matmul %72, %73, %cst_29 {dimension_numbers = #tpu.dot_dimension_numbers<[1], [0], [0], [1], [0, 0, 1, 1], [], []>} : vector<8x128xbf16>, vector<128x8xbf16>, vector<8x8xf32> -> vector<8x8xf32>
    %c0_30 = arith.constant 0 : index
    %c8 = arith.constant 8 : index
    %75 = vector.load %arg18[%c0_30, %c8] : memref<16x32xf32, #tpu.memory_space<vmem>>, vector<8x8xf32>
    tpu.vector_store %arg18[%c0_30, %c8], %74 {strides = array<i32>} : memref<16x32xf32, #tpu.memory_space<vmem>>, vector<8x8xf32>,
    %76 = vector.extract_strided_slice %31 {offsets = [0, 16], sizes = [8, 8], strides = [1, 1]} : vector<8x32xbf16> to vector<8x8xbf16>
    %77 = vector.extract_strided_slice %33 {offsets = [0, 16], sizes = [128, 8], strides = [1, 1]} : vector<128x32xbf16> to vector<128x8xbf16>
    %cst_31 = arith.constant dense<0.000000e+00> : vector<8x128xf32>
    %78 = tpu.matmul %76, %77, %cst_31 {dimension_numbers = #tpu.dot_dimension_numbers<[1], [1], [0], [0], [0, 0, 1, 0], [], []>} : vector<8x8xbf16>, vector<128x8xbf16>, vector<8x128xf32> -> vector<8x128xf32>
    %79 = vector.shape_cast %23 : vector<1x128xf32> to vector<1x128xf32>
    %80 = vector.broadcast %79 : vector<1x128xf32> to vector<8x128xf32>
    %81 = arith.select %30, %80, %78 : vector<8x128xi1>, vector<8x128xf32>
    %cst_32 = arith.constant dense<0xFF800000> : vector<8xf32>
    %82 = vector.multi_reduction <maximumf>, %81, %cst_32 [1] : vector<8x128xf32> to vector<8xf32>
    %83 = vector.shape_cast %82 : vector<8xf32> to vector<8x1xf32>
    %84 = vector.broadcast %83 : vector<8x1xf32> to vector<8x128xf32>
    %85 = arith.subf %81, %84 : vector<8x128xf32>
    %86 = math.exp %85 : vector<8x128xf32>
    %cst_33 = arith.constant dense<0.000000e+00> : vector<8xf32>
    %87 = vector.multi_reduction <add>, %86, %cst_33 [1] : vector<8x128xf32> to vector<8xf32>
    %88 = vector.shape_cast %87 : vector<8xf32> to vector<8x1xf32>
    %89 = tpu.reciprocal %88 {approx = true} : vector<8x1xf32> -> vector<8x1xf32>
    %90 = vector.broadcast %89 : vector<8x1xf32> to vector<8x128xf32>
    %91 = arith.mulf %86, %90 : vector<8x128xf32>
    %92 = arith.truncf %91 : vector<8x128xf32> to vector<8x128xbf16>
    %93 = vector.extract_strided_slice %35 {offsets = [0, 16], sizes = [128, 8], strides = [1, 1]} : vector<128x32xbf16> to vector<128x8xbf16>
    %cst_34 = arith.constant dense<0.000000e+00> : vector<8x8xf32>
    %94 = tpu.matmul %92, %93, %cst_34 {dimension_numbers = #tpu.dot_dimension_numbers<[1], [0], [0], [1], [0, 0, 1, 1], [], []>} : vector<8x128xbf16>, vector<128x8xbf16>, vector<8x8xf32> -> vector<8x8xf32>
    %c0_35 = arith.constant 0 : index
    %c16 = arith.constant 16 : index
    %95 = vector.load %arg18[%c0_35, %c16] : memref<16x32xf32, #tpu.memory_space<vmem>>, vector<8x8xf32>
    tpu.vector_store %arg18[%c0_35, %c16], %94 {strides = array<i32>} : memref<16x32xf32, #tpu.memory_space<vmem>>, vector<8x8xf32>,
    %96 = vector.extract_strided_slice %31 {offsets = [0, 24], sizes = [8, 8], strides = [1, 1]} : vector<8x32xbf16> to vector<8x8xbf16>
    %97 = vector.extract_strided_slice %33 {offsets = [0, 24], sizes = [128, 8], strides = [1, 1]} : vector<128x32xbf16> to vector<128x8xbf16>
    %cst_36 = arith.constant dense<0.000000e+00> : vector<8x128xf32>
    %98 = tpu.matmul %96, %97, %cst_36 {dimension_numbers = #tpu.dot_dimension_numbers<[1], [1], [0], [0], [0, 0, 1, 0], [], []>} : vector<8x8xbf16>, vector<128x8xbf16>, vector<8x128xf32> -> vector<8x128xf32>
    %99 = vector.shape_cast %23 : vector<1x128xf32> to vector<1x128xf32>
    %100 = vector.broadcast %99 : vector<1x128xf32> to vector<8x128xf32>
    %101 = arith.select %30, %100, %98 : vector<8x128xi1>, vector<8x128xf32>
    %cst_37 = arith.constant dense<0xFF800000> : vector<8xf32>
    %102 = vector.multi_reduction <maximumf>, %101, %cst_37 [1] : vector<8x128xf32> to vector<8xf32>
    %103 = vector.shape_cast %102 : vector<8xf32> to vector<8x1xf32>
    %104 = vector.broadcast %103 : vector<8x1xf32> to vector<8x128xf32>
    %105 = arith.subf %101, %104 : vector<8x128xf32>
    %106 = math.exp %105 : vector<8x128xf32>
    %cst_38 = arith.constant dense<0.000000e+00> : vector<8xf32>
    %107 = vector.multi_reduction <add>, %106, %cst_38 [1] : vector<8x128xf32> to vector<8xf32>
    %108 = vector.shape_cast %107 : vector<8xf32> to vector<8x1xf32>
    %109 = tpu.reciprocal %108 {approx = true} : vector<8x1xf32> -> vector<8x1xf32>
    %110 = vector.broadcast %109 : vector<8x1xf32> to vector<8x128xf32>
    %111 = arith.mulf %106, %110 : vector<8x128xf32>
    %112 = arith.truncf %111 : vector<8x128xf32> to vector<8x128xbf16>
    %113 = vector.extract_strided_slice %35 {offsets = [0, 24], sizes = [128, 8], strides = [1, 1]} : vector<128x32xbf16> to vector<128x8xbf16>
    %cst_39 = arith.constant dense<0.000000e+00> : vector<8x8xf32>
    %114 = tpu.matmul %112, %113, %cst_39 {dimension_numbers = #tpu.dot_dimension_numbers<[1], [0], [0], [1], [0, 0, 1, 1], [], []>} : vector<8x128xbf16>, vector<128x8xbf16>, vector<8x8xf32> -> vector<8x8xf32>
    %c0_40 = arith.constant 0 : index
    %c24 = arith.constant 24 : index
    %115 = vector.load %arg18[%c0_40, %c24] : memref<16x32xf32, #tpu.memory_space<vmem>>, vector<8x8xf32>
    tpu.vector_store %arg18[%c0_40, %c24], %114 {strides = array<i32>} : memref<16x32xf32, #tpu.memory_space<vmem>>, vector<8x8xf32>,
    %c2_i32_41 = arith.constant 2 : i32
    %116 = arith.muli %arg1, %c2_i32_41 : i32
    %c1_i32_42 = arith.constant 1 : i32
    %117 = arith.addi %116, %c1_i32_42 : i32
    %c8_i32_43 = arith.constant 8 : i32
    %118 = arith.muli %117, %c8_i32_43 : i32
    %c1_i32_44 = arith.constant 1 : i32
    %119 = arith.subi %118, %c1_i32_44 : i32
    %c0_i32_45 = arith.constant 0 : i32
    %120 = arith.maxsi %119, %c0_i32_45 : i32
    %c8_i32_46 = arith.constant 8 : i32
    %121 = arith.addi %118, %c8_i32_46 : i32
    %c1_i32_47 = arith.constant 1 : i32
    %122 = arith.addi %121, %c1_i32_47 : i32
    %c16_i32_48 = arith.constant 16 : i32
    %123 = arith.minsi %122, %c16_i32_48 : i32
    %c1_i32_49 = arith.constant 1 : i32
    %124 = arith.subi %118, %c1_i32_49 : i32
    %c0_i32_50 = arith.constant 0 : i32
    %c6_i32_51 = arith.constant 6 : i32
    %125 = arith.maxsi %c0_i32_50, %124 : i32
    %126 = arith.minsi %c6_i32_51, %125 : i32
    %127 = tpu.iota {dimensions = array<i32: 1>} : vector<1x128xi32>
    %128 = vector.broadcast %126 : i32 to vector<1x128xi32>
    %129 = arith.addi %128, %127 : vector<1x128xi32>
    %130 = vector.broadcast %120 : i32 to vector<1x128xi32>
    %131 = arith.cmpi slt, %129, %130 : vector<1x128xi32>
    %132 = vector.broadcast %123 : i32 to vector<1x128xi32>
    %133 = arith.cmpi sge, %129, %132 : vector<1x128xi32>
    %134 = arith.ori %131, %133 : vector<1x128xi1>
    %cst_52 = arith.constant -1.000000e+30 : f32
    %cst_53 = arith.constant -1.000000e+10 : f32
    %135 = vector.broadcast %cst_52 : f32 to vector<1x128xf32>
    %136 = vector.broadcast %cst_53 : f32 to vector<1x128xf32>
    %137 = arith.select %134, %135, %136 : vector<1x128xi1>, vector<1x128xf32>
    %c0_54 = arith.constant 0 : index
    %c8_55 = arith.constant 8 : index
    %c0_56 = arith.constant 0 : index
    %138 = vector.load %arg6[%c0_54, %c8_55, %c0_56] : memref<1x16x1xf32, #tpu.memory_space<vmem>>, vector<1x8x1xf32>
    %139 = vector.shape_cast %138 : vector<1x8x1xf32> to vector<8x1xf32>
    %cst_57 = arith.constant 0.000000e+00 : f32
    %140 = vector.broadcast %cst_57 : f32 to vector<8x1xf32>
    %141 = arith.cmpf oeq, %139, %140 : vector<8x1xf32>
    %142 = vector.broadcast %141 : vector<8x1xi1> to vector<8x128xi1>
    %143 = vector.broadcast %134 : vector<1x128xi1> to vector<8x128xi1>
    %144 = arith.ori %142, %143 : vector<8x128xi1>
    %145 = vector.extract_strided_slice %1 {offsets = [8, 0], sizes = [8, 32], strides = [1, 1]} : vector<16x32xbf16> to vector<8x32xbf16>
    %c0_58 = arith.constant 0 : index
    %c1 = arith.constant 1 : index
    %c0_59 = arith.constant 0 : index
    %c0_60 = arith.constant 0 : index
    %146 = vector.load %arg4[%c0_58, %c1, %c0_59, %c0_60] : memref<1x2x128x32xbf16, #tpu.memory_space<vmem>>, vector<1x1x128x32xbf16>
    %147 = vector.shape_cast %146 : vector<1x1x128x32xbf16> to vector<128x32xbf16>
    %c0_61 = arith.constant 0 : index
    %c1_62 = arith.constant 1 : index
    %c0_63 = arith.constant 0 : index
    %c0_64 = arith.constant 0 : index
    %148 = vector.load %arg5[%c0_61, %c1_62, %c0_63, %c0_64] : memref<1x2x128x32xbf16, #tpu.memory_space<vmem>>, vector<1x1x128x32xbf16>
    %149 = vector.shape_cast %148 : vector<1x1x128x32xbf16> to vector<128x32xbf16>
    %150 = vector.extract_strided_slice %145 {offsets = [0, 0], sizes = [8, 8], strides = [1, 1]} : vector<8x32xbf16> to vector<8x8xbf16>
    %151 = vector.extract_strided_slice %147 {offsets = [0, 0], sizes = [128, 8], strides = [1, 1]} : vector<128x32xbf16> to vector<128x8xbf16>
    %cst_65 = arith.constant dense<0.000000e+00> : vector<8x128xf32>
    %152 = tpu.matmul %150, %151, %cst_65 {dimension_numbers = #tpu.dot_dimension_numbers<[1], [1], [0], [0], [0, 0, 1, 0], [], []>} : vector<8x8xbf16>, vector<128x8xbf16>, vector<8x128xf32> -> vector<8x128xf32>
    %153 = vector.shape_cast %137 : vector<1x128xf32> to vector<1x128xf32>
    %154 = vector.broadcast %153 : vector<1x128xf32> to vector<8x128xf32>
    %155 = arith.select %144, %154, %152 : vector<8x128xi1>, vector<8x128xf32>
    %cst_66 = arith.constant dense<0xFF800000> : vector<8xf32>
    %156 = vector.multi_reduction <maximumf>, %155, %cst_66 [1] : vector<8x128xf32> to vector<8xf32>
    %157 = vector.shape_cast %156 : vector<8xf32> to vector<8x1xf32>
    %158 = vector.broadcast %157 : vector<8x1xf32> to vector<8x128xf32>
    %159 = arith.subf %155, %158 : vector<8x128xf32>
    %160 = math.exp %159 : vector<8x128xf32>
    %cst_67 = arith.constant dense<0.000000e+00> : vector<8xf32>
    %161 = vector.multi_reduction <add>, %160, %cst_67 [1] : vector<8x128xf32> to vector<8xf32>
    %162 = vector.shape_cast %161 : vector<8xf32> to vector<8x1xf32>
    %163 = tpu.reciprocal %162 {approx = true} : vector<8x1xf32> -> vector<8x1xf32>
    %164 = vector.broadcast %163 : vector<8x1xf32> to vector<8x128xf32>
    %165 = arith.mulf %160, %164 : vector<8x128xf32>
    %166 = arith.truncf %165 : vector<8x128xf32> to vector<8x128xbf16>
    %167 = vector.extract_strided_slice %149 {offsets = [0, 0], sizes = [128, 8], strides = [1, 1]} : vector<128x32xbf16> to vector<128x8xbf16>
    %cst_68 = arith.constant dense<0.000000e+00> : vector<8x8xf32>
    %168 = tpu.matmul %166, %167, %cst_68 {dimension_numbers = #tpu.dot_dimension_numbers<[1], [0], [0], [1], [0, 0, 1, 1], [], []>} : vector<8x128xbf16>, vector<128x8xbf16>, vector<8x8xf32> -> vector<8x8xf32>
    %c8_69 = arith.constant 8 : index
    %c0_70 = arith.constant 0 : index
    %169 = vector.load %arg18[%c8_69, %c0_70] : memref<16x32xf32, #tpu.memory_space<vmem>>, vector<8x8xf32>
    tpu.vector_store %arg18[%c8_69, %c0_70], %168 {strides = array<i32>} : memref<16x32xf32, #tpu.memory_space<vmem>>, vector<8x8xf32>,
    %170 = vector.extract_strided_slice %145 {offsets = [0, 8], sizes = [8, 8], strides = [1, 1]} : vector<8x32xbf16> to vector<8x8xbf16>
    %171 = vector.extract_strided_slice %147 {offsets = [0, 8], sizes = [128, 8], strides = [1, 1]} : vector<128x32xbf16> to vector<128x8xbf16>
    %cst_71 = arith.constant dense<0.000000e+00> : vector<8x128xf32>
    %172 = tpu.matmul %170, %171, %cst_71 {dimension_numbers = #tpu.dot_dimension_numbers<[1], [1], [0], [0], [0, 0, 1, 0], [], []>} : vector<8x8xbf16>, vector<128x8xbf16>, vector<8x128xf32> -> vector<8x128xf32>
    %173 = vector.shape_cast %137 : vector<1x128xf32> to vector<1x128xf32>
    %174 = vector.broadcast %173 : vector<1x128xf32> to vector<8x128xf32>
    %175 = arith.select %144, %174, %172 : vector<8x128xi1>, vector<8x128xf32>
    %cst_72 = arith.constant dense<0xFF800000> : vector<8xf32>
    %176 = vector.multi_reduction <maximumf>, %175, %cst_72 [1] : vector<8x128xf32> to vector<8xf32>
    %177 = vector.shape_cast %176 : vector<8xf32> to vector<8x1xf32>
    %178 = vector.broadcast %177 : vector<8x1xf32> to vector<8x128xf32>
    %179 = arith.subf %175, %178 : vector<8x128xf32>
    %180 = math.exp %179 : vector<8x128xf32>
    %cst_73 = arith.constant dense<0.000000e+00> : vector<8xf32>
    %181 = vector.multi_reduction <add>, %180, %cst_73 [1] : vector<8x128xf32> to vector<8xf32>
    %182 = vector.shape_cast %181 : vector<8xf32> to vector<8x1xf32>
    %183 = tpu.reciprocal %182 {approx = true} : vector<8x1xf32> -> vector<8x1xf32>
    %184 = vector.broadcast %183 : vector<8x1xf32> to vector<8x128xf32>
    %185 = arith.mulf %180, %184 : vector<8x128xf32>
    %186 = arith.truncf %185 : vector<8x128xf32> to vector<8x128xbf16>
    %187 = vector.extract_strided_slice %149 {offsets = [0, 8], sizes = [128, 8], strides = [1, 1]} : vector<128x32xbf16> to vector<128x8xbf16>
    %cst_74 = arith.constant dense<0.000000e+00> : vector<8x8xf32>
    %188 = tpu.matmul %186, %187, %cst_74 {dimension_numbers = #tpu.dot_dimension_numbers<[1], [0], [0], [1], [0, 0, 1, 1], [], []>} : vector<8x128xbf16>, vector<128x8xbf16>, vector<8x8xf32> -> vector<8x8xf32>
    %c8_75 = arith.constant 8 : index
    %c8_76 = arith.constant 8 : index
    %189 = vector.load %arg18[%c8_75, %c8_76] : memref<16x32xf32, #tpu.memory_space<vmem>>, vector<8x8xf32>
    tpu.vector_store %arg18[%c8_75, %c8_76], %188 {strides = array<i32>} : memref<16x32xf32, #tpu.memory_space<vmem>>, vector<8x8xf32>,
    %190 = vector.extract_strided_slice %145 {offsets = [0, 16], sizes = [8, 8], strides = [1, 1]} : vector<8x32xbf16> to vector<8x8xbf16>
    %191 = vector.extract_strided_slice %147 {offsets = [0, 16], sizes = [128, 8], strides = [1, 1]} : vector<128x32xbf16> to vector<128x8xbf16>
    %cst_77 = arith.constant dense<0.000000e+00> : vector<8x128xf32>
    %192 = tpu.matmul %190, %191, %cst_77 {dimension_numbers = #tpu.dot_dimension_numbers<[1], [1], [0], [0], [0, 0, 1, 0], [], []>} : vector<8x8xbf16>, vector<128x8xbf16>, vector<8x128xf32> -> vector<8x128xf32>
    %193 = vector.shape_cast %137 : vector<1x128xf32> to vector<1x128xf32>
    %194 = vector.broadcast %193 : vector<1x128xf32> to vector<8x128xf32>
    %195 = arith.select %144, %194, %192 : vector<8x128xi1>, vector<8x128xf32>
    %cst_78 = arith.constant dense<0xFF800000> : vector<8xf32>
    %196 = vector.multi_reduction <maximumf>, %195, %cst_78 [1] : vector<8x128xf32> to vector<8xf32>
    %197 = vector.shape_cast %196 : vector<8xf32> to vector<8x1xf32>
    %198 = vector.broadcast %197 : vector<8x1xf32> to vector<8x128xf32>
    %199 = arith.subf %195, %198 : vector<8x128xf32>
    %200 = math.exp %199 : vector<8x128xf32>
    %cst_79 = arith.constant dense<0.000000e+00> : vector<8xf32>
    %201 = vector.multi_reduction <add>, %200, %cst_79 [1] : vector<8x128xf32> to vector<8xf32>
    %202 = vector.shape_cast %201 : vector<8xf32> to vector<8x1xf32>
    %203 = tpu.reciprocal %202 {approx = true} : vector<8x1xf32> -> vector<8x1xf32>
    %204 = vector.broadcast %203 : vector<8x1xf32> to vector<8x128xf32>
    %205 = arith.mulf %200, %204 : vector<8x128xf32>
    %206 = arith.truncf %205 : vector<8x128xf32> to vector<8x128xbf16>
    %207 = vector.extract_strided_slice %149 {offsets = [0, 16], sizes = [128, 8], strides = [1, 1]} : vector<128x32xbf16> to vector<128x8xbf16>
    %cst_80 = arith.constant dense<0.000000e+00> : vector<8x8xf32>
    %208 = tpu.matmul %206, %207, %cst_80 {dimension_numbers = #tpu.dot_dimension_numbers<[1], [0], [0], [1], [0, 0, 1, 1], [], []>} : vector<8x128xbf16>, vector<128x8xbf16>, vector<8x8xf32> -> vector<8x8xf32>
    %c8_81 = arith.constant 8 : index
    %c16_82 = arith.constant 16 : index
    %209 = vector.load %arg18[%c8_81, %c16_82] : memref<16x32xf32, #tpu.memory_space<vmem>>, vector<8x8xf32>
    tpu.vector_store %arg18[%c8_81, %c16_82], %208 {strides = array<i32>} : memref<16x32xf32, #tpu.memory_space<vmem>>, vector<8x8xf32>,
    %210 = vector.extract_strided_slice %145 {offsets = [0, 24], sizes = [8, 8], strides = [1, 1]} : vector<8x32xbf16> to vector<8x8xbf16>
    %211 = vector.extract_strided_slice %147 {offsets = [0, 24], sizes = [128, 8], strides = [1, 1]} : vector<128x32xbf16> to vector<128x8xbf16>
    %cst_83 = arith.constant dense<0.000000e+00> : vector<8x128xf32>
    %212 = tpu.matmul %210, %211, %cst_83 {dimension_numbers = #tpu.dot_dimension_numbers<[1], [1], [0], [0], [0, 0, 1, 0], [], []>} : vector<8x8xbf16>, vector<128x8xbf16>, vector<8x128xf32> -> vector<8x128xf32>
    %213 = vector.shape_cast %137 : vector<1x128xf32> to vector<1x128xf32>
    %214 = vector.broadcast %213 : vector<1x128xf32> to vector<8x128xf32>
    %215 = arith.select %144, %214, %212 : vector<8x128xi1>, vector<8x128xf32>
    %cst_84 = arith.constant dense<0xFF800000> : vector<8xf32>
    %216 = vector.multi_reduction <maximumf>, %215, %cst_84 [1] : vector<8x128xf32> to vector<8xf32>
    %217 = vector.shape_cast %216 : vector<8xf32> to vector<8x1xf32>
    %218 = vector.broadcast %217 : vector<8x1xf32> to vector<8x128xf32>
    %219 = arith.subf %215, %218 : vector<8x128xf32>
    %220 = math.exp %219 : vector<8x128xf32>
    %cst_85 = arith.constant dense<0.000000e+00> : vector<8xf32>
    %221 = vector.multi_reduction <add>, %220, %cst_85 [1] : vector<8x128xf32> to vector<8xf32>
    %222 = vector.shape_cast %221 : vector<8xf32> to vector<8x1xf32>
    %223 = tpu.reciprocal %222 {approx = true} : vector<8x1xf32> -> vector<8x1xf32>
    %224 = vector.broadcast %223 : vector<8x1xf32> to vector<8x128xf32>
    %225 = arith.mulf %220, %224 : vector<8x128xf32>
    %226 = arith.truncf %225 : vector<8x128xf32> to vector<8x128xbf16>
    %227 = vector.extract_strided_slice %149 {offsets = [0, 24], sizes = [128, 8], strides = [1, 1]} : vector<128x32xbf16> to vector<128x8xbf16>
    %cst_86 = arith.constant dense<0.000000e+00> : vector<8x8xf32>
    %228 = tpu.matmul %226, %227, %cst_86 {dimension_numbers = #tpu.dot_dimension_numbers<[1], [0], [0], [1], [0, 0, 1, 1], [], []>} : vector<8x128xbf16>, vector<128x8xbf16>, vector<8x8xf32> -> vector<8x8xf32>
    %c8_87 = arith.constant 8 : index
    %c24_88 = arith.constant 24 : index
    %229 = vector.load %arg18[%c8_87, %c24_88] : memref<16x32xf32, #tpu.memory_space<vmem>>, vector<8x8xf32>
    tpu.vector_store %arg18[%c8_87, %c24_88], %228 {strides = array<i32>} : memref<16x32xf32, #tpu.memory_space<vmem>>, vector<8x8xf32>,
    %c0_89 = arith.constant 0 : index
    %c0_90 = arith.constant 0 : index
    %230 = vector.load %arg18[%c0_89, %c0_90] : memref<16x32xf32, #tpu.memory_space<vmem>>, vector<16x32xf32>
    %231 = arith.truncf %230 : vector<16x32xf32> to vector<16x32xbf16>
    %c0_91 = arith.constant 0 : index
    %c0_92 = arith.constant 0 : index
    %232 = vector.load %arg7[%c0_91, %c0_92] : memref<32x32xbf16, #tpu.memory_space<vmem>>, vector<32x32xbf16>
    %cst_93 = arith.constant dense<0.000000e+00> : vector<16x32xf32>
    %233 = tpu.matmul %231, %232, %cst_93 {dimension_numbers = #tpu.dot_dimension_numbers<[1], [0], [0], [1], [0, 0, 1, 1], [], []>} : vector<16x32xbf16>, vector<32x32xbf16>, vector<16x32xf32> -> vector<16x32xf32>
    %c0_94 = arith.constant 0 : index
    %c0_95 = arith.constant 0 : index
    %234 = vector.load %arg8[%c0_94, %c0_95] : memref<1x32xf32, #tpu.memory_space<vmem>>, vector<1x32xf32>
    %235 = vector.broadcast %234 : vector<1x32xf32> to vector<16x32xf32>
    %236 = arith.addf %233, %235 : vector<16x32xf32>
    %c0_96 = arith.constant 0 : index
    %c0_97 = arith.constant 0 : index
    %c0_98 = arith.constant 0 : index
    %237 = vector.load %arg3[%c0_96, %c0_97, %c0_98] : memref<1x16x32xf32, #tpu.memory_space<vmem>>, vector<1x16x32xf32>
    %238 = vector.shape_cast %237 : vector<1x16x32xf32> to vector<16x32xf32>
    %239 = arith.addf %236, %238 : vector<16x32xf32>
    %cst_99 = arith.constant dense<0.000000e+00> : vector<16xf32>
    %240 = vector.multi_reduction <add>, %239, %cst_99 [1] : vector<16x32xf32> to vector<16xf32>
    %241 = vector.shape_cast %240 : vector<16xf32> to vector<16x1xf32>
    %cst_100 = arith.constant 3.200000e+01 : f32
    %242 = vector.broadcast %cst_100 : f32 to vector<16x1xf32>
    %243 = arith.divf %241, %242 : vector<16x1xf32>
    %244 = vector.broadcast %243 : vector<16x1xf32> to vector<16x32xf32>
    %245 = arith.subf %239, %244 : vector<16x32xf32>
    %246 = arith.mulf %245, %245 : vector<16x32xf32>
    %cst_101 = arith.constant dense<0.000000e+00> : vector<16xf32>
    %247 = vector.multi_reduction <add>, %246, %cst_101 [1] : vector<16x32xf32> to vector<16xf32>
    %248 = vector.shape_cast %247 : vector<16xf32> to vector<16x1xf32>
    %cst_102 = arith.constant 3.200000e+01 : f32
    %249 = vector.broadcast %cst_102 : f32 to vector<16x1xf32>
    %250 = arith.divf %248, %249 : vector<16x1xf32>
    %251 = vector.broadcast %243 : vector<16x1xf32> to vector<16x32xf32>
    %252 = arith.subf %239, %251 : vector<16x32xf32>
    %cst_103 = arith.constant 9.99999974E-6 : f32
    %253 = vector.broadcast %cst_103 : f32 to vector<16x1xf32>
    %254 = arith.addf %250, %253 : vector<16x1xf32>
    %255 = math.rsqrt %254 : vector<16x1xf32>
    %256 = vector.broadcast %255 : vector<16x1xf32> to vector<16x32xf32>
    %257 = arith.mulf %252, %256 : vector<16x32xf32>
    %c0_104 = arith.constant 0 : index
    %c0_105 = arith.constant 0 : index
    %258 = vector.load %arg9[%c0_104, %c0_105] : memref<1x32xf32, #tpu.memory_space<vmem>>, vector<1x32xf32>
    %259 = vector.broadcast %258 : vector<1x32xf32> to vector<16x32xf32>
    %260 = arith.mulf %257, %259 : vector<16x32xf32>
    %c0_106 = arith.constant 0 : index
    %c0_107 = arith.constant 0 : index
    %261 = vector.load %arg10[%c0_106, %c0_107] : memref<1x32xf32, #tpu.memory_space<vmem>>, vector<1x32xf32>
    %262 = vector.broadcast %261 : vector<1x32xf32> to vector<16x32xf32>
    %263 = arith.addf %260, %262 : vector<16x32xf32>
    %264 = arith.truncf %263 : vector<16x32xf32> to vector<16x32xbf16>
    %c0_108 = arith.constant 0 : index
    %c0_109 = arith.constant 0 : index
    %265 = vector.load %arg11[%c0_108, %c0_109] : memref<32x64xbf16, #tpu.memory_space<vmem>>, vector<32x64xbf16>
    %cst_110 = arith.constant dense<0.000000e+00> : vector<16x64xf32>
    %266 = tpu.matmul %264, %265, %cst_110 {dimension_numbers = #tpu.dot_dimension_numbers<[1], [0], [0], [1], [0, 0, 1, 1], [], []>} : vector<16x32xbf16>, vector<32x64xbf16>, vector<16x64xf32> -> vector<16x64xf32>
    %c0_111 = arith.constant 0 : index
    %c0_112 = arith.constant 0 : index
    %267 = vector.load %arg12[%c0_111, %c0_112] : memref<1x64xf32, #tpu.memory_space<vmem>>, vector<1x64xf32>
    %268 = vector.broadcast %267 : vector<1x64xf32> to vector<16x64xf32>
    %269 = arith.addf %266, %268 : vector<16x64xf32>
    %cst_113 = arith.constant 5.000000e-01 : f32
    %270 = vector.broadcast %cst_113 : f32 to vector<16x64xf32>
    %271 = arith.mulf %270, %269 : vector<16x64xf32>
    %cst_114 = arith.constant 4.471500e-02 : f32
    %272 = vector.broadcast %cst_114 : f32 to vector<16x64xf32>
    %273 = arith.mulf %272, %269 : vector<16x64xf32>
    %274 = arith.mulf %273, %269 : vector<16x64xf32>
    %275 = arith.mulf %274, %269 : vector<16x64xf32>
    %276 = arith.addf %269, %275 : vector<16x64xf32>
    %cst_115 = arith.constant 0.797884583 : f32
    %277 = vector.broadcast %cst_115 : f32 to vector<16x64xf32>
    %278 = arith.mulf %277, %276 : vector<16x64xf32>
    %279 = math.tanh %278 : vector<16x64xf32>
    %cst_116 = arith.constant 1.000000e+00 : f32
    %280 = vector.broadcast %cst_116 : f32 to vector<16x64xf32>
    %281 = arith.addf %280, %279 : vector<16x64xf32>
    %282 = arith.mulf %271, %281 : vector<16x64xf32>
    %283 = arith.truncf %282 : vector<16x64xf32> to vector<16x64xbf16>
    %c0_117 = arith.constant 0 : index
    %c0_118 = arith.constant 0 : index
    %284 = vector.load %arg13[%c0_117, %c0_118] : memref<64x32xbf16, #tpu.memory_space<vmem>>, vector<64x32xbf16>
    %cst_119 = arith.constant dense<0.000000e+00> : vector<16x32xf32>
    %285 = tpu.matmul %283, %284, %cst_119 {dimension_numbers = #tpu.dot_dimension_numbers<[1], [0], [0], [1], [0, 0, 1, 1], [], []>} : vector<16x64xbf16>, vector<64x32xbf16>, vector<16x32xf32> -> vector<16x32xf32>
    %c0_120 = arith.constant 0 : index
    %c0_121 = arith.constant 0 : index
    %286 = vector.load %arg14[%c0_120, %c0_121] : memref<1x32xf32, #tpu.memory_space<vmem>>, vector<1x32xf32>
    %287 = vector.broadcast %286 : vector<1x32xf32> to vector<16x32xf32>
    %288 = arith.addf %285, %287 : vector<16x32xf32>
    %289 = arith.addf %288, %263 : vector<16x32xf32>
    %cst_122 = arith.constant dense<0.000000e+00> : vector<16xf32>
    %290 = vector.multi_reduction <add>, %289, %cst_122 [1] : vector<16x32xf32> to vector<16xf32>
    %291 = vector.shape_cast %290 : vector<16xf32> to vector<16x1xf32>
    %cst_123 = arith.constant 3.200000e+01 : f32
    %292 = vector.broadcast %cst_123 : f32 to vector<16x1xf32>
    %293 = arith.divf %291, %292 : vector<16x1xf32>
    %294 = vector.broadcast %293 : vector<16x1xf32> to vector<16x32xf32>
    %295 = arith.subf %289, %294 : vector<16x32xf32>
    %296 = arith.mulf %295, %295 : vector<16x32xf32>
    %cst_124 = arith.constant dense<0.000000e+00> : vector<16xf32>
    %297 = vector.multi_reduction <add>, %296, %cst_124 [1] : vector<16x32xf32> to vector<16xf32>
    %298 = vector.shape_cast %297 : vector<16xf32> to vector<16x1xf32>
    %cst_125 = arith.constant 3.200000e+01 : f32
    %299 = vector.broadcast %cst_125 : f32 to vector<16x1xf32>
    %300 = arith.divf %298, %299 : vector<16x1xf32>
    %301 = vector.broadcast %293 : vector<16x1xf32> to vector<16x32xf32>
    %302 = arith.subf %289, %301 : vector<16x32xf32>
    %cst_126 = arith.constant 9.99999974E-6 : f32
    %303 = vector.broadcast %cst_126 : f32 to vector<16x1xf32>
    %304 = arith.addf %300, %303 : vector<16x1xf32>
    %305 = math.rsqrt %304 : vector<16x1xf32>
    %306 = vector.broadcast %305 : vector<16x1xf32> to vector<16x32xf32>
    %307 = arith.mulf %302, %306 : vector<16x32xf32>
    %c0_127 = arith.constant 0 : index
    %c0_128 = arith.constant 0 : index
    %308 = vector.load %arg15[%c0_127, %c0_128] : memref<1x32xf32, #tpu.memory_space<vmem>>, vector<1x32xf32>
    %309 = vector.broadcast %308 : vector<1x32xf32> to vector<16x32xf32>
    %310 = arith.mulf %307, %309 : vector<16x32xf32>
    %c0_129 = arith.constant 0 : index
    %c0_130 = arith.constant 0 : index
    %311 = vector.load %arg16[%c0_129, %c0_130] : memref<1x32xf32, #tpu.memory_space<vmem>>, vector<1x32xf32>
    %312 = vector.broadcast %311 : vector<1x32xf32> to vector<16x32xf32>
    %313 = arith.addf %310, %312 : vector<16x32xf32>
    %c0_131 = arith.constant 0 : index
    %c0_132 = arith.constant 0 : index
    %c0_133 = arith.constant 0 : index
    %314 = vector.load %arg17[%c0_131, %c0_132, %c0_133] : memref<1x16x32xf32, #tpu.memory_space<vmem>>, vector<1x16x32xf32>
    %315 = vector.shape_cast %314 : vector<1x16x32xf32> to vector<16x32xf32>
    %316 = vector.shape_cast %313 : vector<16x32xf32> to vector<1x16x32xf32>
    tpu.vector_store %arg17[%c0_131, %c0_132, %c0_133], %316 {strides = array<i32>} : memref<1x16x32xf32, #tpu.memory_space<vmem>>, vector<1x16x32xf32>,
    return
  }
  func.func @transform_0(%arg0: i32, %arg1: i32) -> (i32, i32, i32) {
    %c0_i32 = arith.constant 0 : i32
    %c0_i32_0 = arith.constant 0 : i32
    return %arg0, %arg1, %c0_i32 : i32, i32, i32
  }
  func.func @transform_1(%arg0: i32, %arg1: i32) -> (i32, i32, i32) {
    %c0_i32 = arith.constant 0 : i32
    %c0_i32_0 = arith.constant 0 : i32
    return %arg0, %arg1, %c0_i32 : i32, i32, i32
  }
  func.func @transform_2(%arg0: i32, %arg1: i32) -> (i32, i32, i32, i32) {
    %c0_i32 = arith.constant 0 : i32
    %c0_i32_0 = arith.constant 0 : i32
    %c0_i32_1 = arith.constant 0 : i32
    return %arg0, %arg1, %c0_i32, %c0_i32_0 : i32, i32, i32, i32
  }
  func.func @transform_3(%arg0: i32, %arg1: i32) -> (i32, i32, i32, i32) {
    %c0_i32 = arith.constant 0 : i32
    %c0_i32_0 = arith.constant 0 : i32
    %c0_i32_1 = arith.constant 0 : i32
    return %arg0, %arg1, %c0_i32, %c0_i32_0 : i32, i32, i32, i32
  }
  func.func @transform_4(%arg0: i32, %arg1: i32) -> (i32, i32, i32) {
    %c0_i32 = arith.constant 0 : i32
    %c0_i32_0 = arith.constant 0 : i32
    return %arg0, %arg1, %c0_i32 : i32, i32, i32
  }
  func.func @transform_5(%arg0: i32, %arg1: i32) -> (i32, i32) {
    %c0_i32 = arith.constant 0 : i32
    %c0_i32_0 = arith.constant 0 : i32
    %c0_i32_1 = arith.constant 0 : i32
    return %c0_i32, %c0_i32_0 : i32, i32
  }
  func.func @transform_6(%arg0: i32, %arg1: i32) -> (i32, i32) {
    %c0_i32 = arith.constant 0 : i32
    %c0_i32_0 = arith.constant 0 : i32
    %c0_i32_1 = arith.constant 0 : i32
    return %c0_i32, %c0_i32_0 : i32, i32
  }
  func.func @transform_7(%arg0: i32, %arg1: i32) -> (i32, i32) {
    %c0_i32 = arith.constant 0 : i32
    %c0_i32_0 = arith.constant 0 : i32
    %c0_i32_1 = arith.constant 0 : i32
    return %c0_i32, %c0_i32_0 : i32, i32
  }
  func.func @transform_8(%arg0: i32, %arg1: i32) -> (i32, i32) {
    %c0_i32 = arith.constant 0 : i32
    %c0_i32_0 = arith.constant 0 : i32
    %c0_i32_1 = arith.constant 0 : i32
    return %c0_i32, %c0_i32_0 : i32, i32
  }
  func.func @transform_9(%arg0: i32, %arg1: i32) -> (i32, i32) {
    %c0_i32 = arith.constant 0 : i32
    %c0_i32_0 = arith.constant 0 : i32
    %c0_i32_1 = arith.constant 0 : i32
    return %c0_i32, %c0_i32_0 : i32, i32
  }
  func.func @transform_10(%arg0: i32, %arg1: i32) -> (i32, i32) {
    %c0_i32 = arith.constant 0 : i32
    %c0_i32_0 = arith.constant 0 : i32
    %c0_i32_1 = arith.constant 0 : i32
    return %c0_i32, %c0_i32_0 : i32, i32
  }
  func.func @transform_11(%arg0: i32, %arg1: i32) -> (i32, i32) {
    %c0_i32 = arith.constant 0 : i32
    %c0_i32_0 = arith.constant 0 : i32
    %c0_i32_1 = arith.constant 0 : i32
    return %c0_i32, %c0_i32_0 : i32, i32
  }
  func.func @transform_12(%arg0: i32, %arg1: i32) -> (i32, i32) {
    %c0_i32 = arith.constant 0 : i32
    %c0_i32_0 = arith.constant 0 : i32
    %c0_i32_1 = arith.constant 0 : i32
    return %c0_i32, %c0_i32_0 : i32, i32
  }
  func.func @transform_13(%arg0: i32, %arg1: i32) -> (i32, i32) {
    %c0_i32 = arith.constant 0 : i32
    %c0_i32_0 = arith.constant 0 : i32
    %c0_i32_1 = arith.constant 0 : i32
    return %c0_i32, %c0_i32_0 : i32, i32
  }
  func.func @transform_14(%arg0: i32, %arg1: i32) -> (i32, i32) {
    %c0_i32 = arith.constant 0 : i32
    %c0_i32_0 = arith.constant 0 : i32
    %c0_i32_1 = arith.constant 0 : i32
    return %c0_i32, %c0_i32_0 : i32, i32
  }
  func.func @transform_15(%arg0: i32, %arg1: i32) -> (i32, i32, i32) {
    %c0_i32 = arith.constant 0 : i32
    %c0_i32_0 = arith.constant 0 : i32
    return %arg0, %arg1, %c0_i32 : i32, i32, i32
  }
}

</mosaic_0001>

<bundles_post_ra>
// kernel: tpu_custom_call.1
= control target key start
LH: loop header
LB: loop body
LE: loop exit
PB: predicated region body
PF: predicated region fallthrough
CT: control target
= control target key end

     0   :  { %s3472_s0 = inlined_call_operand.vmem [shape: bf16[2,16,32], index: 0, kind: input, shape index: {}]   ;;  %s3473_s1 = inlined_call_operand.vmem [shape: f32[2,16,32], index: 1, kind: input, shape index: {}]   ;;  %s3474_s2 = inlined_call_operand.vmem [shape: bf16[2,2,128,32], index: 2, kind: input, shape index: {}]   ;;  %s3475_s3 = inlined_call_operand.vmem [shape: bf16[2,2,128,32], index: 3, kind: input, shape index: {}]   ;;  %s3476_s4 = inlined_call_operand.vmem [shape: f32[2,16,1], index: 4, kind: input, shape index: {}]   ;;  %s3477_s5 = inlined_call_operand.vmem [shape: bf16[32,32], index: 5, kind: input, shape index: {}]   ;;  %s3478_s6 = inlined_call_operand.vmem [shape: f32[1,32], index: 6, kind: input, shape index: {}]   ;;  %s3479_s7 = inlined_call_operand.vmem [shape: f32[1,32], index: 7, kind: input, shape index: {}]   ;;  %s3480_s8 = inlined_call_operand.vmem [shape: f32[1,32], index: 8, kind: input, shape index: {}]   ;;  %s3481_s9 = inlined_call_operand.vmem [shape: bf16[32,64], index: 9, kind: input, shape index: {}]   ;;  %s3482_s10 = inlined_call_operand.vmem [shape: f32[1,64], index: 10, kind: input, shape index: {}]   ;;  %s3483_s11 = inlined_call_operand.vmem [shape: bf16[64,32], index: 11, kind: input, shape index: {}]   ;;  %s3484_s12 = inlined_call_operand.vmem [shape: f32[1,32], index: 12, kind: input, shape index: {}]   ;;  %s3485_s13 = inlined_call_operand.vmem [shape: f32[1,32], index: 13, kind: input, shape index: {}]   ;;  %s3486_s14 = inlined_call_operand.vmem [shape: f32[1,32], index: 14, kind: input, shape index: {}]   ;;  %s3487_s15 = inlined_call_operand.hbm [shape: f32[2,16,32], index: 15, kind: output, shape index: {}]  }
   0x1   :  { %3496 = sst [smem:[#allocation10_spill]] %s3472_s0 }
   0x2   :  { %3497 = sst [smem:[#allocation11_spill]] %s3474_s2 }
   0x3   :  { %20 = vsyncpa [#allocation4], 0 }
   0x4   :  { %22 = vsyncpa [#allocation4 + $0x1], 0  ;;  %s2797_s18 = smov 0   ;;  %s2799_s19 = smov 0  }
   0x5   :  { %s2801_s20 = smov 0   ;;  %s2803_s21 = smov 0  }
   0x6   :  { %s2805_s22 = smov 0   ;;  %s2807_s23 = smov 0  }
   0x7 LB: > { %3498 = sst [smem:[#allocation6_spill]] %s2693_s20  ;;  %s2237_s24 = sadd.s32 4294967295, %s2705_s23   ;;  %s2705_s23 = sphi %s2807_s23, %s28_s23   ;;  %s2701_s22 = sphi %s2805_s22, %s3517_s22   ;;  %s2697_s21 = sphi %s2803_s21, %s3516_s21   ;;  %s2693_s20 = sphi %s2801_s20, %s3515_s20   ;;  %s2689_s19 = sphi %s2799_s19, %s3519_s19   ;;  %s2685_s18 = sphi %s2797_s18, %s3518_s18  }
   0x8   : > { %3499 = sst [smem:[#allocation7_spill]] %s2701_s22  ;;  %s2238_s25 = sadd.s32 4294967294, %s2705_s23  }
   0x9   : > { %s40_s26 = sadd.s32 1, %s2701_s22  ;;  %s399_s27 = sadd.s32 1, %s2693_s20 }
   0xa   : > { %p42_p0 = scmp.ge.s32.totalorder %s40_s26, 2  ;;  %p409_p1 = scmp.ne.s32.totalorder %s2693_s20, %s2689_s19 }
   0xb   : > { %p410_p2 = scmp.eq.s32.totalorder %s2237_s24, 1  ;;  %p415_p3 = scmp.ne.s32.totalorder %s2689_s19, %s2685_s18 }
   0xc   : > { %s3521_s26 = smov (%p42_p0, %s40_s26), 0  ;;  %p416_p5 = scmp.eq.s32.totalorder %s2238_s25, 1 }
   0xd   : > { %3500 = sst [smem:[#allocation8_spill]] %s3521_s26  ;;  %p2837_p4 = por %p410_p2, %p409_p1 }
   0xe   : > { %s394_s29 = ssub.s32 %s2701_s22, %s3521_s26  ;;  %p2241_p6 = scmp.ge.s32.totalorder %s2705_s23, 1 }
   0xf   : > { %p397_p7 = scmp.eq.s32.totalorder %s394_s29, 0  ;;  %p2844_p8 = por %p416_p5, %p415_p3 }
  0x10   : > { %p531_p9 = scmp.lt.s32.totalorder %s2705_s23, 3 }
  0x11   : > { %s2850_s16 = scalar_select %p397_p7, %s2693_s20, %s399_s27  }
  0x12   : > { %p532_p10 = pnand %p2241_p6, %p531_p9 }
  0x13   : > { %3503 = sst [smem:[#allocation9_spill]] %s2850_s16  ;;  %p622_p11 = scmp.lt.s32.totalorder (!%p532_p10), %s2697_s21, 1 }
  0x14   : > { %535 = sbr.rel (%p532_p10) target bundleno = 2915 (0xb63), region = 80  ;;  %s3504_s2 = sld [smem:[#allocation11_spill]] (!%p532_p10) }
  0x15   : > { %s2708_s27 = smov (!%p532_p10), 120   ;;  %s3493_s22 = smov (!%p532_p10), 112  }
  0x16   : > { %s2710_s16 = smov (!%p532_p10), 104   ;;  %s3505_s0 = sld [smem:[#allocation10_spill]] (!%p532_p10) }
  0x19   : > { %v2707_v0 = vmov 0   ;;  %s2856_s17 = scalar_select %p622_p11, %s2697_s21, 1  ;;  %vm778_vm0 = vcmask 64512   ;;  %v686_v39 = vlaneseq  ;;  %v2711_v45 = vmov -1e+10  }
  0x1a   : > { %2572 = vset.pattern.permute.xlu0 %v2707_v0  ;;  %2573 = vset.pattern.permute.xlu2 %v2707_v0  ;;  %vm1005_vm11 = vcmask 130112   ;;  %vm1117_vm12 = vcmask 195712   ;;  %vm1229_vm13 = vcmask 261312   ;;  %vm1806_vm14 = vcmask 261120  }
  0x1b   : > { %s3491_s24 = sshll.u32 %s2856_s17, 4  ;;  %s3492_s25 = sshll.u32 %s2856_s17, 7  ;;  %v2956_v43 = vand.u32 127, %v686_v39 }
  0x1c   : > { %s2865_s26 = scalar_lea.vmem %s3504_s2, %s3492_s25  ;;  %s2872_s20 = scalar_lea.vmem %s3476_s4, %s3491_s24 }
  0x1d   : > { %v2473_v1 = vld [vmem:[%s2865_s26 + $0x38] sm:$0xff]  ;;  %v2472_v2 = vld [vmem:[%s2865_s26 + $0x30] sm:$0xff]  ;;  %v696_v3 = vld [vmem:[%s2872_s20] sm:$0xff]  ;;  %s2461_s29 = sshll.u32 %s2856_s17, 3  ;;  %vm693_vm2 = vcmp.ge.s32.totalorder %v2956_v43, 9  ;;  %s3508_s24 = sshll.u32 %s2856_s17, 7 }
  0x1e   : > { %v2470_v4 = vld [vmem:[%s2865_s26 + $0x20] sm:$0xff]  ;;  %vm697_vm1 = vcmp.eq.f32.partialorder %v696_v3, 0.0  ;;  %v804_v5 = vsel %vm778_vm0, %v2473_v1, 0  ;;  %909 = vrot.lane.b32.xlu1 %v2472_v2, %s2708_s27  ;;  %v801_v7 = vsel %vm778_vm0, %v2472_v2, 0  ;;  %v2471_v8 = vld [vmem:[%s2865_s26 + $0x28] sm:$0xff]  ;;  %v2885_v9 = vld [vmem:[%s2865_s26 + $0x18] sm:$0xff]  ;;  %s2909_s2 = scalar_lea.vmem %s3505_s0, %s2461_s29 }
  0x1f   : > { %v698_v6 = vsel %vm697_vm1, 1, %v2707_v0  ;;  %806 = vmatpush.bf16.xpose.msra.mxu0 %v804_v5  ;;  %905 = vrot.lane.b32.xlu2 %v2470_v4, %s2708_s27  ;;  %v798_v10 = vsel %vm778_vm0, %v2471_v8, 0  ;;  %v2893_v11 = vld [vmem:[%s2865_s26 + $0x10] sm:$0xff]  ;;  %v2896_v12 = vld [vmem:[%s2865_s26 + $0x8] sm:$0xff]  ;;  %v795_v13 = vsel %vm778_vm0, %v2470_v4, 0  ;;  %v792_v14 = vsel %vm778_vm0, %v2885_v9, 0 }
  0x20   : > { %700 = vperm.xlu0 %2572, %v698_v6   ;;  %v2914_v15 = vld [vmem:[%s2865_s26] sm:$0xff]  ;;  %v789_v19 = vsel %vm778_vm0, %v2893_v11, 0  ;;  %v786_v20 = vsel %vm778_vm0, %v2896_v12, 0  ;;  %v2960_v46 = vsel %vm693_vm2, -1e+30, %v2711_v45 }
  0x21   : > { %v675_v16 = vld [vmem:[%s2909_s2] sm:$0xf]  ;;  %v783_v21 = vsel %vm778_vm0, %v2914_v15, 0 }
  0x22   : > { %v893_v17 = vunpack.c.l.b16 %v675_v16 }
  0x24   : > { %v2920_v18 = vpack.c.b16 %v893_v17, %v893_v17 }
  0x26   : > { %907 = vrot.lane.b32.xlu1 %v2471_v8, %s2708_s27 }
  0x27   : > { %807 = vmatpush.bf16.xpose.msra.mxu0 %v801_v7  ;;  %903 = vrot.lane.b32.xlu2 %v2885_v9, %s2708_s27 }
  0x28   : > { %911 = vrot.lane.b32.xlu0 %v2473_v1, %s2708_s27 }
  0x2e   : > { %901 = vrot.lane.b32.xlu1 %v2893_v11, %s2708_s27 }
  0x2f   : > { %808 = vmatpush.bf16.xpose.msra.mxu0 %v798_v10  ;;  %899 = vrot.lane.b32.xlu2 %v2896_v12, %s2708_s27 }
  0x36   : > { %1023 = vrot.lane.b32.xlu1 %v2473_v1, %s3493_s22 }
  0x37   : > { %809 = vmatpush.bf16.xpose.msra.mxu0 %v795_v13  ;;  %1135 = vrot.lane.b32.xlu2 %v2473_v1, %s2710_s16 }
  0x3e   : > { %897 = vrot.lane.b32.xlu1 %v2914_v15, %s2708_s27 }
  0x3f   : > { %810 = vmatpush.bf16.xpose.msra.mxu0 %v792_v14  ;;  %1021 = vrot.lane.b32.xlu2 %v2472_v2, %s3493_s22 }
  0x46   : > { %1133 = vrot.lane.b32.xlu1 %v2472_v2, %s2710_s16 }
  0x47   : > { %811 = vmatpush.bf16.xpose.msra.mxu0 %v789_v19  ;;  %895 = vrot.lane.b32.xlu2 %v2920_v18, %s2708_s27 }
  0x4e   : > { %1019 = vrot.lane.b32.xlu1 %v2471_v8, %s3493_s22 }
  0x4f   : > { %812 = vmatpush.bf16.xpose.msra.mxu0 %v786_v20  ;;  %1131 = vrot.lane.b32.xlu2 %v2471_v8, %s2710_s16 }
  0x56   : > { %1017 = vrot.lane.b32.xlu1 %v2470_v4, %s3493_s22 }
  0x57   : > { %813 = vmatpush.bf16.xpose.msra.mxu0 %v783_v21  ;;  %1129 = vrot.lane.b32.xlu2 %v2470_v4, %s2710_s16 }
  0x5e   : > { %2285 = vmatmul.msk.bf16.vlgmr.msra.gmra.mxu0 %vm778_vm0, %v675_v16  ;;  %1127 = vrot.lane.b32.xlu1 %v2885_v9, %s2710_s16 }
  0x66   : > { %1013 = vrot.lane.b32.xlu1 %v2893_v11, %s3493_s22 }
  0x6e   : > { %1011 = vrot.lane.b32.xlu1 %v2896_v12, %s3493_s22 }
  0x76   : > { %1009 = vrot.lane.b32.xlu1 %v2914_v15, %s3493_s22 }
  0x79   : > { %v906_v28 = vpop.permute.xlu2 %905 }
  0x7a   : > { %v929_v31 = vsel %vm778_vm0, %v906_v28, 0 }
  0x7e   : > { %1007 = vrot.lane.b32.xlu1 %v2920_v18, %s3493_s22 }
  0x81   : > { %v904_v30 = vpop.permute.xlu2 %903 }
  0x82   : > { %v926_v32 = vsel %vm778_vm0, %v904_v30, 0 }
  0x89   : > { %v900_v34 = vpop.permute.xlu2 %899 }
  0x8a   : > { %v920_v38 = vsel %vm778_vm0, %v900_v34, 0 }
  0x90   : > { %v910_v25 = vpop.permute.xlu1 %909 }
  0x91   : > { %v935_v26 = vsel %vm778_vm0, %v910_v25, 0  ;;  %v1136_v37 = vpop.permute.xlu2 %1135  ;;  %v3054_v25 = vld [vmem:[%s2865_s26 + $0x70] sm:$0xff] }
  0x92   : > { %v701_v22 = vpop.permute.xlu0 %700  ;;  %v1162_v51 = vsel %vm778_vm0, %v1136_v37, 0 }
  0x93   : > { %vm702_vm3 = vcmp.eq.s32.totalorder %v701_v22, 1  ;;  %1164 = vmatpush.bf16.xpose.msrb.mxu0 %v1162_v51 }
  0x94   : > { %vm2962_vm4 = vmor %vm702_vm3, %vm693_vm2 }
  0x98   : > { %v908_v27 = vpop.permute.xlu1 %907 }
  0x99   : > { %v932_v29 = vsel %vm778_vm0, %v908_v27, 0  ;;  %v2953_v40 = vpop.permute.xlu2 %1021 }
  0x9a   : > { %v912_v23 = vpop.permute.xlu0 %911 }
  0x9b   : > { %v938_v24 = vsel %vm778_vm0, %v912_v23, 0  ;;  %v3048_v23 = vld [vmem:[%s2865_s26 + $0x78] sm:$0xff] }
  0x9c   : > { %940 = vmatpush.bf16.xpose.msra.mxu2 %v938_v24 }
  0xa0   : > { %v902_v33 = vpop.permute.xlu1 %901 }
  0xa1   : > { %v923_v35 = vsel %vm778_vm0, %v902_v33, 0  ;;  %v896_v44 = vpop.permute.xlu2 %895 }
  0xa4   : > { %941 = vmatpush.bf16.xpose.msra.mxu2 %v935_v26 }
  0xa8   : > { %v1024_v36 = vpop.permute.xlu1 %1023 }
  0xa9   : > { %v1132_v56 = vpop.permute.xlu2 %1131  ;;  %v1050_v7 = vsel %vm778_vm0, %v1024_v36, 0 }
  0xaa   : > { %v1156_v57 = vsel %vm778_vm0, %v1132_v56, 0  ;;  %v3103_v56 = vld [vmem:[%s2865_s26 + $0x58] sm:$0xff] }
  0xac   : > { %942 = vmatpush.bf16.xpose.msra.mxu2 %v932_v29  ;;  %v3066_v29 = vld [vmem:[%s2865_s26 + $0x60] sm:$0xff] }
  0xb0   : > { %v898_v41 = vpop.permute.xlu1 %897 }
  0xb1   : > { %v917_v42 = vsel %vm778_vm0, %v898_v41, 0  ;;  %v1130_v61 = vpop.permute.xlu2 %1129 }
  0xb2   : > { %v1153_v62 = vsel %vm778_vm0, %v1130_v61, 0 }
  0xb4   : > { %943 = vmatpush.bf16.xpose.msra.mxu2 %v929_v31 }
  0xb8   : > { %v1134_v52 = vpop.permute.xlu1 %1133 }
  0xb9   : > { %v1159_v53 = vsel %vm778_vm0, %v1134_v52, 0 }
  0xba   : > { %1165 = vmatpush.bf16.xpose.msrb.mxu0 %v1159_v53 }
  0xbc   : > { %944 = vmatpush.bf16.xpose.msra.mxu2 %v926_v32 }
  0xc0   : > { %v1020_v55 = vpop.permute.xlu1 %1019 }
  0xc1   : > { %v1044_v26 = vsel %vm778_vm0, %v1020_v55, 0 }
  0xc2   : > { %1166 = vmatpush.bf16.xpose.msrb.mxu0 %v1156_v57 }
  0xc4   : > { %945 = vmatpush.bf16.xpose.msra.mxu2 %v923_v35 }
  0xc8   : > { %v1018_v60 = vpop.permute.xlu1 %1017 }
  0xc9   : > { %v1041_v27 = vsel %vm778_vm0, %v1018_v60, 0 }
  0xca   : > { %1167 = vmatpush.bf16.xpose.msrb.mxu0 %v1153_v62 }
  0xcc   : > { %946 = vmatpush.bf16.xpose.msra.mxu2 %v920_v38 }
  0xd0   : > { %v1128_v3 = vpop.permute.xlu1 %1127 }
  0xd1   : > { %v1150_v4 = vsel %vm778_vm0, %v1128_v3, 0 }
  0xd2   : > { %1168 = vmatpush.bf16.xpose.msrb.mxu0 %v1150_v4 }
  0xd4   : > { %947 = vmatpush.bf16.xpose.msra.mxu2 %v917_v42 }
  0xd8   : > { %v1014_v30 = vpop.permute.xlu1 %1013 }
  0xd9   : > { %v1035_v31 = vsel %vm778_vm0, %v1014_v30, 0 }
  0xdb   : > { %2318 = vmatmul.msk.bf16.vlgmr.msra.gmra.mxu2 %vm778_vm0, %v896_v44  ;;  %v815_v48 = vpop.f32.mrf.mxu0 }
  0xdc   : > { %v819_v49 = vsel %vm2962_vm4, %v2960_v46, %v815_v48 }
  0xdd   : > { %820 = vmax.xlane.f32.xlu0 %v819_v49 }
  0xe0   : > { %v1012_v32 = vpop.permute.xlu1 %1011 }
  0xe1   : > { %v1032_v33 = vsel %vm778_vm0, %v1012_v32, 0 }
  0xe3   : > { %v817_v50 = vpop.f32.mrf.mxu0 }
  0xe8   : > { %v1010_v34 = vpop.permute.xlu1 %1009 }
  0xe9   : > { %v1029_v35 = vsel %vm778_vm0, %v1010_v34, 0  ;;  %v3136_v34 = vld [vmem:[%s2865_s26 + $0x48] sm:$0xff] }
  0xf0   : > { %v1008_v36 = vpop.permute.xlu1 %1007 }
  0xf1   : > { %1015 = vrot.lane.b32.xlu0 %v2885_v9, %s3493_s22  ;;  %s2987_s22 = scalar_lea.vmem %s3475_s3, %s3508_s24  ;;  %s3509_s24 = smov 112  }
  0xf2   : > { %v2990_v54 = vld [vmem:[%s2987_s22 + $0x38] sm:$0xff]  ;;  %v2995_v58 = vld [vmem:[%s2987_s22 + $0x30] sm:$0xff]  ;;  %v2999_v59 = vld [vmem:[%s2987_s22 + $0x28] sm:$0xff] }
  0xf3   : > { %878 = vmatpush.bf16.msra.mxu1 %v2990_v54  ;;  %v3006_v63 = vld [vmem:[%s2987_s22 + $0x20] sm:$0xff]  ;;  %v3012_v1 = vld [vmem:[%s2987_s22 + $0x18] sm:$0xff]  ;;  %v3016_v2 = vld [vmem:[%s2987_s22 + $0x10] sm:$0xff] }
  0xf4   : > { %v3021_v5 = vld [vmem:[%s2987_s22 + $0x8] sm:$0xff]  ;;  %v3027_v6 = vld [vmem:[%s2987_s22] sm:$0xff] }
  0xf7   : > { %879 = vmatpush.bf16.msra.mxu1 %v2995_v58 }
  0xf9   : > { %1125 = vrot.lane.b32.xlu0 %v2893_v11, %s2710_s16  ;;  %v1047_v11 = vsel %vm778_vm0, %v2953_v40, 0 }
  0xfb   : > { %880 = vmatpush.bf16.msra.mxu1 %v2999_v59 }
  0xff   : > { %881 = vmatpush.bf16.msra.mxu1 %v3006_v63 }
 0x101   : > { %1123 = vrot.lane.b32.xlu0 %v2896_v12, %s2710_s16 }
 0x103   : > { %882 = vmatpush.bf16.msra.mxu1 %v3012_v1 }
 0x107   : > { %883 = vmatpush.bf16.msra.mxu1 %v3016_v2 }
 0x109   : > { %1121 = vrot.lane.b32.xlu0 %v2914_v15, %s2710_s16 }
 0x10b   : > { %884 = vmatpush.bf16.msra.mxu1 %v3021_v5 }
 0x10f   : > { %885 = vmatpush.bf16.msra.mxu1 %v3027_v6 }
 0x111   : > { %1119 = vrot.lane.b32.xlu0 %v2920_v18, %s2710_s16 }
 0x113   : > { %1052 = vmatpush.bf16.xpose.msrb.mxu1 %v1050_v7 }
 0x119   : > { %976 = vrot.lane.b32.xlu0 %v2995_v58, %s2708_s27 }
 0x11b   : > { %1053 = vmatpush.bf16.xpose.msrb.mxu1 %v1047_v11 }
 0x121   : > { %974 = vrot.lane.b32.xlu0 %v2999_v59, %s2708_s27 }
 0x123   : > { %1054 = vmatpush.bf16.xpose.msrb.mxu1 %v1044_v26 }
 0x129   : > { %972 = vrot.lane.b32.xlu0 %v3006_v63, %s2708_s27 }
 0x12b   : > { %1055 = vmatpush.bf16.xpose.msrb.mxu1 %v1041_v27 }
 0x131   : > { %966 = vrot.lane.b32.xlu0 %v3021_v5, %s2708_s27 }
 0x150   : > { %v821_v8 = vpop.xlane.xlu0 %820 }
 0x151   : > { %v822_v9 = vsub.f32 %v819_v49, %v821_v8  ;;  %v3079_v49 = vld [vmem:[%s2865_s26 + $0x68] sm:$0xff] }
 0x152   : > { %1462 = vrot.lane.b32.xlu0 %v3079_v49, %s2708_s27 }
 0x153   : > { %v823_v10 = vmul.f32 1.442695, %v822_v9 }
 0x155   : > { %2581 = vpow2.f32 %v823_v10 }
 0x15a   : > { %1200 = vrot.lane.b32.xlu0 %v2995_v58, %s2710_s16 }
 0x15b   : > { %v2582_v12 = vpop.eup %2581 }
 0x15c   : > { %825 = vadd.xlane.f32.xlu2 %v2582_v12 }
 0x15e   : > { %v949_v13 = vpop.f32.mrf.mxu2 }
 0x15f   : > { %v953_v14 = vsel %vm2962_vm4, %v2960_v46, %v949_v13 }
 0x160   : > { %954 = vmax.xlane.f32.xlu1 %v953_v14 }
 0x162   : > { %1198 = vrot.lane.b32.xlu0 %v2999_v59, %s2710_s16 }
 0x163   : > { %v1016_v15 = vpop.permute.xlu0 %1015 }
 0x164   : > { %v1038_v28 = vsel %vm778_vm0, %v1016_v15, 0 }
 0x165   : > { %1056 = vmatpush.bf16.xpose.msrb.mxu1 %v1038_v28 }
 0x166   : > { %v951_v16 = vpop.f32.mrf.mxu2 }
 0x16a   : > { %1082 = vrot.lane.b32.xlu0 %v3012_v1, %s3509_s24 }
 0x16b   : > { %v1126_v17 = vpop.permute.xlu0 %1125 }
 0x16c   : > { %v1147_v18 = vsel %vm778_vm0, %v1126_v17, 0 }
 0x16d   : > { %1169 = vmatpush.bf16.xpose.msrb.mxu0 %v1147_v18  ;;  %1057 = vmatpush.bf16.xpose.msrb.mxu1 %v1035_v31 }
 0x173   : > { %v1124_v19 = vpop.permute.xlu0 %1123 }
 0x174   : > { %v1144_v20 = vsel %vm778_vm0, %v1124_v19, 0  ;;  %978 = vrot.lane.b32.xlu2 %v2990_v54, %s2708_s27 }
 0x175   : > { %1170 = vmatpush.bf16.xpose.msrb.mxu0 %v1144_v20  ;;  %1058 = vmatpush.bf16.xpose.msrb.mxu1 %v1032_v33 }
 0x179   : > { %968 = vrot.lane.b32.xlu1 %v3016_v2, %s2708_s27 }
 0x17b   : > { %v1122_v21 = vpop.permute.xlu0 %1121 }
 0x17c   : > { %v1141_v22 = vsel %vm778_vm0, %v1122_v21, 0  ;;  %970 = vrot.lane.b32.xlu2 %v3012_v1, %s2708_s27 }
 0x17d   : > { %1171 = vmatpush.bf16.xpose.msrb.mxu0 %v1141_v22  ;;  %1059 = vmatpush.bf16.xpose.msrb.mxu1 %v1029_v35 }
 0x181   : > { %1466 = vrot.lane.b32.xlu1 %v3048_v23, %s2708_s27 }
 0x183   : > { %v1120_v24 = vpop.permute.xlu0 %1119 }
 0x184   : > { %2320 = vmatmul.msk.bf16.vlgmr.msrb.gmra.mxu0 %vm778_vm0, %v1120_v24 }
 0x189   : > { %1464 = vrot.lane.b32.xlu1 %v3054_v25, %s2708_s27 }
 0x18b   : > { %v977_v57 = vpop.permute.xlu0 %976 }
 0x191   : > { %1090 = vrot.lane.b32.xlu1 %v2990_v54, %s3509_s24 }
 0x199   : > { %1088 = vrot.lane.b32.xlu1 %v2995_v58, %s3509_s24 }
 0x1a1   : > { %1460 = vrot.lane.b32.xlu1 %v3066_v29, %s2708_s27 }
 0x1a9   : > { %1196 = vrot.lane.b32.xlu1 %v3006_v63, %s2710_s16 }
 0x1cf   : > { %v826_v37 = vpop.xlane.xlu2 %825 }
 0x1d0   : > { %2583 = vrcp.f32 %v826_v37 }
 0x1d3   : > { %v955_v38 = vpop.xlane.xlu1 %954 }
 0x1d4   : > { %v956_v39 = vsub.f32 %v953_v14, %v955_v38 }
 0x1d6   : > { %v2584_v40 = vpop.eup %2583  ;;  %v957_v41 = vmul.f32 1.442695, %v956_v39 }
 0x1d7   : > { %v828_v42 = vmul.f32 %v2584_v40, %v2582_v12  ;;  %v979_v60 = vpop.permute.xlu2 %978 }
 0x1d8   : > { %2585 = vpow2.f32 %v957_v41  ;;  %988 = vmatpush.bf16.msra.mxu3 %v979_v60  ;;  %v1356_v60 = vsel %vm778_vm0, %v3054_v25, 0 }
 0x1d9   : > { %v829_v44 = vpack.c.bf16 %v828_v42, %v828_v42 }
 0x1db   : > { %886 = vmatmul.bf16.vlgmr.msra.gmra.mxu1 %v829_v44  ;;  %v3154_v44 = vld [vmem:[%s2865_s26 + $0x40] sm:$0xff] }
 0x1dc   : > { %989 = vmatpush.bf16.msra.mxu3 %v977_v57 }
 0x1de   : > { %v2586_v48 = vpop.eup %2585 }
 0x1df   : > { %959 = vadd.xlane.f32.xlu1 %v2586_v48  ;;  %v971_v62 = vpop.permute.xlu2 %970 }
 0x1eb   : > { %2319 = vmatmul.msk.bf16.vlgmr.msrb.gmra.mxu1 %vm778_vm0, %v1008_v36  ;;  %v969_v53 = vpop.permute.xlu1 %968 }
 0x1f3   : > { %v3100_v55 = vpop.permute.xlu1 %1466 }
 0x1f4   : > { %v1493_v36 = vsel %vm778_vm0, %v3100_v55, 0 }
 0x1f8   : > { %1194 = vrot.lane.b32.xlu1 %v3012_v1, %s2710_s16  ;;  %v3116_v1 = vld [vmem:[%s2865_s26 + $0x50] sm:$0xff]  ;;  %s2714_s26 = smov 24  }
 0x1fb   : > { %v3107_v58 = vpop.permute.xlu1 %1464 }
 0x1fc   : > { %v1490_v37 = vsel %vm778_vm0, %v3107_v58, 0 }
 0x201   : > { %v1173_v50 = vpop.f32.mrf.mxu0 }
 0x202   : > { %v1177_v51 = vsel %vm2962_vm4, %v2960_v46, %v1173_v50 }
 0x203   : > { %1178 = vmax.xlane.f32.xlu2 %v1177_v51 }
 0x209   : > { %v1175_v52 = vpop.f32.mrf.mxu0 }
 0x21b   : > { %964 = vrot.lane.b32.xlu2 %v3027_v6, %s2708_s27 }
 0x223   : > { %1202 = vrot.lane.b32.xlu2 %v2990_v54, %s2710_s16  ;;  %v975_v54 = vpop.permute.xlu0 %974 }
 0x224   : > { %990 = vmatpush.bf16.msra.mxu3 %v975_v54 }
 0x22b   : > { %1086 = vrot.lane.b32.xlu2 %v2999_v59, %s3509_s24  ;;  %v1091_v59 = vpop.permute.xlu1 %1090  ;;  %v973_v61 = vpop.permute.xlu0 %972 }
 0x22c   : > { %991 = vmatpush.bf16.msra.mxu3 %v973_v61 }
 0x230   : > { %992 = vmatpush.bf16.msra.mxu3 %v971_v62  ;;  %v1353_v62 = vsel %vm778_vm0, %v3079_v49, 0 }
 0x233   : > { %1084 = vrot.lane.b32.xlu2 %v3006_v63, %s3509_s24  ;;  %v1089_v63 = vpop.permute.xlu1 %1088  ;;  %v967_v4 = vpop.permute.xlu0 %966 }
 0x234   : > { %993 = vmatpush.bf16.msra.mxu3 %v969_v53  ;;  %v676_v53 = vld [vmem:[%s2909_s2 + $0x4] sm:$0xf]  ;;  %s2712_s2 = smov 16  }
 0x235   : > { %v1448_v58 = vunpack.c.l.b16 %v676_v53 }
 0x237   : > { %v3169_v54 = vpack.c.b16 %v1448_v58, %v1448_v58 }
 0x238   : > { %994 = vmatpush.bf16.msra.mxu3 %v967_v4  ;;  %v1347_v4 = vsel %vm778_vm0, %v3103_v56, 0 }
 0x23b   : > { %1458 = vrot.lane.b32.xlu2 %v3103_v56, %s2708_s27  ;;  %v3121_v7 = vpop.permute.xlu1 %1460  ;;  %v1463_v15 = vpop.permute.xlu0 %1462 }
 0x23c   : > { %v1487_v40 = vsel %vm778_vm0, %v1463_v15, 0  ;;  %v1484_v42 = vsel %vm778_vm0, %v3121_v7, 0 }
 0x243   : > { %1080 = vrot.lane.b32.xlu2 %v3016_v2, %s3509_s24  ;;  %v1197_v8 = vpop.permute.xlu1 %1196  ;;  %v1201_v19 = vpop.permute.xlu0 %1200 }
 0x24b   : > { %1192 = vrot.lane.b32.xlu2 %v3016_v2, %s2710_s16  ;;  %v1199_v21 = vpop.permute.xlu0 %1198 }
 0x252   : > { %v960_v11 = vpop.xlane.xlu1 %959 }
 0x253   : > { %1078 = vrot.lane.b32.xlu2 %v3021_v5, %s3509_s24  ;;  %2587 = vrcp.f32 %v960_v11  ;;  %v1341_v11 = vsel %vm778_vm0, %v3136_v34, 0 }
 0x258   : > { %v887_v3 = vpop.f32.mrf.mxu1 }
 0x259   : > { %891 = vst.msk [vmem:[#allocation2] sm:$0xff] %vm778_vm0, %v887_v3  ;;  %v2588_v16 = vpop.eup %2587 }
 0x25b   : > { %1456 = vrot.lane.b32.xlu2 %v3116_v1, %s2708_s27 }
 0x260   : > { %v889_v2 = vpop.f32.mrf.mxu1 }
 0x261   : > { %v1344_v2 = vsel %vm778_vm0, %v3116_v1, 0 }
 0x263   : > { %1190 = vrot.lane.b32.xlu2 %v3021_v5, %s2710_s16  ;;  %v962_v5 = vmul.f32 %v2588_v16, %v2586_v48 }
 0x268   : > { %v1061_v9 = vpop.f32.mrf.mxu1 }
 0x269   : > { %v1065_v10 = vsel %vm2962_vm4, %v2960_v46, %v1061_v9  ;;  %v963_v46 = vpack.c.bf16 %v962_v5, %v962_v5  ;;  %v3192_v5 = vld [vmem:[%s2987_s22 + $0x78] sm:$0xff] }
 0x26a   : > { %1066 = vmax.xlane.f32.xlu0 %v1065_v10  ;;  %v1195_v27 = vpop.permute.xlu1 %1194  ;;  %1433 = vmatpush.bf16.msra.mxu1 %v3192_v5 }
 0x26b   : > { %1188 = vrot.lane.b32.xlu2 %v3027_v6, %s2710_s16 }
 0x270   : > { %v1063_v12 = vpop.f32.mrf.mxu1 }
 0x271   : > { %v1338_v12 = vsel %vm778_vm0, %v3154_v44, 0 }
 0x273   : > { %1452 = vrot.lane.b32.xlu2 %v3154_v44, %s2708_s27 }
 0x276   : > { %v1179_v13 = vpop.xlane.xlu2 %1178 }
 0x277   : > { %v1180_v14 = vsub.f32 %v1177_v51, %v1179_v13  ;;  %v1359_v51 = vsel %vm778_vm0, %v3048_v23, 0 }
 0x279   : > { %v1181_v17 = vmul.f32 1.442695, %v1180_v14 }
 0x27b   : > { %2589 = vpow2.f32 %v1181_v17  ;;  %v1250_v17 = vld [vmem:[%s2872_s20 + $0x8] sm:$0xff]  ;;  %s3495_s20 = smov 8  }
 0x27c   : > { %vm1251_vm5 = vcmp.eq.f32.partialorder %v1250_v17, 0.0 }
 0x27e   : > { %v965_v18 = vpop.permute.xlu2 %964  ;;  %1076 = vrot.lane.b32.xlu0 %v3027_v6, %s3509_s24  ;;  %v1083_v6 = vpop.permute.xlu0 %1082 }
 0x27f   : > { %995 = vmatpush.bf16.msra.mxu3 %v965_v18  ;;  %v3195_v18 = vld [vmem:[%s2987_s22 + $0x70] sm:$0xff] }
 0x280   : > { %1434 = vmatpush.bf16.msra.mxu1 %v3195_v18 }
 0x281   : > { %v3132_v47 = vpop.eup %2589 }
 0x282   : > { %1183 = vadd.xlane.f32.xlu1 %v3132_v47  ;;  %996 = vmatmul.bf16.vlgmr.msra.gmra.mxu3 %v963_v46  ;;  %v1252_v46 = vsel %vm1251_vm5, 1, %v2707_v0 }
 0x283   : > { %1100 = vmatpush.bf16.msrb.mxu3 %v1091_v59  ;;  %1254 = vperm.xlu2 %2573, %v1252_v46  }
 0x286   : > { %v1203_v20 = vpop.permute.xlu2 %1202 }
 0x287   : > { %1101 = vmatpush.bf16.msrb.mxu3 %v1089_v63  ;;  %1212 = vmatpush.bf16.msrb.mxu2 %v1203_v20 }
 0x28b   : > { %1213 = vmatpush.bf16.msrb.mxu2 %v1201_v19  ;;  %v3205_v19 = vld [vmem:[%s2987_s22 + $0x68] sm:$0xff] }
 0x28c   : > { %1435 = vmatpush.bf16.msra.mxu1 %v3205_v19 }
 0x28e   : > { %v1087_v22 = vpop.permute.xlu2 %1086 }
 0x28f   : > { %1102 = vmatpush.bf16.msrb.mxu3 %v1087_v22  ;;  %1214 = vmatpush.bf16.msrb.mxu2 %v1199_v21  ;;  %v1243_v21 = vadd.s32 6, %v2956_v43 }
 0x291   : > { %vm1245_vm6 = vcmp.lt.s32.totalorder %v1243_v21, 7  ;;  %vm1247_vm7 = vcmp.ge.s32.totalorder %v1243_v21, 16 }
 0x292   : > { %vm1248_vm8 = vmor %vm1245_vm6, %vm1247_vm7  ;;  %vm1984_vm6 = vcmask 523264  }
 0x293   : > { %1215 = vmatpush.bf16.msrb.mxu2 %v1197_v8 }
 0x296   : > { %v1085_v24 = vpop.permute.xlu2 %1084 }
 0x297   : > { %1103 = vmatpush.bf16.msrb.mxu3 %v1085_v24  ;;  %1216 = vmatpush.bf16.msrb.mxu2 %v1195_v27 }
 0x29b   : > { %1104 = vmatpush.bf16.msrb.mxu3 %v1083_v6  ;;  %1454 = vrot.lane.b32.xlu1 %v3136_v34, %s2708_s27 }
 0x29e   : > { %v1459_v26 = vpop.permute.xlu2 %1458 }
 0x29f   : > { %v1481_v50 = vsel %vm778_vm0, %v1459_v26, 0  ;;  %v3224_v26 = vld [vmem:[%s2987_s22 + $0x60] sm:$0xff] }
 0x2a0   : > { %1436 = vmatpush.bf16.msra.mxu1 %v3224_v26 }
 0x2a3   : > { %1577 = vrot.lane.b32.xlu1 %v3048_v23, %s3509_s24 }
 0x2a6   : > { %v1081_v28 = vpop.permute.xlu2 %1080 }
 0x2a7   : > { %1105 = vmatpush.bf16.msrb.mxu3 %v1081_v28 }
 0x2ab   : > { %1688 = vrot.lane.b32.xlu1 %v3048_v23, %s2710_s16 }
 0x2ae   : > { %v1193_v30 = vpop.permute.xlu2 %1192 }
 0x2af   : > { %1217 = vmatpush.bf16.msrb.mxu2 %v1193_v30 }
 0x2b3   : > { %1575 = vrot.lane.b32.xlu1 %v3054_v25, %s3509_s24 }
 0x2b6   : > { %v1079_v31 = vpop.permute.xlu2 %1078 }
 0x2b7   : > { %1106 = vmatpush.bf16.msrb.mxu3 %v1079_v31 }
 0x2bb   : > { %1686 = vrot.lane.b32.xlu1 %v3054_v25, %s2710_s16  ;;  %v1350_v25 = vsel %vm778_vm0, %v3066_v29, 0 }
 0x2be   : > { %v1457_v32 = vpop.permute.xlu2 %1456 }
 0x2bf   : > { %v1478_v55 = vsel %vm778_vm0, %v1457_v32, 0  ;;  %v3240_v32 = vld [vmem:[%s2987_s22 + $0x58] sm:$0xff] }
 0x2c0   : > { %1437 = vmatpush.bf16.msra.mxu1 %v3240_v32 }
 0x2c3   : > { %1573 = vrot.lane.b32.xlu1 %v3079_v49, %s3509_s24 }
 0x2c6   : > { %v1191_v33 = vpop.permute.xlu2 %1190 }
 0x2c7   : > { %1218 = vmatpush.bf16.msrb.mxu2 %v1191_v33 }
 0x2cb   : > { %1531 = vrot.lane.b32.xlu1 %v3195_v18, %s2708_s27 }
 0x2ce   : > { %v1189_v35 = vpop.permute.xlu2 %1188 }
 0x2cf   : > { %1219 = vmatpush.bf16.msrb.mxu2 %v1189_v35 }
 0x2d3   : > { %1495 = vmatpush.bf16.xpose.msra.mxu2 %v1493_v36  ;;  %1571 = vrot.lane.b32.xlu1 %v3066_v29, %s3509_s24 }
 0x2d6   : > { %v1453_v9 = vpop.permute.xlu2 %1452 }
 0x2db   : > { %1496 = vmatpush.bf16.xpose.msra.mxu2 %v1490_v37  ;;  %1682 = vrot.lane.b32.xlu1 %v3066_v29, %s2710_s16  ;;  %v3228_v29 = vsel %vm1248_vm8, -1e+30, %v2711_v45  ;;  %v3247_v37 = vld [vmem:[%s2987_s22 + $0x50] sm:$0xff] }
 0x2dc   : > { %1438 = vmatpush.bf16.msra.mxu1 %v3247_v37 }
 0x2dd   : > { %v1067_v38 = vpop.xlane.xlu0 %1066 }
 0x2de   : > { %v1068_v39 = vsub.f32 %v1065_v10, %v1067_v38  ;;  %v1472_v10 = vsel %vm778_vm0, %v1453_v9, 0  ;;  %v1255_v24 = vpop.permute.xlu2 %1254 }
 0x2df   : > { %vm1256_vm9 = vcmp.eq.s32.totalorder %v1255_v24, 1 }
 0x2e0   : > { %v1069_v41 = vmul.f32 1.442695, %v1068_v39  ;;  %vm3230_vm10 = vmor %vm1256_vm9, %vm1248_vm8 }
 0x2e2   : > { %2591 = vpow2.f32 %v1069_v41 }
 0x2e3   : > { %1497 = vmatpush.bf16.xpose.msra.mxu2 %v1487_v40  ;;  %1569 = vrot.lane.b32.xlu1 %v3103_v56, %s3509_s24 }
 0x2e8   : > { %v2592_v48 = vpop.eup %2591 }
 0x2e9   : > { %1071 = vadd.xlane.f32.xlu0 %v2592_v48 }
 0x2eb   : > { %1498 = vmatpush.bf16.xpose.msra.mxu2 %v1484_v42 }
 0x2f0   : > { %v1077_v52 = vpop.permute.xlu0 %1076 }
 0x2f1   : > { %1107 = vmatpush.bf16.msrb.mxu3 %v1077_v52 }
 0x2f3   : > { %1499 = vmatpush.bf16.xpose.msra.mxu2 %v1481_v50 }
 0x2f5   : > { %1361 = vmatpush.bf16.xpose.msra.mxu3 %v1359_v51  ;;  %v1184_v57 = vpop.xlane.xlu1 %1183 }
 0x2f6   : > { %2593 = vrcp.f32 %v1184_v57 }
 0x2fb   : > { %1500 = vmatpush.bf16.xpose.msra.mxu2 %v1478_v55 }
 0x2fc   : > { %v2594_v23 = vpop.eup %2593 }
 0x2fd   : > { %1362 = vmatpush.bf16.xpose.msra.mxu3 %v1356_v60  ;;  %1450 = vrot.lane.b32.xlu0 %v3169_v54, %s2708_s27  ;;  %v1186_v59 = vmul.f32 %v2594_v23, %v3132_v47 }
 0x2ff   : > { %v1187_v61 = vpack.c.bf16 %v1186_v59, %v1186_v59 }
 0x301   : > { %1220 = vmatmul.bf16.vlgmr.msrb.gmra.mxu2 %v1187_v61 }
 0x305   : > { %1363 = vmatpush.bf16.xpose.msra.mxu3 %v1353_v62  ;;  %v3176_v63 = vpop.f32.mrf.mxu3  ;;  %1533 = vrot.lane.b32.xlu0 %v3192_v5, %s2708_s27 }
 0x30d   : > { %1364 = vmatpush.bf16.xpose.msra.mxu3 %v1350_v25  ;;  %v999_v3 = vpop.f32.mrf.mxu3  ;;  %v1455_v7 = vpop.permute.xlu1 %1454  ;;  %1529 = vrot.lane.b32.xlu0 %v3205_v19, %s2708_s27 }
 0x30e   : > { %v1475_v8 = vsel %vm778_vm0, %v1455_v7, 0 }
 0x30f   : > { %1501 = vmatpush.bf16.xpose.msra.mxu2 %v1475_v8 }
 0x315   : > { %1365 = vmatpush.bf16.xpose.msra.mxu3 %v1347_v4  ;;  %v1578_v6 = vpop.permute.xlu1 %1577 }
 0x316   : > { %v1604_v51 = vsel %vm778_vm0, %v1578_v6, 0 }
 0x317   : > { %1502 = vmatpush.bf16.xpose.msra.mxu2 %v1472_v10 }
 0x31d   : > { %1366 = vmatpush.bf16.xpose.msra.mxu3 %v1344_v2  ;;  %v3237_v31 = vpop.permute.xlu1 %1688 }
 0x325   : > { %1367 = vmatpush.bf16.xpose.msra.mxu3 %v1341_v11  ;;  %v1576_v36 = vpop.permute.xlu1 %1575 }
 0x32d   : > { %1368 = vmatpush.bf16.xpose.msra.mxu3 %v1338_v12  ;;  %v3250_v39 = vpop.permute.xlu1 %1686 }
 0x335   : > { %v1574_v40 = vpop.permute.xlu1 %1573 }
 0x336   : > { %v1598_v52 = vsel %vm778_vm0, %v1574_v40, 0 }
 0x33d   : > { %v1532_v42 = vpop.permute.xlu1 %1531 }
 0x345   : > { %v1572_v3 = vpop.permute.xlu1 %1571 }
 0x346   : > { %v1595_v4 = vsel %vm778_vm0, %v1572_v3, 0 }
 0x34d   : > { %v1683_v2 = vpop.permute.xlu1 %1682 }
 0x355   : > { %v1570_v9 = vpop.permute.xlu1 %1569 }
 0x356   : > { %v1592_v10 = vsel %vm778_vm0, %v1570_v9, 0 }
 0x35c   : > { %v1072_v13 = vpop.xlane.xlu0 %1071 }
 0x35d   : > { %2595 = vrcp.f32 %v1072_v13  ;;  %v1712_v13 = vsel %vm778_vm0, %v3250_v39, 0 }
 0x363   : > { %v2596_v14 = vpop.eup %2595 }
 0x364   : > { %v1074_v15 = vmul.f32 %v2596_v14, %v2592_v48  ;;  %v3259_v48 = vld [vmem:[%s2987_s22 + $0x48] sm:$0xff] }
 0x365   : > { %1439 = vmatpush.bf16.msra.mxu1 %v3259_v48 }
 0x366   : > { %v1075_v16 = vpack.c.bf16 %v1074_v15, %v1074_v15  ;;  %v1706_v15 = vsel %vm778_vm0, %v1683_v2, 0 }
 0x368   : > { %1108 = vmatmul.bf16.vlgmr.msrb.gmra.mxu3 %v1075_v16 }
 0x36f   : > { %v1451_v47 = vpop.permute.xlu0 %1450 }
 0x370   : > { %2418 = vmatmul.msk.bf16.vlgmr.msra.gmra.mxu2 %vm778_vm0, %v1451_v47 }
 0x377   : > { %v1534_v41 = vpop.permute.xlu0 %1533 }
 0x378   : > { %2385 = vmatmul.msk.bf16.vlgmr.msra.gmra.mxu3 %vm778_vm0, %v676_v53  ;;  %1543 = vmatpush.bf16.msra.mxu0 %v1534_v41 }
 0x37c   : > { %1544 = vmatpush.bf16.msra.mxu0 %v1532_v42 }
 0x37f   : > { %v1530_v50 = vpop.permute.xlu0 %1529 }
 0x380   : > { %1545 = vmatpush.bf16.msra.mxu0 %v1530_v50 }
 0x384   : > { %v3216_v0 = vpop.f32.mrf.mxu2 }
 0x38c   : > { %v1223_v20 = vpop.f32.mrf.mxu2 }
 0x3eb   : > { %v3221_v22 = vpop.f32.mrf.mxu3 }
 0x3f3   : > { %v1111_v43 = vpop.f32.mrf.mxu3  ;;  %v1504_v28 = vpop.f32.mrf.mxu2 }
 0x3f4   : > { %v1508_v30 = vsel %vm3230_vm10, %v3228_v29, %v1504_v28 }
 0x3f5   : > { %1509 = vmax.xlane.f32.xlu2 %v1508_v30 }
 0x3fb   : > { %v1370_v33 = vpop.f32.mrf.mxu3  ;;  %v1506_v45 = vpop.f32.mrf.mxu2 }
 0x3fc   : > { %v1374_v35 = vsel %vm3230_vm10, %v3228_v29, %v1370_v33 }
 0x3fd   : > { %1375 = vmax.xlane.f32.xlu0 %v1374_v35 }
 0x403   : > { %v1372_v38 = vpop.f32.mrf.mxu3 }
 0x40d   : > { %1684 = vrot.lane.b32.xlu2 %v3079_v49, %s2710_s16  ;;  %v3266_v49 = vld [vmem:[%s2987_s22 + $0x40] sm:$0xff] }
 0x40e   : > { %1440 = vmatpush.bf16.msra.mxu1 %v3266_v49 }
 0x411   : > { %1680 = vrot.lane.b32.xlu0 %v3103_v56, %s2710_s16  ;;  %v1601_v56 = vsel %vm778_vm0, %v1576_v36, 0 }
 0x412   : > { %1606 = vmatpush.bf16.xpose.msrb.mxu1 %v1604_v51 }
 0x415   : > { %1527 = vrot.lane.b32.xlu2 %v3224_v26, %s2708_s27 }
 0x41a   : > { %1607 = vmatpush.bf16.xpose.msrb.mxu1 %v1601_v56 }
 0x41d   : > { %1525 = vrot.lane.b32.xlu2 %v3240_v32, %s2708_s27 }
 0x422   : > { %1608 = vmatpush.bf16.xpose.msrb.mxu1 %v1598_v52 }
 0x425   : > { %1523 = vrot.lane.b32.xlu2 %v3247_v37, %s2708_s27 }
 0x42a   : > { %1609 = vmatpush.bf16.xpose.msrb.mxu1 %v1595_v4 }
 0x42d   : > { %1567 = vrot.lane.b32.xlu2 %v3116_v1, %s3509_s24 }
 0x432   : > { %1610 = vmatpush.bf16.xpose.msrb.mxu1 %v1592_v10 }
 0x435   : > { %1678 = vrot.lane.b32.xlu2 %v3116_v1, %s2710_s16 }
 0x43d   : > { %1521 = vrot.lane.b32.xlu2 %v3259_v48, %s2708_s27 }
 0x445   : > { %1519 = vrot.lane.b32.xlu2 %v3266_v49, %s2708_s27 }
 0x44d   : > { %1563 = vrot.lane.b32.xlu2 %v3154_v44, %s3509_s24 }
 0x455   : > { %1674 = vrot.lane.b32.xlu2 %v3154_v44, %s2710_s16 }
 0x45d   : > { %1561 = vrot.lane.b32.xlu2 %v3169_v54, %s3509_s24 }
 0x468   : > { %v1510_v53 = vpop.xlane.xlu2 %1509 }
 0x469   : > { %v1511_v55 = vsub.f32 %v1508_v30, %v1510_v53 }
 0x46b   : > { %v1512_v57 = vmul.f32 1.442695, %v1511_v55 }
 0x46d   : > { %2597 = vpow2.f32 %v1512_v57 }
 0x470   : > { %v1685_v1 = vpop.permute.xlu2 %1684  ;;  %v1376_v58 = vpop.xlane.xlu0 %1375 }
 0x471   : > { %v1377_v60 = vsub.f32 %v1374_v35, %v1376_v58  ;;  %v1709_v14 = vsel %vm778_vm0, %v1685_v1, 0 }
 0x473   : > { %v2598_v23 = vpop.eup %2597  ;;  %v1378_v59 = vmul.f32 1.442695, %v1377_v60 }
 0x474   : > { %1514 = vadd.xlane.f32.xlu0 %v2598_v23 }
 0x475   : > { %2599 = vpow2.f32 %v1378_v59 }
 0x478   : > { %v1528_v61 = vpop.permute.xlu2 %1527 }
 0x479   : > { %1546 = vmatpush.bf16.msra.mxu0 %v1528_v61 }
 0x47b   : > { %v2600_v62 = vpop.eup %2599 }
 0x47c   : > { %1380 = vadd.xlane.f32.xlu1 %v2600_v62 }
 0x480   : > { %v1526_v25 = vpop.permute.xlu2 %1525 }
 0x481   : > { %1547 = vmatpush.bf16.msra.mxu0 %v1526_v25 }
 0x483   : > { %v1681_v16 = vpop.permute.xlu0 %1680 }
 0x484   : > { %v1703_v17 = vsel %vm778_vm0, %v1681_v16, 0 }
 0x488   : > { %v1524_v44 = vpop.permute.xlu2 %1523  ;;  %1676 = vrot.lane.b32.xlu0 %v3136_v34, %s2710_s16 }
 0x489   : > { %1548 = vmatpush.bf16.msra.mxu0 %v1524_v44 }
 0x490   : > { %v1568_v7 = vpop.permute.xlu2 %1567  ;;  %1672 = vrot.lane.b32.xlu0 %v3169_v54, %s2710_s16 }
 0x491   : > { %v1589_v12 = vsel %vm778_vm0, %v1568_v7, 0 }
 0x492   : > { %1611 = vmatpush.bf16.xpose.msrb.mxu1 %v1589_v12 }
 0x495   : > { %1565 = vrot.lane.b32.xlu1 %v3136_v34, %s3509_s24  ;;  %v1715_v34 = vsel %vm778_vm0, %v3237_v31, 0 }
 0x498   : > { %v1679_v8 = vpop.permute.xlu2 %1678  ;;  %1644 = vrot.lane.b32.xlu0 %v3192_v5, %s3509_s24 }
 0x4a0   : > { %v1522_v11 = vpop.permute.xlu2 %1521  ;;  %1755 = vrot.lane.b32.xlu0 %v3192_v5, %s2710_s16  ;;  %v1700_v5 = vsel %vm778_vm0, %v1679_v8, 0 }
 0x4a1   : > { %1549 = vmatpush.bf16.msra.mxu0 %v1522_v11 }
 0x4a8   : > { %v1520_v54 = vpop.permute.xlu2 %1519  ;;  %1642 = vrot.lane.b32.xlu0 %v3195_v18, %s3509_s24 }
 0x4a9   : > { %1550 = vmatpush.bf16.msra.mxu0 %v1520_v54 }
 0x4ad   : > { %1717 = vmatpush.bf16.xpose.msrb.mxu0 %v1715_v34 }
 0x4b0   : > { %1753 = vrot.lane.b32.xlu0 %v3195_v18, %s2710_s16  ;;  %v1564_v24 = vpop.permute.xlu2 %1563 }
 0x4b1   : > { %v1583_v38 = vsel %vm778_vm0, %v1564_v24, 0  ;;  %v2498_v24 = vld [vmem:[%s3477_s5] sm:$0xff] }
 0x4b5   : > { %1718 = vmatpush.bf16.xpose.msrb.mxu0 %v1712_v13 }
 0x4b8   : > { %1640 = vrot.lane.b32.xlu0 %v3205_v19, %s3509_s24  ;;  %v1675_v33 = vpop.permute.xlu2 %1674 }
 0x4bd   : > { %1719 = vmatpush.bf16.xpose.msrb.mxu0 %v1709_v14 }
 0x4c0   : > { %1749 = vrot.lane.b32.xlu0 %v3224_v26, %s2710_s16  ;;  %v1562_v39 = vpop.permute.xlu2 %1561 }
 0x4c5   : > { %1720 = vmatpush.bf16.xpose.msrb.mxu0 %v1706_v15 }
 0x4c8   : > { %1636 = vrot.lane.b32.xlu0 %v3240_v32, %s3509_s24 }
 0x4cd   : > { %1721 = vmatpush.bf16.xpose.msrb.mxu0 %v1703_v17 }
 0x4d0   : > { %1747 = vrot.lane.b32.xlu0 %v3240_v32, %s2710_s16  ;;  %v1694_v32 = vsel %vm778_vm0, %v1675_v33, 0  ;;  %v2574_v33 = vld [vmem:[%s3478_s6] ss:$0 sm:$0xff] }
 0x4d5   : > { %1722 = vmatpush.bf16.xpose.msrb.mxu0 %v1700_v5 }
 0x4e7   : > { %v1515_v18 = vpop.xlane.xlu0 %1514 }
 0x4e8   : > { %2601 = vrcp.f32 %v1515_v18 }
 0x4ee   : > { %v2602_v46 = vpop.eup %2601 }
 0x4ef   : > { %v1517_v47 = vmul.f32 %v2602_v46, %v2598_v23  ;;  %v1381_v20 = vpop.xlane.xlu1 %1380 }
 0x4f0   : > { %2603 = vrcp.f32 %v1381_v20 }
 0x4f1   : > { %v1518_v21 = vpack.c.bf16 %v1517_v47, %v1517_v47 }
 0x4f3   : > { %1551 = vmatmul.bf16.vlgmr.msra.gmra.mxu0 %v1518_v21  ;;  %v2499_v21 = vld [vmem:[%s3477_s5 + $0x8] sm:$0xff] }
 0x4f6   : > { %v2604_v6 = vpop.eup %2603 }
 0x4f7   : > { %v1383_v43 = vmul.f32 %v2604_v6, %v2600_v62 }
 0x4f9   : > { %v1384_v28 = vpack.c.bf16 %v1383_v43, %v1383_v43 }
 0x4fa   : > { %v1677_v30 = vpop.permute.xlu0 %1676 }
 0x4fb   : > { %v1697_v31 = vsel %vm778_vm0, %v1677_v30, 0  ;;  %1441 = vmatmul.bf16.vlgmr.msra.gmra.mxu1 %v1384_v28 }
 0x4fc   : > { %1723 = vmatpush.bf16.xpose.msrb.mxu0 %v1697_v31 }
 0x502   : > { %v1673_v36 = vpop.permute.xlu0 %1672 }
 0x504   : > { %1724 = vmatpush.bf16.xpose.msrb.mxu0 %v1694_v32 }
 0x507   : > { %v1566_v45 = vpop.permute.xlu1 %1565 }
 0x508   : > { %v1586_v35 = vsel %vm778_vm0, %v1566_v45, 0 }
 0x509   : > { %1612 = vmatpush.bf16.xpose.msrb.mxu1 %v1586_v35 }
 0x50b   : > { %2420 = vmatmul.msk.bf16.vlgmr.msrb.gmra.mxu0 %vm778_vm0, %v1673_v36 }
 0x511   : > { %1613 = vmatpush.bf16.xpose.msrb.mxu1 %v1583_v38 }
 0x518   : > { %2419 = vmatmul.msk.bf16.vlgmr.msrb.gmra.mxu1 %vm778_vm0, %v1562_v39 }
 0x570   : > { %v1552_v40 = vpop.f32.mrf.mxu0 }
 0x578   : > { %v1442_v41 = vpop.f32.mrf.mxu1  ;;  %v1554_v42 = vpop.f32.mrf.mxu0 }
 0x579   : > { %1446 = vst.msk [vmem:[#allocation2 + $0x8] sm:$0xff] %vm778_vm0, %v1442_v41 }
 0x580   : > { %v1444_v50 = vpop.f32.mrf.mxu1 }
 0x588   : > { %v1726_v51 = vpop.f32.mrf.mxu0 }
 0x589   : > { %v1730_v56 = vsel %vm3230_vm10, %v3228_v29, %v1726_v51  ;;  %v2715_v51 = vmov 32.0  }
 0x58a   : > { %1731 = vmax.xlane.f32.xlu2 %v1730_v56 }
 0x590   : > { %v1728_v52 = vpop.f32.mrf.mxu0 }
 0x595   : > { %v1615_v53 = vpop.f32.mrf.mxu1 }
 0x596   : > { %v1619_v55 = vsel %vm3230_vm10, %v3228_v29, %v1615_v53 }
 0x597   : > { %1620 = vmax.xlane.f32.xlu1 %v1619_v55 }
 0x59d   : > { %v1617_v57 = vpop.f32.mrf.mxu1 }
 0x5a2   : > { %1638 = vrot.lane.b32.xlu2 %v3224_v26, %s3509_s24 }
 0x5aa   : > { %1634 = vrot.lane.b32.xlu2 %v3247_v37, %s3509_s24 }
 0x5b0   : > { %1751 = vrot.lane.b32.xlu1 %v3205_v19, %s2710_s16 }
 0x5b2   : > { %1745 = vrot.lane.b32.xlu2 %v3247_v37, %s2710_s16 }
 0x5ba   : > { %1632 = vrot.lane.b32.xlu2 %v3259_v48, %s3509_s24 }
 0x5c2   : > { %1743 = vrot.lane.b32.xlu2 %v3259_v48, %s2710_s16  ;;  %v1645_v48 = vpop.permute.xlu0 %1644 }
 0x5c3   : > { %1654 = vmatpush.bf16.msrb.mxu3 %v1645_v48 }
 0x5ca   : > { %1630 = vrot.lane.b32.xlu2 %v3266_v49, %s3509_s24  ;;  %v1756_v59 = vpop.permute.xlu0 %1755 }
 0x5cb   : > { %1765 = vmatpush.bf16.msrb.mxu2 %v1756_v59 }
 0x5d2   : > { %1741 = vrot.lane.b32.xlu2 %v3266_v49, %s2710_s16 }
 0x5da   : > { %1114 = vrot.lane.b32.xlu2 %v3221_v22, %s2712_s2  ;;  %v1643_v22 = vpop.permute.xlu0 %1642 }
 0x5db   : > { %1655 = vmatpush.bf16.msrb.mxu3 %v1643_v22  ;;  %v2501_v22 = vld [vmem:[%s3481_s9 + $0x8] sm:$0xff] }
 0x5e2   : > { %v1754_v61 = vpop.permute.xlu0 %1753 }
 0x5e3   : > { %1766 = vmatpush.bf16.msrb.mxu2 %v1754_v61 }
 0x5ea   : > { %v1641_v44 = vpop.permute.xlu0 %1640 }
 0x5eb   : > { %1656 = vmatpush.bf16.msrb.mxu3 %v1641_v44 }
 0x5f2   : > { %v1750_v4 = vpop.permute.xlu0 %1749 }
 0x5fa   : > { %v1637_v2 = vpop.permute.xlu0 %1636 }
 0x5fd   : > { %v1732_v19 = vpop.xlane.xlu2 %1731 }
 0x5fe   : > { %v1733_v26 = vsub.f32 %v1730_v56, %v1732_v19 }
 0x600   : > { %v1734_v29 = vmul.f32 1.442695, %v1733_v26 }
 0x602   : > { %2605 = vpow2.f32 %v1734_v29  ;;  %v1748_v8 = vpop.permute.xlu0 %1747 }
 0x605   : > { %v1639_v23 = vpop.permute.xlu2 %1638 }
 0x606   : > { %1657 = vmatpush.bf16.msrb.mxu3 %v1639_v23 }
 0x608   : > { %v2606_v27 = vpop.eup %2605 }
 0x609   : > { %1736 = vadd.xlane.f32.xlu0 %v2606_v27 }
 0x60a   : > { %v1621_v37 = vpop.xlane.xlu1 %1620  ;;  %1658 = vmatpush.bf16.msrb.mxu3 %v1637_v2 }
 0x60b   : > { %v1622_v1 = vsub.f32 %v1619_v55, %v1621_v37 }
 0x60d   : > { %v1623_v58 = vmul.f32 1.442695, %v1622_v1  ;;  %v1635_v49 = vpop.permute.xlu2 %1634 }
 0x60e   : > { %1659 = vmatpush.bf16.msrb.mxu3 %v1635_v49 }
 0x60f   : > { %2607 = vpow2.f32 %v1623_v58 }
 0x615   : > { %v2608_v60 = vpop.eup %2607  ;;  %v1746_v25 = vpop.permute.xlu2 %1745 }
 0x616   : > { %1625 = vadd.xlane.f32.xlu1 %v2608_v60 }
 0x61d   : > { %1557 = vrot.lane.b32.xlu0 %v1552_v40, %s3495_s20  ;;  %v1633_v3 = vpop.permute.xlu2 %1632 }
 0x61e   : > { %1660 = vmatpush.bf16.msrb.mxu3 %v1633_v3 }
 0x622   : > { %v1752_v62 = vpop.permute.xlu1 %1751 }
 0x623   : > { %1767 = vmatpush.bf16.msrb.mxu2 %v1752_v62 }
 0x625   : > { %1226 = vrot.lane.b32.xlu0 %v3216_v0, %s2714_s26  ;;  %v1744_v7 = vpop.permute.xlu2 %1743 }
 0x627   : > { %1768 = vmatpush.bf16.msrb.mxu2 %v1750_v4 }
 0x62b   : > { %1769 = vmatpush.bf16.msrb.mxu2 %v1748_v8 }
 0x62d   : > { %v1631_v0 = vpop.permute.xlu2 %1630 }
 0x62e   : > { %1661 = vmatpush.bf16.msrb.mxu3 %v1631_v0 }
 0x62f   : > { %1002 = vrot.lane.b32.xlu1 %v3176_v63, %s3495_s20  ;;  %1770 = vmatpush.bf16.msrb.mxu2 %v1746_v25  ;;  %v2500_v25 = vld [vmem:[%s3481_s9] sm:$0xff] }
 0x632   : > { %1816 = vmatpush.bf16.msra.mxu3 %v2499_v21 }
 0x633   : > { %1771 = vmatpush.bf16.msrb.mxu2 %v1744_v7 }
 0x635   : > { %v1742_v9 = vpop.permute.xlu2 %1741 }
 0x636   : > { %1817 = vmatpush.bf16.msra.mxu3 %v2498_v24 }
 0x637   : > { %1772 = vmatpush.bf16.msrb.mxu2 %v1742_v9 }
 0x63d   : > { %v1115_v17 = vpop.permute.xlu2 %1114 }
 0x67c   : > { %v1737_v10 = vpop.xlane.xlu0 %1736 }
 0x67d   : > { %2609 = vrcp.f32 %v1737_v10 }
 0x683   : > { %v2610_v63 = vpop.eup %2609 }
 0x684   : > { %v1739_v11 = vmul.f32 %v2610_v63, %v2606_v27 }
 0x686   : > { %v1740_v12 = vpack.c.bf16 %v1739_v11, %v1739_v11 }
 0x688   : > { %1773 = vmatmul.bf16.vlgmr.msrb.gmra.mxu2 %v1740_v12 }
 0x689   : > { %v1626_v54 = vpop.xlane.xlu1 %1625 }
 0x68a   : > { %2611 = vrcp.f32 %v1626_v54 }
 0x68b   : > { %2613 = vrcp.f32 %v2715_v51 }
 0x68f   : > { %v1558_v34 = vpop.permute.xlu0 %1557 }
 0x690   : > { %v2612_v13 = vpop.eup %2611  ;;  %1560 = vst.msk [vmem:[#allocation2 + $0x8] sm:$0xff] %vm1005_vm11, %v1558_v34 }
 0x691   : > { %v1628_v14 = vmul.f32 %v2612_v13, %v2608_v60  ;;  %v2614_v56 = vpop.eup %2613 }
 0x692   : > { %v1835_v52 = vmul.f32 32.0, %v2614_v56  ;;  %vm1839_vm15 = vweird.f32 %v2614_v56 }
 0x693   : > { %v1629_v15 = vpack.c.bf16 %v1628_v14, %v1628_v14  ;;  %v2575_v14 = vld [vmem:[%s3479_s7] ss:$0 sm:$0xff] }
 0x694   : > { %v1836_v53 = vsub.f32 1.0, %v1835_v52 }
 0x695   : > { %1662 = vmatmul.bf16.vlgmr.msrb.gmra.mxu3 %v1629_v15 }
 0x696   : > { %v1837_v55 = vmul.f32 %v2614_v56, %v1836_v53  ;;  %1921 = vmatpush.bf16.msrb.mxu3 %v2501_v22 }
 0x697   : > { %v1227_v5 = vpop.permute.xlu0 %1226 }
 0x698   : > { %v1838_v57 = vadd.f32 %v2614_v56, %v1837_v55 }
 0x69a   : > { %v3379_v19 = vsel %vm1839_vm15, %v2614_v56, %v1838_v57  ;;  %1922 = vmatpush.bf16.msrb.mxu3 %v2500_v25 }
 0x6a1   : > { %v1003_v16 = vpop.permute.xlu1 %1002 }
 0x6a2   : > { %1006 = vst.msk [vmem:[#allocation2] sm:$0xff] %vm1005_vm11, %v1003_v16 }
 0x6a3   : > { %1118 = vst.msk [vmem:[#allocation2] sm:$0xff] %vm1117_vm12, %v1115_v17 }
 0x6a4   : > { %1230 = vst.msk [vmem:[#allocation2] sm:$0xff] %vm1229_vm13, %v1227_v5  ;;  %v2576_v5 = vld [vmem:[%s3480_s8] ss:$0 sm:$0xff] }
 0x6ab   : > { %v1783_v28 = vld [vmem:[#allocation2] sm:$0xff] }
 0x70b   : > { %v1774_v18 = vpop.f32.mrf.mxu2 }
 0x713   : > { %v1776_v46 = vpop.f32.mrf.mxu2 }
 0x718   : > { %v1663_v47 = vpop.f32.mrf.mxu3 }
 0x719   : > { %1668 = vrot.lane.b32.xlu2 %v1663_v47, %s2712_s2  ;;  %s3512_s2 = sshll.u32 %s2856_s17, 4  ;;  %s618_s17 = sand.u32 1, %s2689_s19  }
 0x71a   : > { %s639_s22 = scalar_lea.vmem %s3473_s1, %s3512_s2  ;;  %s2242_s2 = sshll.u32 %s618_s17, 4 }
 0x71b   : > { %v1824_v45 = vld [vmem:[%s639_s22] sm:$0xff]  ;;  %v1825_v40 = vld [vmem:[%s639_s22 + $0x8] sm:$0xff]  ;;  %s620_s27 = scalar_lea.vmem [#allocation3], %s2242_s2  ;;  %s2647_s22 = scalar_lea.hbm %s3487_s15, 32 }
 0x71c   : > { %s2077_s25 = sshll.u32 %s620_s27, 4  ;;  %s2078_s25 = int_to_ptr.vmem [resolvable:$true] %s2077_s25 }
 0x720   : > { %v1665_v20 = vpop.f32.mrf.mxu3 }
 0x721   : > { %1779 = vrot.lane.b32.xlu2 %v1774_v18, %s2714_s26  ;;  %s2506_s26 = sshll.u32 %s2697_s21, 4  ;;  %s2063_s21 = scalar_lea.sflag [#allocation4], %s618_s17 }
 0x722   : > { %s2076_s16 = scalar_lea.hbm %s3487_s15, %s2506_s26 }
 0x723   : > { %s2079_s29 = sshll.u32 %s2076_s16, 4  ;;  %s2080_s29 = int_to_ptr.hbm [resolvable:$true] %s2079_s29 }
 0x724   : > { %s2641_s24 = sshra.s32 %s2080_s29, 4  ;;  %s2642_s24 = int_to_ptr.hbm [resolvable:$true] %s2641_s24 }
 0x725   : > { %s2643_s2 = scalar_lea.hbm %s2642_s24, 16  ;;  %p2648_p1 = scmp.lt.s32.totalorder %s2642_s24, %s3487_s15 }
 0x726   : > { %p2644_p12 = scmp.ne.s32.totalorder %s2642_s24, %s2643_s2  ;;  %p2649_p2 = scmp.lt.s32.totalorder %s2647_s22, %s2643_s2 }
 0x728   : > { %p2645_p13 = pnand %p2644_p12, %p2837_p4  ;;  %p2650_p3 = por %p2649_p2, %p2648_p1 }
 0x72a   : > { %p2646_p0 = pneg %p2645_p13 }
 0x72c   : > { %p2651_p5 = pnand %p2650_p3, %p2646_p0 }
 0x773   : > { %v1669_v6 = vpop.permute.xlu2 %1668 }
 0x774   : > { %1671 = vst.msk [vmem:[#allocation2 + $0x8] sm:$0xff] %vm1117_vm12, %v1669_v6  ;;  %v2505_v6 = vld [vmem:[%s3483_s11 + $0x18] sm:$0xff] }
 0x775   : > { %1992 = vmatpush.bf16.msra.mxu1 %v2505_v6  ;;  %v2580_v6 = vld [vmem:[%s3486_s14] ss:$0 sm:$0xff] }
 0x77b   : > { %v1780_v43 = vpop.permute.xlu2 %1779 }
 0x77c   : > { %1782 = vst.msk [vmem:[#allocation2 + $0x8] sm:$0xff] %vm1229_vm13, %v1780_v43  ;;  %v2504_v43 = vld [vmem:[%s3483_s11 + $0x10] sm:$0xff] }
 0x77d   : > { %1993 = vmatpush.bf16.msra.mxu1 %v2504_v43 }
 0x783   : > { %v1784_v30 = vld [vmem:[#allocation2 + $0x8] sm:$0xff] }
 0x784   : > { %v1785_v31 = vpack.c.bf16 %v1784_v30, %v1783_v28  ;;  %v2503_v28 = vld [vmem:[%s3483_s11 + $0x8] sm:$0xff]  ;;  %v2502_v30 = vld [vmem:[%s3483_s11] sm:$0xff] }
 0x785   : > { %1994 = vmatpush.bf16.msra.mxu1 %v2503_v28 }
 0x786   : > { %2429 = vmatmul.msk.bf16.vlgmr.msra.gmra.mxu3 %vm1806_vm14, %v1785_v31  ;;  %v2577_v31 = vld [vmem:[%s3482_s10] ss:$0 sm:$0xff] }
 0x789   : > { %1995 = vmatpush.bf16.msra.mxu1 %v2502_v30 }
 0x809   : > { %v1819_v32 = vpop.f32.mrf.mxu3 }
 0x80a   : > { %v1820_v35 = vadd.f32 %v2574_v33, %v1819_v32 }
 0x80c   : > { %v1826_v36 = vadd.f32 %v1824_v45, %v1820_v35 }
 0x80e   : > { %v1828_v38 = vsel %vm1806_vm14, %v1826_v36, 0.0 }
 0x80f   : > { %1829 = vadd.xlane.f32.xlu1 %v1828_v38 }
 0x811   : > { %v1821_v39 = vpop.f32.mrf.mxu3 }
 0x812   : > { %v1822_v41 = vadd.f32 %v2574_v33, %v1821_v39 }
 0x814   : > { %v1827_v42 = vadd.f32 %v1825_v40, %v1822_v41 }
 0x816   : > { %v1831_v50 = vsel %vm1806_vm14, %v1827_v42, 0.0 }
 0x817   : > { %1832 = vadd.xlane.f32.xlu0 %v1831_v50 }
 0x882   : > { %v1830_v26 = vpop.xlane.xlu1 %1829 }
 0x883   : > { %v1841_v29 = vmul.f32 %v3379_v19, %v1830_v26 }
 0x885   : > { %v1843_v27 = vsub.f32 %v1826_v36, %v1841_v29 }
 0x887   : > { %v1845_v37 = vmul.f32 %v1843_v27, %v1843_v27 }
 0x889   : > { %v1847_v1 = vsel %vm1806_vm14, %v1845_v37, 0.0 }
 0x88a   : > { %v1833_v58 = vpop.xlane.xlu0 %1832  ;;  %1848 = vadd.xlane.f32.xlu2 %v1847_v1 }
 0x88b   : > { %v1842_v48 = vmul.f32 %v3379_v19, %v1833_v58 }
 0x88d   : > { %v1844_v60 = vsub.f32 %v1827_v42, %v1842_v48  ;;  %v2578_v48 = vld [vmem:[%s3484_s12] ss:$0 sm:$0xff] }
 0x88f   : > { %v1846_v23 = vmul.f32 %v1844_v60, %v1844_v60 }
 0x891   : > { %v1850_v59 = vsel %vm1806_vm14, %v1846_v23, 0.0 }
 0x892   : > { %1851 = vadd.xlane.f32.xlu1 %v1850_v59 }
 0x8fd   : > { %v1849_v49 = vpop.xlane.xlu2 %1848 }
 0x8fe   : > { %v1853_v61 = vmul.f32 %v1849_v49, %v3379_v19 }
 0x900   : > { %v1855_v62 = vadd.f32 1e-05, %v1853_v61 }
 0x902   : > { %2615 = vrsqrt.f32 %v1855_v62  ;;  %vm1863_vm1 = vweird.f32 %v1855_v62 }
 0x905   : > { %v1852_v44 = vpop.xlane.xlu1 %1851 }
 0x906   : > { %v1854_v3 = vmul.f32 %v1852_v44, %v3379_v19 }
 0x908   : > { %v2616_v4 = vpop.eup %2615  ;;  %v1856_v7 = vadd.f32 1e-05, %v1854_v3 }
 0x909   : > { %v1858_v2 = vmul.f32 %v2616_v4, %v1855_v62  ;;  %vm1864_vm0 = vweird.f32 %v2616_v4 }
 0x90a   : > { %2617 = vrsqrt.f32 %v1856_v7  ;;  %vm1865_vm2 = vmor %vm1863_vm1, %vm1864_vm0  ;;  %vm1873_vm4 = vweird.f32 %v1856_v7 }
 0x90b   : > { %v1859_v8 = vmul.f32 %v2616_v4, %v1858_v2 }
 0x90d   : > { %v1860_v0 = vmul.f32 0.5, %v1859_v8 }
 0x90f   : > { %v1861_v9 = vsub.f32 1.5, %v1860_v0 }
 0x910   : > { %v2618_v10 = vpop.eup %2617 }
 0x911   : > { %v1862_v63 = vmul.f32 %v2616_v4, %v1861_v9  ;;  %v1868_v11 = vmul.f32 %v2618_v10, %v1856_v7  ;;  %vm1874_vm3 = vweird.f32 %v2618_v10 }
 0x912   : > { %vm1875_vm5 = vmor %vm1873_vm4, %vm1874_vm3 }
 0x913   : > { %v1869_v12 = vmul.f32 %v2618_v10, %v1868_v11  ;;  %v1866_v54 = vsel %vm1865_vm2, %v2616_v4, %v1862_v63 }
 0x914   : > { %v1877_v15 = vmul.f32 %v1866_v54, %v1843_v27 }
 0x915   : > { %v1870_v34 = vmul.f32 0.5, %v1869_v12 }
 0x916   : > { %v1883_v18 = vmul.f32 %v2575_v14, %v1877_v15 }
 0x917   : > { %v1871_v13 = vsub.f32 1.5, %v1870_v34 }
 0x918   : > { %v1889_v20 = vadd.f32 %v2576_v5, %v1883_v18 }
 0x919   : > { %v1872_v16 = vmul.f32 %v2618_v10, %v1871_v13 }
 0x91b   : > { %v1876_v17 = vsel %vm1875_vm5, %v2618_v10, %v1872_v16 }
 0x91c   : > { %v1878_v46 = vmul.f32 %v1876_v17, %v1844_v60 }
 0x91e   : > { %v1884_v47 = vmul.f32 %v2575_v14, %v1878_v46 }
 0x920   : > { %v1890_v21 = vadd.f32 %v2576_v5, %v1884_v47 }
 0x922   : > { %v1891_v24 = vpack.c.bf16 %v1890_v21, %v1889_v20 }
 0x924   : > { %2438 = vmatmul.msk.bf16.vlgmr.msrb.gmra.mxu3 %vm1806_vm14, %v1891_v24 }
 0x9a7   : > { %v1924_v33 = vpop.f32.mrf.mxu3 }
 0x9a8   : > { %v1925_v32 = vadd.f32 %v2577_v31, %v1924_v33 }
 0x9aa   : > { %v1931_v45 = vmul.f32 0.044715, %v1925_v32  ;;  %v1929_v26 = vmul.f32 0.5, %v1925_v32 }
 0x9ac   : > { %v1933_v35 = vmul.f32 %v1931_v45, %v1925_v32 }
 0x9ae   : > { %v1935_v36 = vmul.f32 %v1933_v35, %v1925_v32 }
 0x9af   : > { %v1926_v38 = vpop.f32.mrf.mxu3 }
 0x9b0   : > { %v1937_v39 = vadd.f32 %v1935_v36, %v1925_v32  ;;  %v1927_v40 = vadd.f32 %v2577_v31, %v1926_v38 }
 0x9b2   : > { %v1932_v41 = vmul.f32 0.044715, %v1927_v40  ;;  %v1939_v42 = vmul.f32 0.7978846, %v1937_v39  ;;  %v1930_v29 = vmul.f32 0.5, %v1927_v40 }
 0x9b4   : > { %v1934_v50 = vmul.f32 %v1932_v41, %v1927_v40  ;;  %2619 = vtanh.f32 %v1939_v42 }
 0x9b6   : > { %v1936_v51 = vmul.f32 %v1934_v50, %v1927_v40 }
 0x9b8   : > { %v1938_v56 = vadd.f32 %v1936_v51, %v1927_v40 }
 0x9ba   : > { %v1940_v52 = vmul.f32 0.7978846, %v1938_v56  ;;  %v2620_v53 = vpop.eup %2619 }
 0x9bb   : > { %v1943_v55 = vadd.f32 1.0, %v2620_v53 }
 0x9bc   : > { %2621 = vtanh.f32 %v1940_v52 }
 0x9bd   : > { %v1945_v37 = vmul.f32 %v1943_v55, %v1929_v26 }
 0x9c2   : > { %v2622_v57 = vpop.eup %2621 }
 0x9c3   : > { %v1944_v27 = vadd.f32 1.0, %v2622_v57 }
 0x9c5   : > { %v1946_v1 = vmul.f32 %v1944_v27, %v1930_v29 }
 0x9c7   : > { %v1947_v58 = vpack.c.bf16 %v1946_v1, %v1945_v37 }
 0x9c9   : > { %2455 = vmatmul.msk.bf16.vlgmr.msra.gmra.mxu1 %vm1984_vm6, %v1947_v58 }
 0xa46   : > { %v1997_v60 = vpop.f32.mrf.mxu1 }
 0xa47   : > { %v1998_v23 = vadd.f32 %v2578_v48, %v1997_v60 }
 0xa49   : > { %v2002_v59 = vadd.f32 %v1998_v23, %v1889_v20 }
 0xa4b   : > { %v2004_v22 = vsel %vm1806_vm14, %v2002_v59, 0.0 }
 0xa4c   : > { %2005 = vadd.xlane.f32.xlu2 %v2004_v22 }
 0xa4e   : > { %v1999_v49 = vpop.f32.mrf.mxu1 }
 0xa4f   : > { %v2000_v61 = vadd.f32 %v2578_v48, %v1999_v49 }
 0xa51   : > { %v2003_v62 = vadd.f32 %v2000_v61, %v1890_v21  ;;  %v2579_v21 = vld [vmem:[%s3485_s13] ss:$0 sm:$0xff] }
 0xa53   : > { %v2007_v25 = vsel %vm1806_vm14, %v2003_v62, 0.0 }
 0xa54   : > { %2008 = vadd.xlane.f32.xlu0 %v2007_v25 }
 0xabf   : > { %v2006_v44 = vpop.xlane.xlu2 %2005 }
 0xac0   : > { %v2010_v3 = vmul.f32 %v2006_v44, %v3379_v19 }
 0xac2   : > { %v2012_v4 = vsub.f32 %v2002_v59, %v2010_v3 }
 0xac4   : > { %v2014_v7 = vmul.f32 %v2012_v4, %v2012_v4 }
 0xac6   : > { %v2016_v2 = vsel %vm1806_vm14, %v2014_v7, 0.0 }
 0xac7   : > { %v2009_v8 = vpop.xlane.xlu0 %2008  ;;  %2017 = vadd.xlane.f32.xlu1 %v2016_v2 }
 0xac8   : > { %v2011_v0 = vmul.f32 %v2009_v8, %v3379_v19 }
 0xaca   : > { %v2013_v9 = vsub.f32 %v2003_v62, %v2011_v0 }
 0xacc   : > { %v2015_v10 = vmul.f32 %v2013_v9, %v2013_v9 }
 0xace   : > { %v2019_v63 = vsel %vm1806_vm14, %v2015_v10, 0.0 }
 0xacf   : > { %2020 = vadd.xlane.f32.xlu2 %v2019_v63 }
 0xb3a   : > { %v2018_v11 = vpop.xlane.xlu1 %2017 }
 0xb3b   : > { %v2022_v12 = vmul.f32 %v2018_v11, %v3379_v19 }
 0xb3d   : > { %v2024_v54 = vadd.f32 1e-05, %v2022_v12 }
 0xb3f   : > { %2623 = vrsqrt.f32 %v2024_v54  ;;  %vm2032_vm8 = vweird.f32 %v2024_v54 }
 0xb42   : > { %v2021_v34 = vpop.xlane.xlu2 %2020 }
 0xb43   : > { %v2023_v13 = vmul.f32 %v2021_v34, %v3379_v19 }
 0xb45   : > { %v2624_v14 = vpop.eup %2623  ;;  %v2025_v15 = vadd.f32 1e-05, %v2023_v13 }
 0xb46   : > { %v2027_v16 = vmul.f32 %v2624_v14, %v2024_v54  ;;  %vm2033_vm7 = vweird.f32 %v2624_v14 }
 0xb47   : > { %2625 = vrsqrt.f32 %v2025_v15  ;;  %vm2034_vm9 = vmor %vm2032_vm8, %vm2033_vm7  ;;  %vm2042_vm11 = vweird.f32 %v2025_v15 }
 0xb48   : > { %v2028_v17 = vmul.f32 %v2624_v14, %v2027_v16 }
 0xb4a   : > { %v2029_v5 = vmul.f32 0.5, %v2028_v17 }
 0xb4c   : > { %v2030_v18 = vsub.f32 1.5, %v2029_v5 }
 0xb4d   : > { %v2626_v46 = vpop.eup %2625 }
 0xb4e   : > { %v2031_v47 = vmul.f32 %v2624_v14, %v2030_v18  ;;  %v2037_v20 = vmul.f32 %v2626_v46, %v2025_v15  ;;  %vm2043_vm10 = vweird.f32 %v2626_v46 }
 0xb4f   : > { %vm2044_vm12 = vmor %vm2042_vm11, %vm2043_vm10 }
 0xb50   : > { %v2035_v19 = vsel %vm2034_vm9, %v2624_v14, %v2031_v47  ;;  %v2038_v24 = vmul.f32 %v2626_v46, %v2037_v20 }
 0xb51   : > { %v2046_v43 = vmul.f32 %v2035_v19, %v2012_v4 }
 0xb52   : > { %v2039_v28 = vmul.f32 0.5, %v2038_v24 }
 0xb53   : > { %v2052_v30 = vmul.f32 %v2579_v21, %v2046_v43 }
 0xb54   : > { %v2040_v31 = vsub.f32 1.5, %v2039_v28 }
 0xb55   : > { %v2058_v33 = vadd.f32 %v2580_v6, %v2052_v30 }
 0xb56   : > { %v2041_v32 = vmul.f32 %v2626_v46, %v2040_v31 }
 0xb57   : > { %2060 = vst.msk [vmem:[%s620_s27] sm:$0xff] %vm1806_vm14, %v2058_v33 }
 0xb58   : > { %v2045_v45 = vsel %vm2044_vm12, %v2626_v46, %v2041_v32 }
 0xb59   : > { %v2047_v35 = vmul.f32 %v2045_v45, %v2013_v9 }
 0xb5b   : > { %v2053_v36 = vmul.f32 %v2579_v21, %v2047_v35 }
 0xb5d   : > { %v2059_v38 = vadd.f32 %v2580_v6, %v2053_v36 }
 0xb5f   : > { %2061 = vst.msk [vmem:[%s620_s27 + $0x8] sm:$0xff] %vm1806_vm14, %v2059_v38 }
 0xb60   : > { %2654 = shalt.err (!%p2651_p5)
}
 0xb61   : > { %s2716_s17 = smov 128   ;;  %s3513_s27 = smov 8  }
 0xb62   : > { %2507 = dma.vmem_to_hbm [thread:$0]  (%p2837_p4), %s2078_s25, 256, %s2080_s29, %s2063_s21, %s2716_s17, %s2716_s17, %s3513_s27  }
 0xb63 PF: > { %p2513_p6 = scmp.ge.s32.totalorder %s2705_s23, 2  ;;  %s2094_s20 = sand.u32 1, %s2685_s18  }
 0xb64   : > { %s2095_s0 = scalar_lea.sflag [#allocation4], %s2094_s20 }
 0xb65   : > { %p2510_p7 = pnand %p2513_p6, %p2844_p8 }
 0xb67   : > { %p2511_p9 = pneg %p2510_p7 }
 0xb69   : > { %2680 = dma.done.wait (%p2511_p9), %s2095_s0, 256  }
 0xb6a   : > { %2682 = vsyncadd (%p2511_p9), %s2095_s0, 4294967040  ;;  %s28_s23 = sadd.s32 1, %s2705_s23   ;;  %s3514_s24 = sld [smem:[#allocation6_spill]] }
 0xb6b   : > { %p25_p10 = scmp.ge.s32.totalorder %s28_s23, 4   ;;  %s3515_s20 = sld [smem:[#allocation9_spill]] }
 0xb6c   : > { %s3516_s21 = sld [smem:[#allocation7_spill]]  ;;  %s3518_s18 = smov %s2689_s19 }
 0xb6d   : > { %s3517_s22 = sld [smem:[#allocation8_spill]]  ;;  %27 = sbr.rel (!%p25_p10) target bundleno = 7 (0x7), region = 129 }
 0xb70   : > { %s3519_s19 = smov %s3514_s24 }
 0xb72   :  { %2101 = vsyncpa [#allocation4], 1 }
 0xb73   :  { %2103 = vsyncpa [#allocation4 + $0x1], 1 }

// kernel: tpu_custom_call.1
= control target key start
LH: loop header
LB: loop body
LE: loop exit
PB: predicated region body
PF: predicated region fallthrough
CT: control target
= control target key end

     0   :  { %s3472_s0 = inlined_call_operand.vmem [shape: bf16[2,16,32], index: 0, kind: input, shape index: {}]   ;;  %s3473_s1 = inlined_call_operand.vmem [shape: f32[2,16,32], index: 1, kind: input, shape index: {}]   ;;  %s3474_s2 = inlined_call_operand.vmem [shape: bf16[2,2,128,32], index: 2, kind: input, shape index: {}]   ;;  %s3475_s3 = inlined_call_operand.vmem [shape: bf16[2,2,128,32], index: 3, kind: input, shape index: {}]   ;;  %s3476_s4 = inlined_call_operand.vmem [shape: f32[2,16,1], index: 4, kind: input, shape index: {}]   ;;  %s3477_s5 = inlined_call_operand.vmem [shape: bf16[32,32], index: 5, kind: input, shape index: {}]   ;;  %s3478_s6 = inlined_call_operand.vmem [shape: f32[1,32], index: 6, kind: input, shape index: {}]   ;;  %s3479_s7 = inlined_call_operand.vmem [shape: f32[1,32], index: 7, kind: input, shape index: {}]   ;;  %s3480_s8 = inlined_call_operand.vmem [shape: f32[1,32], index: 8, kind: input, shape index: {}]   ;;  %s3481_s9 = inlined_call_operand.vmem [shape: bf16[32,64], index: 9, kind: input, shape index: {}]   ;;  %s3482_s10 = inlined_call_operand.vmem [shape: f32[1,64], index: 10, kind: input, shape index: {}]   ;;  %s3483_s11 = inlined_call_operand.vmem [shape: bf16[64,32], index: 11, kind: input, shape index: {}]   ;;  %s3484_s12 = inlined_call_operand.vmem [shape: f32[1,32], index: 12, kind: input, shape index: {}]   ;;  %s3485_s13 = inlined_call_operand.vmem [shape: f32[1,32], index: 13, kind: input, shape index: {}]   ;;  %s3486_s14 = inlined_call_operand.vmem [shape: f32[1,32], index: 14, kind: input, shape index: {}]   ;;  %s3487_s15 = inlined_call_operand.hbm [shape: f32[2,16,32], index: 15, kind: output, shape index: {}]  }
   0x1   :  { %3496 = sst [smem:[#allocation10_spill]] %s3472_s0 }
   0x2   :  { %3497 = sst [smem:[#allocation11_spill]] %s3474_s2 }
   0x3   :  { %20 = vsyncpa [#allocation4], 0 }
   0x4   :  { %22 = vsyncpa [#allocation4 + $0x1], 0  ;;  %s2797_s18 = smov 0   ;;  %s2799_s19 = smov 0  }
   0x5   :  { %s2801_s20 = smov 0   ;;  %s2803_s21 = smov 0  }
   0x6   :  { %s2805_s22 = smov 0   ;;  %s2807_s23 = smov 0  }
   0x7 LB: > { %3498 = sst [smem:[#allocation6_spill]] %s2693_s20  ;;  %s2237_s24 = sadd.s32 4294967295, %s2705_s23   ;;  %s2705_s23 = sphi %s2807_s23, %s28_s23   ;;  %s2701_s22 = sphi %s2805_s22, %s3517_s22   ;;  %s2697_s21 = sphi %s2803_s21, %s3516_s21   ;;  %s2693_s20 = sphi %s2801_s20, %s3515_s20   ;;  %s2689_s19 = sphi %s2799_s19, %s3519_s19   ;;  %s2685_s18 = sphi %s2797_s18, %s3518_s18  }
   0x8   : > { %3499 = sst [smem:[#allocation7_spill]] %s2701_s22  ;;  %s2238_s25 = sadd.s32 4294967294, %s2705_s23  }
   0x9   : > { %s40_s26 = sadd.s32 1, %s2701_s22  ;;  %s399_s27 = sadd.s32 1, %s2693_s20 }
   0xa   : > { %p42_p0 = scmp.ge.s32.totalorder %s40_s26, 2  ;;  %p409_p1 = scmp.ne.s32.totalorder %s2693_s20, %s2689_s19 }
   0xb   : > { %p410_p2 = scmp.eq.s32.totalorder %s2237_s24, 1  ;;  %p415_p3 = scmp.ne.s32.totalorder %s2689_s19, %s2685_s18 }
   0xc   : > { %s3521_s26 = smov (%p42_p0, %s40_s26), 0  ;;  %p416_p5 = scmp.eq.s32.totalorder %s2238_s25, 1 }
   0xd   : > { %3500 = sst [smem:[#allocation8_spill]] %s3521_s26  ;;  %p2837_p4 = por %p410_p2, %p409_p1 }
   0xe   : > { %s394_s29 = ssub.s32 %s2701_s22, %s3521_s26  ;;  %p2241_p6 = scmp.ge.s32.totalorder %s2705_s23, 1 }
   0xf   : > { %p397_p7 = scmp.eq.s32.totalorder %s394_s29, 0  ;;  %p2844_p8 = por %p416_p5, %p415_p3 }
  0x10   : > { %p531_p9 = scmp.lt.s32.totalorder %s2705_s23, 3 }
  0x11   : > { %s2850_s16 = scalar_select %p397_p7, %s2693_s20, %s399_s27  }
  0x12   : > { %p532_p10 = pnand %p2241_p6, %p531_p9 }
  0x13   : > { %3503 = sst [smem:[#allocation9_spill]] %s2850_s16  ;;  %p622_p11 = scmp.lt.s32.totalorder (!%p532_p10), %s2697_s21, 1 }
  0x14   : > { %535 = sbr.rel (%p532_p10) target bundleno = 2915 (0xb63), region = 80  ;;  %s3504_s2 = sld [smem:[#allocation11_spill]] (!%p532_p10) }
  0x15   : > { %s2708_s27 = smov (!%p532_p10), 120   ;;  %s3493_s22 = smov (!%p532_p10), 112  }
  0x16   : > { %s2710_s16 = smov (!%p532_p10), 104   ;;  %s3505_s0 = sld [smem:[#allocation10_spill]] (!%p532_p10) }
  0x19   : > { %v2707_v0 = vmov 0   ;;  %s2856_s17 = scalar_select %p622_p11, %s2697_s21, 1  ;;  %vm778_vm0 = vcmask 64512   ;;  %v686_v39 = vlaneseq  ;;  %v2711_v45 = vmov -1e+10  }
  0x1a   : > { %2572 = vset.pattern.permute.xlu0 %v2707_v0  ;;  %2573 = vset.pattern.permute.xlu2 %v2707_v0  ;;  %vm1005_vm11 = vcmask 130112   ;;  %vm1117_vm12 = vcmask 195712   ;;  %vm1229_vm13 = vcmask 261312   ;;  %vm1806_vm14 = vcmask 261120  }
  0x1b   : > { %s3491_s24 = sshll.u32 %s2856_s17, 4  ;;  %s3492_s25 = sshll.u32 %s2856_s17, 7  ;;  %v2956_v43 = vand.u32 127, %v686_v39 }
  0x1c   : > { %s2865_s26 = scalar_lea.vmem %s3504_s2, %s3492_s25  ;;  %s2872_s20 = scalar_lea.vmem %s3476_s4, %s3491_s24 }
  0x1d   : > { %v2473_v1 = vld [vmem:[%s2865_s26 + $0x38] sm:$0xff]  ;;  %v2472_v2 = vld [vmem:[%s2865_s26 + $0x30] sm:$0xff]  ;;  %v696_v3 = vld [vmem:[%s2872_s20] sm:$0xff]  ;;  %s2461_s29 = sshll.u32 %s2856_s17, 3  ;;  %vm693_vm2 = vcmp.ge.s32.totalorder %v2956_v43, 9  ;;  %s3508_s24 = sshll.u32 %s2856_s17, 7 }
  0x1e   : > { %v2470_v4 = vld [vmem:[%s2865_s26 + $0x20] sm:$0xff]  ;;  %vm697_vm1 = vcmp.eq.f32.partialorder %v696_v3, 0.0  ;;  %v804_v5 = vsel %vm778_vm0, %v2473_v1, 0  ;;  %909 = vrot.lane.b32.xlu1 %v2472_v2, %s2708_s27  ;;  %v801_v7 = vsel %vm778_vm0, %v2472_v2, 0  ;;  %v2471_v8 = vld [vmem:[%s2865_s26 + $0x28] sm:$0xff]  ;;  %v2885_v9 = vld [vmem:[%s2865_s26 + $0x18] sm:$0xff]  ;;  %s2909_s2 = scalar_lea.vmem %s3505_s0, %s2461_s29 }
  0x1f   : > { %v698_v6 = vsel %vm697_vm1, 1, %v2707_v0  ;;  %806 = vmatpush.bf16.xpose.msra.mxu0 %v804_v5  ;;  %905 = vrot.lane.b32.xlu2 %v2470_v4, %s2708_s27  ;;  %v798_v10 = vsel %vm778_vm0, %v2471_v8, 0  ;;  %v2893_v11 = vld [vmem:[%s2865_s26 + $0x10] sm:$0xff]  ;;  %v2896_v12 = vld [vmem:[%s2865_s26 + $0x8] sm:$0xff]  ;;  %v795_v13 = vsel %vm778_vm0, %v2470_v4, 0  ;;  %v792_v14 = vsel %vm778_vm0, %v2885_v9, 0 }
  0x20   : > { %700 = vperm.xlu0 %2572, %v698_v6   ;;  %v2914_v15 = vld [vmem:[%s2865_s26] sm:$0xff]  ;;  %v789_v19 = vsel %vm778_vm0, %v2893_v11, 0  ;;  %v786_v20 = vsel %vm778_vm0, %v2896_v12, 0  ;;  %v2960_v46 = vsel %vm693_vm2, -1e+30, %v2711_v45 }
  0x21   : > { %v675_v16 = vld [vmem:[%s2909_s2] sm:$0xf]  ;;  %v783_v21 = vsel %vm778_vm0, %v2914_v15, 0 }
  0x22   : > { %v893_v17 = vunpack.c.l.b16 %v675_v16 }
  0x24   : > { %v2920_v18 = vpack.c.b16 %v893_v17, %v893_v17 }
  0x26   : > { %907 = vrot.lane.b32.xlu1 %v2471_v8, %s2708_s27 }
  0x27   : > { %807 = vmatpush.bf16.xpose.msra.mxu0 %v801_v7  ;;  %903 = vrot.lane.b32.xlu2 %v2885_v9, %s2708_s27 }
  0x28   : > { %911 = vrot.lane.b32.xlu0 %v2473_v1, %s2708_s27 }
  0x2e   : > { %901 = vrot.lane.b32.xlu1 %v2893_v11, %s2708_s27 }
  0x2f   : > { %808 = vmatpush.bf16.xpose.msra.mxu0 %v798_v10  ;;  %899 = vrot.lane.b32.xlu2 %v2896_v12, %s2708_s27 }
  0x36   : > { %1023 = vrot.lane.b32.xlu1 %v2473_v1, %s3493_s22 }
  0x37   : > { %809 = vmatpush.bf16.xpose.msra.mxu0 %v795_v13  ;;  %1135 = vrot.lane.b32.xlu2 %v2473_v1, %s2710_s16 }
  0x3e   : > { %897 = vrot.lane.b32.xlu1 %v2914_v15, %s2708_s27 }
  0x3f   : > { %810 = vmatpush.bf16.xpose.msra.mxu0 %v792_v14  ;;  %1021 = vrot.lane.b32.xlu2 %v2472_v2, %s3493_s22 }
  0x46   : > { %1133 = vrot.lane.b32.xlu1 %v2472_v2, %s2710_s16 }
  0x47   : > { %811 = vmatpush.bf16.xpose.msra.mxu0 %v789_v19  ;;  %895 = vrot.lane.b32.xlu2 %v2920_v18, %s2708_s27 }
  0x4e   : > { %1019 = vrot.lane.b32.xlu1 %v2471_v8, %s3493_s22 }
  0x4f   : > { %812 = vmatpush.bf16.xpose.msra.mxu0 %v786_v20  ;;  %1131 = vrot.lane.b32.xlu2 %v2471_v8, %s2710_s16 }
  0x56   : > { %1017 = vrot.lane.b32.xlu1 %v2470_v4, %s3493_s22 }
  0x57   : > { %813 = vmatpush.bf16.xpose.msra.mxu0 %v783_v21  ;;  %1129 = vrot.lane.b32.xlu2 %v2470_v4, %s2710_s16 }
  0x5e   : > { %2285 = vmatmul.msk.bf16.vlgmr.msra.gmra.mxu0 %vm778_vm0, %v675_v16  ;;  %1127 = vrot.lane.b32.xlu1 %v2885_v9, %s2710_s16 }
  0x66   : > { %1013 = vrot.lane.b32.xlu1 %v2893_v11, %s3493_s22 }
  0x6e   : > { %1011 = vrot.lane.b32.xlu1 %v2896_v12, %s3493_s22 }
  0x76   : > { %1009 = vrot.lane.b32.xlu1 %v2914_v15, %s3493_s22 }
  0x79   : > { %v906_v28 = vpop.permute.xlu2 %905 }
  0x7a   : > { %v929_v31 = vsel %vm778_vm0, %v906_v28, 0 }
  0x7e   : > { %1007 = vrot.lane.b32.xlu1 %v2920_v18, %s3493_s22 }
  0x81   : > { %v904_v30 = vpop.permute.xlu2 %903 }
  0x82   : > { %v926_v32 = vsel %vm778_vm0, %v904_v30, 0 }
  0x89   : > { %v900_v34 = vpop.permute.xlu2 %899 }
  0x8a   : > { %v920_v38 = vsel %vm778_vm0, %v900_v34, 0 }
  0x90   : > { %v910_v25 = vpop.permute.xlu1 %909 }
  0x91   : > { %v935_v26 = vsel %vm778_vm0, %v910_v25, 0  ;;  %v1136_v37 = vpop.permute.xlu2 %1135  ;;  %v3054_v25 = vld [vmem:[%s2865_s26 + $0x70] sm:$0xff] }
  0x92   : > { %v701_v22 = vpop.permute.xlu0 %700  ;;  %v1162_v51 = vsel %vm778_vm0, %v1136_v37, 0 }
  0x93   : > { %vm702_vm3 = vcmp.eq.s32.totalorder %v701_v22, 1  ;;  %1164 = vmatpush.bf16.xpose.msrb.mxu0 %v1162_v51 }
  0x94   : > { %vm2962_vm4 = vmor %vm702_vm3, %vm693_vm2 }
  0x98   : > { %v908_v27 = vpop.permute.xlu1 %907 }
  0x99   : > { %v932_v29 = vsel %vm778_vm0, %v908_v27, 0  ;;  %v2953_v40 = vpop.permute.xlu2 %1021 }
  0x9a   : > { %v912_v23 = vpop.permute.xlu0 %911 }
  0x9b   : > { %v938_v24 = vsel %vm778_vm0, %v912_v23, 0  ;;  %v3048_v23 = vld [vmem:[%s2865_s26 + $0x78] sm:$0xff] }
  0x9c   : > { %940 = vmatpush.bf16.xpose.msra.mxu2 %v938_v24 }
  0xa0   : > { %v902_v33 = vpop.permute.xlu1 %901 }
  0xa1   : > { %v923_v35 = vsel %vm778_vm0, %v902_v33, 0  ;;  %v896_v44 = vpop.permute.xlu2 %895 }
  0xa4   : > { %941 = vmatpush.bf16.xpose.msra.mxu2 %v935_v26 }
  0xa8   : > { %v1024_v36 = vpop.permute.xlu1 %1023 }
  0xa9   : > { %v1132_v56 = vpop.permute.xlu2 %1131  ;;  %v1050_v7 = vsel %vm778_vm0, %v1024_v36, 0 }
  0xaa   : > { %v1156_v57 = vsel %vm778_vm0, %v1132_v56, 0  ;;  %v3103_v56 = vld [vmem:[%s2865_s26 + $0x58] sm:$0xff] }
  0xac   : > { %942 = vmatpush.bf16.xpose.msra.mxu2 %v932_v29  ;;  %v3066_v29 = vld [vmem:[%s2865_s26 + $0x60] sm:$0xff] }
  0xb0   : > { %v898_v41 = vpop.permute.xlu1 %897 }
  0xb1   : > { %v917_v42 = vsel %vm778_vm0, %v898_v41, 0  ;;  %v1130_v61 = vpop.permute.xlu2 %1129 }
  0xb2   : > { %v1153_v62 = vsel %vm778_vm0, %v1130_v61, 0 }
  0xb4   : > { %943 = vmatpush.bf16.xpose.msra.mxu2 %v929_v31 }
  0xb8   : > { %v1134_v52 = vpop.permute.xlu1 %1133 }
  0xb9   : > { %v1159_v53 = vsel %vm778_vm0, %v1134_v52, 0 }
  0xba   : > { %1165 = vmatpush.bf16.xpose.msrb.mxu0 %v1159_v53 }
  0xbc   : > { %944 = vmatpush.bf16.xpose.msra.mxu2 %v926_v32 }
  0xc0   : > { %v1020_v55 = vpop.permute.xlu1 %1019 }
  0xc1   : > { %v1044_v26 = vsel %vm778_vm0, %v1020_v55, 0 }
  0xc2   : > { %1166 = vmatpush.bf16.xpose.msrb.mxu0 %v1156_v57 }
  0xc4   : > { %945 = vmatpush.bf16.xpose.msra.mxu2 %v923_v35 }
  0xc8   : > { %v1018_v60 = vpop.permute.xlu1 %1017 }
  0xc9   : > { %v1041_v27 = vsel %vm778_vm0, %v1018_v60, 0 }
  0xca   : > { %1167 = vmatpush.bf16.xpose.msrb.mxu0 %v1153_v62 }
  0xcc   : > { %946 = vmatpush.bf16.xpose.msra.mxu2 %v920_v38 }
  0xd0   : > { %v1128_v3 = vpop.permute.xlu1 %1127 }
  0xd1   : > { %v1150_v4 = vsel %vm778_vm0, %v1128_v3, 0 }
  0xd2   : > { %1168 = vmatpush.bf16.xpose.msrb.mxu0 %v1150_v4 }
  0xd4   : > { %947 = vmatpush.bf16.xpose.msra.mxu2 %v917_v42 }
  0xd8   : > { %v1014_v30 = vpop.permute.xlu1 %1013 }
  0xd9   : > { %v1035_v31 = vsel %vm778_vm0, %v1014_v30, 0 }
  0xdb   : > { %2318 = vmatmul.msk.bf16.vlgmr.msra.gmra.mxu2 %vm778_vm0, %v896_v44  ;;  %v815_v48 = vpop.f32.mrf.mxu0 }
  0xdc   : > { %v819_v49 = vsel %vm2962_vm4, %v2960_v46, %v815_v48 }
  0xdd   : > { %820 = vmax.xlane.f32.xlu0 %v819_v49 }
  0xe0   : > { %v1012_v32 = vpop.permute.xlu1 %1011 }
  0xe1   : > { %v1032_v33 = vsel %vm778_vm0, %v1012_v32, 0 }
  0xe3   : > { %v817_v50 = vpop.f32.mrf.mxu0 }
  0xe8   : > { %v1010_v34 = vpop.permute.xlu1 %1009 }
  0xe9   : > { %v1029_v35 = vsel %vm778_vm0, %v1010_v34, 0  ;;  %v3136_v34 = vld [vmem:[%s2865_s26 + $0x48] sm:$0xff] }
  0xf0   : > { %v1008_v36 = vpop.permute.xlu1 %1007 }
  0xf1   : > { %1015 = vrot.lane.b32.xlu0 %v2885_v9, %s3493_s22  ;;  %s2987_s22 = scalar_lea.vmem %s3475_s3, %s3508_s24  ;;  %s3509_s24 = smov 112  }
  0xf2   : > { %v2990_v54 = vld [vmem:[%s2987_s22 + $0x38] sm:$0xff]  ;;  %v2995_v58 = vld [vmem:[%s2987_s22 + $0x30] sm:$0xff]  ;;  %v2999_v59 = vld [vmem:[%s2987_s22 + $0x28] sm:$0xff] }
  0xf3   : > { %878 = vmatpush.bf16.msra.mxu1 %v2990_v54  ;;  %v3006_v63 = vld [vmem:[%s2987_s22 + $0x20] sm:$0xff]  ;;  %v3012_v1 = vld [vmem:[%s2987_s22 + $0x18] sm:$0xff]  ;;  %v3016_v2 = vld [vmem:[%s2987_s22 + $0x10] sm:$0xff] }
  0xf4   : > { %v3021_v5 = vld [vmem:[%s2987_s22 + $0x8] sm:$0xff]  ;;  %v3027_v6 = vld [vmem:[%s2987_s22] sm:$0xff] }
  0xf7   : > { %879 = vmatpush.bf16.msra.mxu1 %v2995_v58 }
  0xf9   : > { %1125 = vrot.lane.b32.xlu0 %v2893_v11, %s2710_s16  ;;  %v1047_v11 = vsel %vm778_vm0, %v2953_v40, 0 }
  0xfb   : > { %880 = vmatpush.bf16.msra.mxu1 %v2999_v59 }
  0xff   : > { %881 = vmatpush.bf16.msra.mxu1 %v3006_v63 }
 0x101   : > { %1123 = vrot.lane.b32.xlu0 %v2896_v12, %s2710_s16 }
 0x103   : > { %882 = vmatpush.bf16.msra.mxu1 %v3012_v1 }
 0x107   : > { %883 = vmatpush.bf16.msra.mxu1 %v3016_v2 }
 0x109   : > { %1121 = vrot.lane.b32.xlu0 %v2914_v15, %s2710_s16 }
 0x10b   : > { %884 = vmatpush.bf16.msra.mxu1 %v3021_v5 }
 0x10f   : > { %885 = vmatpush.bf16.msra.mxu1 %v3027_v6 }
 0x111   : > { %1119 = vrot.lane.b32.xlu0 %v2920_v18, %s2710_s16 }
 0x113   : > { %1052 = vmatpush.bf16.xpose.msrb.mxu1 %v1050_v7 }
 0x119   : > { %976 = vrot.lane.b32.xlu0 %v2995_v58, %s2708_s27 }
 0x11b   : > { %1053 = vmatpush.bf16.xpose.msrb.mxu1 %v1047_v11 }
 0x121   : > { %974 = vrot.lane.b32.xlu0 %v2999_v59, %s2708_s27 }
 0x123   : > { %1054 = vmatpush.bf16.xpose.msrb.mxu1 %v1044_v26 }
 0x129   : > { %972 = vrot.lane.b32.xlu0 %v3006_v63, %s2708_s27 }
 0x12b   : > { %1055 = vmatpush.bf16.xpose.msrb.mxu1 %v1041_v27 }
 0x131   : > { %966 = vrot.lane.b32.xlu0 %v3021_v5, %s2708_s27 }
 0x150   : > { %v821_v8 = vpop.xlane.xlu0 %820 }
 0x151   : > { %v822_v9 = vsub.f32 %v819_v49, %v821_v8  ;;  %v3079_v49 = vld [vmem:[%s2865_s26 + $0x68] sm:$0xff] }
 0x152   : > { %1462 = vrot.lane.b32.xlu0 %v3079_v49, %s2708_s27 }
 0x153   : > { %v823_v10 = vmul.f32 1.442695, %v822_v9 }
 0x155   : > { %2581 = vpow2.f32 %v823_v10 }
 0x15a   : > { %1200 = vrot.lane.b32.xlu0 %v2995_v58, %s2710_s16 }
 0x15b   : > { %v2582_v12 = vpop.eup %2581 }
 0x15c   : > { %825 = vadd.xlane.f32.xlu2 %v2582_v12 }
 0x15e   : > { %v949_v13 = vpop.f32.mrf.mxu2 }
 0x15f   : > { %v953_v14 = vsel %vm2962_vm4, %v2960_v46, %v949_v13 }
 0x160   : > { %954 = vmax.xlane.f32.xlu1 %v953_v14 }
 0x162   : > { %1198 = vrot.lane.b32.xlu0 %v2999_v59, %s2710_s16 }
 0x163   : > { %v1016_v15 = vpop.permute.xlu0 %1015 }
 0x164   : > { %v1038_v28 = vsel %vm778_vm0, %v1016_v15, 0 }
 0x165   : > { %1056 = vmatpush.bf16.xpose.msrb.mxu1 %v1038_v28 }
 0x166   : > { %v951_v16 = vpop.f32.mrf.mxu2 }
 0x16a   : > { %1082 = vrot.lane.b32.xlu0 %v3012_v1, %s3509_s24 }
 0x16b   : > { %v1126_v17 = vpop.permute.xlu0 %1125 }
 0x16c   : > { %v1147_v18 = vsel %vm778_vm0, %v1126_v17, 0 }
 0x16d   : > { %1169 = vmatpush.bf16.xpose.msrb.mxu0 %v1147_v18  ;;  %1057 = vmatpush.bf16.xpose.msrb.mxu1 %v1035_v31 }
 0x173   : > { %v1124_v19 = vpop.permute.xlu0 %1123 }
 0x174   : > { %v1144_v20 = vsel %vm778_vm0, %v1124_v19, 0  ;;  %978 = vrot.lane.b32.xlu2 %v2990_v54, %s2708_s27 }
 0x175   : > { %1170 = vmatpush.bf16.xpose.msrb.mxu0 %v1144_v20  ;;  %1058 = vmatpush.bf16.xpose.msrb.mxu1 %v1032_v33 }
 0x179   : > { %968 = vrot.lane.b32.xlu1 %v3016_v2, %s2708_s27 }
 0x17b   : > { %v1122_v21 = vpop.permute.xlu0 %1121 }
 0x17c   : > { %v1141_v22 = vsel %vm778_vm0, %v1122_v21, 0  ;;  %970 = vrot.lane.b32.xlu2 %v3012_v1, %s2708_s27 }
 0x17d   : > { %1171 = vmatpush.bf16.xpose.msrb.mxu0 %v1141_v22  ;;  %1059 = vmatpush.bf16.xpose.msrb.mxu1 %v1029_v35 }
 0x181   : > { %1466 = vrot.lane.b32.xlu1 %v3048_v23, %s2708_s27 }
 0x183   : > { %v1120_v24 = vpop.permute.xlu0 %1119 }
 0x184   : > { %2320 = vmatmul.msk.bf16.vlgmr.msrb.gmra.mxu0 %vm778_vm0, %v1120_v24 }
 0x189   : > { %1464 = vrot.lane.b32.xlu1 %v3054_v25, %s2708_s27 }
 0x18b   : > { %v977_v57 = vpop.permute.xlu0 %976 }
 0x191   : > { %1090 = vrot.lane.b32.xlu1 %v2990_v54, %s3509_s24 }
 0x199   : > { %1088 = vrot.lane.b32.xlu1 %v2995_v58, %s3509_s24 }
 0x1a1   : > { %1460 = vrot.lane.b32.xlu1 %v3066_v29, %s2708_s27 }
 0x1a9   : > { %1196 = vrot.lane.b32.xlu1 %v3006_v63, %s2710_s16 }
 0x1cf   : > { %v826_v37 = vpop.xlane.xlu2 %825 }
 0x1d0   : > { %2583 = vrcp.f32 %v826_v37 }
 0x1d3   : > { %v955_v38 = vpop.xlane.xlu1 %954 }
 0x1d4   : > { %v956_v39 = vsub.f32 %v953_v14, %v955_v38 }
 0x1d6   : > { %v2584_v40 = vpop.eup %2583  ;;  %v957_v41 = vmul.f32 1.442695, %v956_v39 }
 0x1d7   : > { %v828_v42 = vmul.f32 %v2584_v40, %v2582_v12  ;;  %v979_v60 = vpop.permute.xlu2 %978 }
 0x1d8   : > { %2585 = vpow2.f32 %v957_v41  ;;  %988 = vmatpush.bf16.msra.mxu3 %v979_v60  ;;  %v1356_v60 = vsel %vm778_vm0, %v3054_v25, 0 }
 0x1d9   : > { %v829_v44 = vpack.c.bf16 %v828_v42, %v828_v42 }
 0x1db   : > { %886 = vmatmul.bf16.vlgmr.msra.gmra.mxu1 %v829_v44  ;;  %v3154_v44 = vld [vmem:[%s2865_s26 + $0x40] sm:$0xff] }
 0x1dc   : > { %989 = vmatpush.bf16.msra.mxu3 %v977_v57 }
 0x1de   : > { %v2586_v48 = vpop.eup %2585 }
 0x1df   : > { %959 = vadd.xlane.f32.xlu1 %v2586_v48  ;;  %v971_v62 = vpop.permute.xlu2 %970 }
 0x1eb   : > { %2319 = vmatmul.msk.bf16.vlgmr.msrb.gmra.mxu1 %vm778_vm0, %v1008_v36  ;;  %v969_v53 = vpop.permute.xlu1 %968 }
 0x1f3   : > { %v3100_v55 = vpop.permute.xlu1 %1466 }
 0x1f4   : > { %v1493_v36 = vsel %vm778_vm0, %v3100_v55, 0 }
 0x1f8   : > { %1194 = vrot.lane.b32.xlu1 %v3012_v1, %s2710_s16  ;;  %v3116_v1 = vld [vmem:[%s2865_s26 + $0x50] sm:$0xff]  ;;  %s2714_s26 = smov 24  }
 0x1fb   : > { %v3107_v58 = vpop.permute.xlu1 %1464 }
 0x1fc   : > { %v1490_v37 = vsel %vm778_vm0, %v3107_v58, 0 }
 0x201   : > { %v1173_v50 = vpop.f32.mrf.mxu0 }
 0x202   : > { %v1177_v51 = vsel %vm2962_vm4, %v2960_v46, %v1173_v50 }
 0x203   : > { %1178 = vmax.xlane.f32.xlu2 %v1177_v51 }
 0x209   : > { %v1175_v52 = vpop.f32.mrf.mxu0 }
 0x21b   : > { %964 = vrot.lane.b32.xlu2 %v3027_v6, %s2708_s27 }
 0x223   : > { %1202 = vrot.lane.b32.xlu2 %v2990_v54, %s2710_s16  ;;  %v975_v54 = vpop.permute.xlu0 %974 }
 0x224   : > { %990 = vmatpush.bf16.msra.mxu3 %v975_v54 }
 0x22b   : > { %1086 = vrot.lane.b32.xlu2 %v2999_v59, %s3509_s24  ;;  %v1091_v59 = vpop.permute.xlu1 %1090  ;;  %v973_v61 = vpop.permute.xlu0 %972 }
 0x22c   : > { %991 = vmatpush.bf16.msra.mxu3 %v973_v61 }
 0x230   : > { %992 = vmatpush.bf16.msra.mxu3 %v971_v62  ;;  %v1353_v62 = vsel %vm778_vm0, %v3079_v49, 0 }
 0x233   : > { %1084 = vrot.lane.b32.xlu2 %v3006_v63, %s3509_s24  ;;  %v1089_v63 = vpop.permute.xlu1 %1088  ;;  %v967_v4 = vpop.permute.xlu0 %966 }
 0x234   : > { %993 = vmatpush.bf16.msra.mxu3 %v969_v53  ;;  %v676_v53 = vld [vmem:[%s2909_s2 + $0x4] sm:$0xf]  ;;  %s2712_s2 = smov 16  }
 0x235   : > { %v1448_v58 = vunpack.c.l.b16 %v676_v53 }
 0x237   : > { %v3169_v54 = vpack.c.b16 %v1448_v58, %v1448_v58 }
 0x238   : > { %994 = vmatpush.bf16.msra.mxu3 %v967_v4  ;;  %v1347_v4 = vsel %vm778_vm0, %v3103_v56, 0 }
 0x23b   : > { %1458 = vrot.lane.b32.xlu2 %v3103_v56, %s2708_s27  ;;  %v3121_v7 = vpop.permute.xlu1 %1460  ;;  %v1463_v15 = vpop.permute.xlu0 %1462 }
 0x23c   : > { %v1487_v40 = vsel %vm778_vm0, %v1463_v15, 0  ;;  %v1484_v42 = vsel %vm778_vm0, %v3121_v7, 0 }
 0x243   : > { %1080 = vrot.lane.b32.xlu2 %v3016_v2, %s3509_s24  ;;  %v1197_v8 = vpop.permute.xlu1 %1196  ;;  %v1201_v19 = vpop.permute.xlu0 %1200 }
 0x24b   : > { %1192 = vrot.lane.b32.xlu2 %v3016_v2, %s2710_s16  ;;  %v1199_v21 = vpop.permute.xlu0 %1198 }
 0x252   : > { %v960_v11 = vpop.xlane.xlu1 %959 }
 0x253   : > { %1078 = vrot.lane.b32.xlu2 %v3021_v5, %s3509_s24  ;;  %2587 = vrcp.f32 %v960_v11  ;;  %v1341_v11 = vsel %vm778_vm0, %v3136_v34, 0 }
 0x258   : > { %v887_v3 = vpop.f32.mrf.mxu1 }
 0x259   : > { %891 = vst.msk [vmem:[#allocation2] sm:$0xff] %vm778_vm0, %v887_v3  ;;  %v2588_v16 = vpop.eup %2587 }
 0x25b   : > { %1456 = vrot.lane.b32.xlu2 %v3116_v1, %s2708_s27 }
 0x260   : > { %v889_v2 = vpop.f32.mrf.mxu1 }
 0x261   : > { %v1344_v2 = vsel %vm778_vm0, %v3116_v1, 0 }
 0x263   : > { %1190 = vrot.lane.b32.xlu2 %v3021_v5, %s2710_s16  ;;  %v962_v5 = vmul.f32 %v2588_v16, %v2586_v48 }
 0x268   : > { %v1061_v9 = vpop.f32.mrf.mxu1 }
 0x269   : > { %v1065_v10 = vsel %vm2962_vm4, %v2960_v46, %v1061_v9  ;;  %v963_v46 = vpack.c.bf16 %v962_v5, %v962_v5  ;;  %v3192_v5 = vld [vmem:[%s2987_s22 + $0x78] sm:$0xff] }
 0x26a   : > { %1066 = vmax.xlane.f32.xlu0 %v1065_v10  ;;  %v1195_v27 = vpop.permute.xlu1 %1194  ;;  %1433 = vmatpush.bf16.msra.mxu1 %v3192_v5 }
 0x26b   : > { %1188 = vrot.lane.b32.xlu2 %v3027_v6, %s2710_s16 }
 0x270   : > { %v1063_v12 = vpop.f32.mrf.mxu1 }
 0x271   : > { %v1338_v12 = vsel %vm778_vm0, %v3154_v44, 0 }
 0x273   : > { %1452 = vrot.lane.b32.xlu2 %v3154_v44, %s2708_s27 }
 0x276   : > { %v1179_v13 = vpop.xlane.xlu2 %1178 }
 0x277   : > { %v1180_v14 = vsub.f32 %v1177_v51, %v1179_v13  ;;  %v1359_v51 = vsel %vm778_vm0, %v3048_v23, 0 }
 0x279   : > { %v1181_v17 = vmul.f32 1.442695, %v1180_v14 }
 0x27b   : > { %2589 = vpow2.f32 %v1181_v17  ;;  %v1250_v17 = vld [vmem:[%s2872_s20 + $0x8] sm:$0xff]  ;;  %s3495_s20 = smov 8  }
 0x27c   : > { %vm1251_vm5 = vcmp.eq.f32.partialorder %v1250_v17, 0.0 }
 0x27e   : > { %v965_v18 = vpop.permute.xlu2 %964  ;;  %1076 = vrot.lane.b32.xlu0 %v3027_v6, %s3509_s24  ;;  %v1083_v6 = vpop.permute.xlu0 %1082 }
 0x27f   : > { %995 = vmatpush.bf16.msra.mxu3 %v965_v18  ;;  %v3195_v18 = vld [vmem:[%s2987_s22 + $0x70] sm:$0xff] }
 0x280   : > { %1434 = vmatpush.bf16.msra.mxu1 %v3195_v18 }
 0x281   : > { %v3132_v47 = vpop.eup %2589 }
 0x282   : > { %1183 = vadd.xlane.f32.xlu1 %v3132_v47  ;;  %996 = vmatmul.bf16.vlgmr.msra.gmra.mxu3 %v963_v46  ;;  %v1252_v46 = vsel %vm1251_vm5, 1, %v2707_v0 }
 0x283   : > { %1100 = vmatpush.bf16.msrb.mxu3 %v1091_v59  ;;  %1254 = vperm.xlu2 %2573, %v1252_v46  }
 0x286   : > { %v1203_v20 = vpop.permute.xlu2 %1202 }
 0x287   : > { %1101 = vmatpush.bf16.msrb.mxu3 %v1089_v63  ;;  %1212 = vmatpush.bf16.msrb.mxu2 %v1203_v20 }
 0x28b   : > { %1213 = vmatpush.bf16.msrb.mxu2 %v1201_v19  ;;  %v3205_v19 = vld [vmem:[%s2987_s22 + $0x68] sm:$0xff] }
 0x28c   : > { %1435 = vmatpush.bf16.msra.mxu1 %v3205_v19 }
 0x28e   : > { %v1087_v22 = vpop.permute.xlu2 %1086 }
 0x28f   : > { %1102 = vmatpush.bf16.msrb.mxu3 %v1087_v22  ;;  %1214 = vmatpush.bf16.msrb.mxu2 %v1199_v21  ;;  %v1243_v21 = vadd.s32 6, %v2956_v43 }
 0x291   : > { %vm1245_vm6 = vcmp.lt.s32.totalorder %v1243_v21, 7  ;;  %vm1247_vm7 = vcmp.ge.s32.totalorder %v1243_v21, 16 }
 0x292   : > { %vm1248_vm8 = vmor %vm1245_vm6, %vm1247_vm7  ;;  %vm1984_vm6 = vcmask 523264  }
 0x293   : > { %1215 = vmatpush.bf16.msrb.mxu2 %v1197_v8 }
 0x296   : > { %v1085_v24 = vpop.permute.xlu2 %1084 }
 0x297   : > { %1103 = vmatpush.bf16.msrb.mxu3 %v1085_v24  ;;  %1216 = vmatpush.bf16.msrb.mxu2 %v1195_v27 }
 0x29b   : > { %1104 = vmatpush.bf16.msrb.mxu3 %v1083_v6  ;;  %1454 = vrot.lane.b32.xlu1 %v3136_v34, %s2708_s27 }
 0x29e   : > { %v1459_v26 = vpop.permute.xlu2 %1458 }
 0x29f   : > { %v1481_v50 = vsel %vm778_vm0, %v1459_v26, 0  ;;  %v3224_v26 = vld [vmem:[%s2987_s22 + $0x60] sm:$0xff] }
 0x2a0   : > { %1436 = vmatpush.bf16.msra.mxu1 %v3224_v26 }
 0x2a3   : > { %1577 = vrot.lane.b32.xlu1 %v3048_v23, %s3509_s24 }
 0x2a6   : > { %v1081_v28 = vpop.permute.xlu2 %1080 }
 0x2a7   : > { %1105 = vmatpush.bf16.msrb.mxu3 %v1081_v28 }
 0x2ab   : > { %1688 = vrot.lane.b32.xlu1 %v3048_v23, %s2710_s16 }
 0x2ae   : > { %v1193_v30 = vpop.permute.xlu2 %1192 }
 0x2af   : > { %1217 = vmatpush.bf16.msrb.mxu2 %v1193_v30 }
 0x2b3   : > { %1575 = vrot.lane.b32.xlu1 %v3054_v25, %s3509_s24 }
 0x2b6   : > { %v1079_v31 = vpop.permute.xlu2 %1078 }
 0x2b7   : > { %1106 = vmatpush.bf16.msrb.mxu3 %v1079_v31 }
 0x2bb   : > { %1686 = vrot.lane.b32.xlu1 %v3054_v25, %s2710_s16  ;;  %v1350_v25 = vsel %vm778_vm0, %v3066_v29, 0 }
 0x2be   : > { %v1457_v32 = vpop.permute.xlu2 %1456 }
 0x2bf   : > { %v1478_v55 = vsel %vm778_vm0, %v1457_v32, 0  ;;  %v3240_v32 = vld [vmem:[%s2987_s22 + $0x58] sm:$0xff] }
 0x2c0   : > { %1437 = vmatpush.bf16.msra.mxu1 %v3240_v32 }
 0x2c3   : > { %1573 = vrot.lane.b32.xlu1 %v3079_v49, %s3509_s24 }
 0x2c6   : > { %v1191_v33 = vpop.permute.xlu2 %1190 }
 0x2c7   : > { %1218 = vmatpush.bf16.msrb.mxu2 %v1191_v33 }
 0x2cb   : > { %1531 = vrot.lane.b32.xlu1 %v3195_v18, %s2708_s27 }
 0x2ce   : > { %v1189_v35 = vpop.permute.xlu2 %1188 }
 0x2cf   : > { %1219 = vmatpush.bf16.msrb.mxu2 %v1189_v35 }
 0x2d3   : > { %1495 = vmatpush.bf16.xpose.msra.mxu2 %v1493_v36  ;;  %1571 = vrot.lane.b32.xlu1 %v3066_v29, %s3509_s24 }
 0x2d6   : > { %v1453_v9 = vpop.permute.xlu2 %1452 }
 0x2db   : > { %1496 = vmatpush.bf16.xpose.msra.mxu2 %v1490_v37  ;;  %1682 = vrot.lane.b32.xlu1 %v3066_v29, %s2710_s16  ;;  %v3228_v29 = vsel %vm1248_vm8, -1e+30, %v2711_v45  ;;  %v3247_v37 = vld [vmem:[%s2987_s22 + $0x50] sm:$0xff] }
 0x2dc   : > { %1438 = vmatpush.bf16.msra.mxu1 %v3247_v37 }
 0x2dd   : > { %v1067_v38 = vpop.xlane.xlu0 %1066 }
 0x2de   : > { %v1068_v39 = vsub.f32 %v1065_v10, %v1067_v38  ;;  %v1472_v10 = vsel %vm778_vm0, %v1453_v9, 0  ;;  %v1255_v24 = vpop.permute.xlu2 %1254 }
 0x2df   : > { %vm1256_vm9 = vcmp.eq.s32.totalorder %v1255_v24, 1 }
 0x2e0   : > { %v1069_v41 = vmul.f32 1.442695, %v1068_v39  ;;  %vm3230_vm10 = vmor %vm1256_vm9, %vm1248_vm8 }
 0x2e2   : > { %2591 = vpow2.f32 %v1069_v41 }
 0x2e3   : > { %1497 = vmatpush.bf16.xpose.msra.mxu2 %v1487_v40  ;;  %1569 = vrot.lane.b32.xlu1 %v3103_v56, %s3509_s24 }
 0x2e8   : > { %v2592_v48 = vpop.eup %2591 }
 0x2e9   : > { %1071 = vadd.xlane.f32.xlu0 %v2592_v48 }
 0x2eb   : > { %1498 = vmatpush.bf16.xpose.msra.mxu2 %v1484_v42 }
 0x2f0   : > { %v1077_v52 = vpop.permute.xlu0 %1076 }
 0x2f1   : > { %1107 = vmatpush.bf16.msrb.mxu3 %v1077_v52 }
 0x2f3   : > { %1499 = vmatpush.bf16.xpose.msra.mxu2 %v1481_v50 }
 0x2f5   : > { %1361 = vmatpush.bf16.xpose.msra.mxu3 %v1359_v51  ;;  %v1184_v57 = vpop.xlane.xlu1 %1183 }
 0x2f6   : > { %2593 = vrcp.f32 %v1184_v57 }
 0x2fb   : > { %1500 = vmatpush.bf16.xpose.msra.mxu2 %v1478_v55 }
 0x2fc   : > { %v2594_v23 = vpop.eup %2593 }
 0x2fd   : > { %1362 = vmatpush.bf16.xpose.msra.mxu3 %v1356_v60  ;;  %1450 = vrot.lane.b32.xlu0 %v3169_v54, %s2708_s27  ;;  %v1186_v59 = vmul.f32 %v2594_v23, %v3132_v47 }
 0x2ff   : > { %v1187_v61 = vpack.c.bf16 %v1186_v59, %v1186_v59 }
 0x301   : > { %1220 = vmatmul.bf16.vlgmr.msrb.gmra.mxu2 %v1187_v61 }
 0x305   : > { %1363 = vmatpush.bf16.xpose.msra.mxu3 %v1353_v62  ;;  %v3176_v63 = vpop.f32.mrf.mxu3  ;;  %1533 = vrot.lane.b32.xlu0 %v3192_v5, %s2708_s27 }
 0x30d   : > { %1364 = vmatpush.bf16.xpose.msra.mxu3 %v1350_v25  ;;  %v999_v3 = vpop.f32.mrf.mxu3  ;;  %v1455_v7 = vpop.permute.xlu1 %1454  ;;  %1529 = vrot.lane.b32.xlu0 %v3205_v19, %s2708_s27 }
 0x30e   : > { %v1475_v8 = vsel %vm778_vm0, %v1455_v7, 0 }
 0x30f   : > { %1501 = vmatpush.bf16.xpose.msra.mxu2 %v1475_v8 }
 0x315   : > { %1365 = vmatpush.bf16.xpose.msra.mxu3 %v1347_v4  ;;  %v1578_v6 = vpop.permute.xlu1 %1577 }
 0x316   : > { %v1604_v51 = vsel %vm778_vm0, %v1578_v6, 0 }
 0x317   : > { %1502 = vmatpush.bf16.xpose.msra.mxu2 %v1472_v10 }
 0x31d   : > { %1366 = vmatpush.bf16.xpose.msra.mxu3 %v1344_v2  ;;  %v3237_v31 = vpop.permute.xlu1 %1688 }
 0x325   : > { %1367 = vmatpush.bf16.xpose.msra.mxu3 %v1341_v11  ;;  %v1576_v36 = vpop.permute.xlu1 %1575 }
 0x32d   : > { %1368 = vmatpush.bf16.xpose.msra.mxu3 %v1338_v12  ;;  %v3250_v39 = vpop.permute.xlu1 %1686 }
 0x335   : > { %v1574_v40 = vpop.permute.xlu1 %1573 }
 0x336   : > { %v1598_v52 = vsel %vm778_vm0, %v1574_v40, 0 }
 0x33d   : > { %v1532_v42 = vpop.permute.xlu1 %1531 }
 0x345   : > { %v1572_v3 = vpop.permute.xlu1 %1571 }
 0x346   : > { %v1595_v4 = vsel %vm778_vm0, %v1572_v3, 0 }
 0x34d   : > { %v1683_v2 = vpop.permute.xlu1 %1682 }
 0x355   : > { %v1570_v9 = vpop.permute.xlu1 %1569 }
 0x356   : > { %v1592_v10 = vsel %vm778_vm0, %v1570_v9, 0 }
 0x35c   : > { %v1072_v13 = vpop.xlane.xlu0 %1071 }
 0x35d   : > { %2595 = vrcp.f32 %v1072_v13  ;;  %v1712_v13 = vsel %vm778_vm0, %v3250_v39, 0 }
 0x363   : > { %v2596_v14 = vpop.eup %2595 }
 0x364   : > { %v1074_v15 = vmul.f32 %v2596_v14, %v2592_v48  ;;  %v3259_v48 = vld [vmem:[%s2987_s22 + $0x48] sm:$0xff] }
 0x365   : > { %1439 = vmatpush.bf16.msra.mxu1 %v3259_v48 }
 0x366   : > { %v1075_v16 = vpack.c.bf16 %v1074_v15, %v1074_v15  ;;  %v1706_v15 = vsel %vm778_vm0, %v1683_v2, 0 }
 0x368   : > { %1108 = vmatmul.bf16.vlgmr.msrb.gmra.mxu3 %v1075_v16 }
 0x36f   : > { %v1451_v47 = vpop.permute.xlu0 %1450 }
 0x370   : > { %2418 = vmatmul.msk.bf16.vlgmr.msra.gmra.mxu2 %vm778_vm0, %v1451_v47 }
 0x377   : > { %v1534_v41 = vpop.permute.xlu0 %1533 }
 0x378   : > { %2385 = vmatmul.msk.bf16.vlgmr.msra.gmra.mxu3 %vm778_vm0, %v676_v53  ;;  %1543 = vmatpush.bf16.msra.mxu0 %v1534_v41 }
 0x37c   : > { %1544 = vmatpush.bf16.msra.mxu0 %v1532_v42 }
 0x37f   : > { %v1530_v50 = vpop.permute.xlu0 %1529 }
 0x380   : > { %1545 = vmatpush.bf16.msra.mxu0 %v1530_v50 }
 0x384   : > { %v3216_v0 = vpop.f32.mrf.mxu2 }
 0x38c   : > { %v1223_v20 = vpop.f32.mrf.mxu2 }
 0x3eb   : > { %v3221_v22 = vpop.f32.mrf.mxu3 }
 0x3f3   : > { %v1111_v43 = vpop.f32.mrf.mxu3  ;;  %v1504_v28 = vpop.f32.mrf.mxu2 }
 0x3f4   : > { %v1508_v30 = vsel %vm3230_vm10, %v3228_v29, %v1504_v28 }
 0x3f5   : > { %1509 = vmax.xlane.f32.xlu2 %v1508_v30 }
 0x3fb   : > { %v1370_v33 = vpop.f32.mrf.mxu3  ;;  %v1506_v45 = vpop.f32.mrf.mxu2 }
 0x3fc   : > { %v1374_v35 = vsel %vm3230_vm10, %v3228_v29, %v1370_v33 }
 0x3fd   : > { %1375 = vmax.xlane.f32.xlu0 %v1374_v35 }
 0x403   : > { %v1372_v38 = vpop.f32.mrf.mxu3 }
 0x40d   : > { %1684 = vrot.lane.b32.xlu2 %v3079_v49, %s2710_s16  ;;  %v3266_v49 = vld [vmem:[%s2987_s22 + $0x40] sm:$0xff] }
 0x40e   : > { %1440 = vmatpush.bf16.msra.mxu1 %v3266_v49 }
 0x411   : > { %1680 = vrot.lane.b32.xlu0 %v3103_v56, %s2710_s16  ;;  %v1601_v56 = vsel %vm778_vm0, %v1576_v36, 0 }
 0x412   : > { %1606 = vmatpush.bf16.xpose.msrb.mxu1 %v1604_v51 }
 0x415   : > { %1527 = vrot.lane.b32.xlu2 %v3224_v26, %s2708_s27 }
 0x41a   : > { %1607 = vmatpush.bf16.xpose.msrb.mxu1 %v1601_v56 }
 0x41d   : > { %1525 = vrot.lane.b32.xlu2 %v3240_v32, %s2708_s27 }
 0x422   : > { %1608 = vmatpush.bf16.xpose.msrb.mxu1 %v1598_v52 }
 0x425   : > { %1523 = vrot.lane.b32.xlu2 %v3247_v37, %s2708_s27 }
 0x42a   : > { %1609 = vmatpush.bf16.xpose.msrb.mxu1 %v1595_v4 }
 0x42d   : > { %1567 = vrot.lane.b32.xlu2 %v3116_v1, %s3509_s24 }
 0x432   : > { %1610 = vmatpush.bf16.xpose.msrb.mxu1 %v1592_v10 }
 0x435   : > { %1678 = vrot.lane.b32.xlu2 %v3116_v1, %s2710_s16 }
 0x43d   : > { %1521 = vrot.lane.b32.xlu2 %v3259_v48, %s2708_s27 }
 0x445   : > { %1519 = vrot.lane.b32.xlu2 %v3266_v49, %s2708_s27 }
 0x44d   : > { %1563 = vrot.lane.b32.xlu2 %v3154_v44, %s3509_s24 }
 0x455   : > { %1674 = vrot.lane.b32.xlu2 %v3154_v44, %s2710_s16 }
 0x45d   : > { %1561 = vrot.lane.b32.xlu2 %v3169_v54, %s3509_s24 }
 0x468   : > { %v1510_v53 = vpop.xlane.xlu2 %1509 }
 0x469   : > { %v1511_v55 = vsub.f32 %v1508_v30, %v1510_v53 }
 0x46b   : > { %v1512_v57 = vmul.f32 1.442695, %v1511_v55 }
 0x46d   : > { %2597 = vpow2.f32 %v1512_v57 }
 0x470   : > { %v1685_v1 = vpop.permute.xlu2 %1684  ;;  %v1376_v58 = vpop.xlane.xlu0 %1375 }
 0x471   : > { %v1377_v60 = vsub.f32 %v1374_v35, %v1376_v58  ;;  %v1709_v14 = vsel %vm778_vm0, %v1685_v1, 0 }
 0x473   : > { %v2598_v23 = vpop.eup %2597  ;;  %v1378_v59 = vmul.f32 1.442695, %v1377_v60 }
 0x474   : > { %1514 = vadd.xlane.f32.xlu0 %v2598_v23 }
 0x475   : > { %2599 = vpow2.f32 %v1378_v59 }
 0x478   : > { %v1528_v61 = vpop.permute.xlu2 %1527 }
 0x479   : > { %1546 = vmatpush.bf16.msra.mxu0 %v1528_v61 }
 0x47b   : > { %v2600_v62 = vpop.eup %2599 }
 0x47c   : > { %1380 = vadd.xlane.f32.xlu1 %v2600_v62 }
 0x480   : > { %v1526_v25 = vpop.permute.xlu2 %1525 }
 0x481   : > { %1547 = vmatpush.bf16.msra.mxu0 %v1526_v25 }
 0x483   : > { %v1681_v16 = vpop.permute.xlu0 %1680 }
 0x484   : > { %v1703_v17 = vsel %vm778_vm0, %v1681_v16, 0 }
 0x488   : > { %v1524_v44 = vpop.permute.xlu2 %1523  ;;  %1676 = vrot.lane.b32.xlu0 %v3136_v34, %s2710_s16 }
 0x489   : > { %1548 = vmatpush.bf16.msra.mxu0 %v1524_v44 }
 0x490   : > { %v1568_v7 = vpop.permute.xlu2 %1567  ;;  %1672 = vrot.lane.b32.xlu0 %v3169_v54, %s2710_s16 }
 0x491   : > { %v1589_v12 = vsel %vm778_vm0, %v1568_v7, 0 }
 0x492   : > { %1611 = vmatpush.bf16.xpose.msrb.mxu1 %v1589_v12 }
 0x495   : > { %1565 = vrot.lane.b32.xlu1 %v3136_v34, %s3509_s24  ;;  %v1715_v34 = vsel %vm778_vm0, %v3237_v31, 0 }
 0x498   : > { %v1679_v8 = vpop.permute.xlu2 %1678  ;;  %1644 = vrot.lane.b32.xlu0 %v3192_v5, %s3509_s24 }
 0x4a0   : > { %v1522_v11 = vpop.permute.xlu2 %1521  ;;  %1755 = vrot.lane.b32.xlu0 %v3192_v5, %s2710_s16  ;;  %v1700_v5 = vsel %vm778_vm0, %v1679_v8, 0 }
 0x4a1   : > { %1549 = vmatpush.bf16.msra.mxu0 %v1522_v11 }
 0x4a8   : > { %v1520_v54 = vpop.permute.xlu2 %1519  ;;  %1642 = vrot.lane.b32.xlu0 %v3195_v18, %s3509_s24 }
 0x4a9   : > { %1550 = vmatpush.bf16.msra.mxu0 %v1520_v54 }
 0x4ad   : > { %1717 = vmatpush.bf16.xpose.msrb.mxu0 %v1715_v34 }
 0x4b0   : > { %1753 = vrot.lane.b32.xlu0 %v3195_v18, %s2710_s16  ;;  %v1564_v24 = vpop.permute.xlu2 %1563 }
 0x4b1   : > { %v1583_v38 = vsel %vm778_vm0, %v1564_v24, 0  ;;  %v2498_v24 = vld [vmem:[%s3477_s5] sm:$0xff] }
 0x4b5   : > { %1718 = vmatpush.bf16.xpose.msrb.mxu0 %v1712_v13 }
 0x4b8   : > { %1640 = vrot.lane.b32.xlu0 %v3205_v19, %s3509_s24  ;;  %v1675_v33 = vpop.permute.xlu2 %1674 }
 0x4bd   : > { %1719 = vmatpush.bf16.xpose.msrb.mxu0 %v1709_v14 }
 0x4c0   : > { %1749 = vrot.lane.b32.xlu0 %v3224_v26, %s2710_s16  ;;  %v1562_v39 = vpop.permute.xlu2 %1561 }
 0x4c5   : > { %1720 = vmatpush.bf16.xpose.msrb.mxu0 %v1706_v15 }
 0x4c8   : > { %1636 = vrot.lane.b32.xlu0 %v3240_v32, %s3509_s24 }
 0x4cd   : > { %1721 = vmatpush.bf16.xpose.msrb.mxu0 %v1703_v17 }
 0x4d0   : > { %1747 = vrot.lane.b32.xlu0 %v3240_v32, %s2710_s16  ;;  %v1694_v32 = vsel %vm778_vm0, %v1675_v33, 0  ;;  %v2574_v33 = vld [vmem:[%s3478_s6] ss:$0 sm:$0xff] }
 0x4d5   : > { %1722 = vmatpush.bf16.xpose.msrb.mxu0 %v1700_v5 }
 0x4e7   : > { %v1515_v18 = vpop.xlane.xlu0 %1514 }
 0x4e8   : > { %2601 = vrcp.f32 %v1515_v18 }
 0x4ee   : > { %v2602_v46 = vpop.eup %2601 }
 0x4ef   : > { %v1517_v47 = vmul.f32 %v2602_v46, %v2598_v23  ;;  %v1381_v20 = vpop.xlane.xlu1 %1380 }
 0x4f0   : > { %2603 = vrcp.f32 %v1381_v20 }
 0x4f1   : > { %v1518_v21 = vpack.c.bf16 %v1517_v47, %v1517_v47 }
 0x4f3   : > { %1551 = vmatmul.bf16.vlgmr.msra.gmra.mxu0 %v1518_v21  ;;  %v2499_v21 = vld [vmem:[%s3477_s5 + $0x8] sm:$0xff] }
 0x4f6   : > { %v2604_v6 = vpop.eup %2603 }
 0x4f7   : > { %v1383_v43 = vmul.f32 %v2604_v6, %v2600_v62 }
 0x4f9   : > { %v1384_v28 = vpack.c.bf16 %v1383_v43, %v1383_v43 }
 0x4fa   : > { %v1677_v30 = vpop.permute.xlu0 %1676 }
 0x4fb   : > { %v1697_v31 = vsel %vm778_vm0, %v1677_v30, 0  ;;  %1441 = vmatmul.bf16.vlgmr.msra.gmra.mxu1 %v1384_v28 }
 0x4fc   : > { %1723 = vmatpush.bf16.xpose.msrb.mxu0 %v1697_v31 }
 0x502   : > { %v1673_v36 = vpop.permute.xlu0 %1672 }
 0x504   : > { %1724 = vmatpush.bf16.xpose.msrb.mxu0 %v1694_v32 }
 0x507   : > { %v1566_v45 = vpop.permute.xlu1 %1565 }
 0x508   : > { %v1586_v35 = vsel %vm778_vm0, %v1566_v45, 0 }
 0x509   : > { %1612 = vmatpush.bf16.xpose.msrb.mxu1 %v1586_v35 }
 0x50b   : > { %2420 = vmatmul.msk.bf16.vlgmr.msrb.gmra.mxu0 %vm778_vm0, %v1673_v36 }
 0x511   : > { %1613 = vmatpush.bf16.xpose.msrb.mxu1 %v1583_v38 }
 0x518   : > { %2419 = vmatmul.msk.bf16.vlgmr.msrb.gmra.mxu1 %vm778_vm0, %v1562_v39 }
 0x570   : > { %v1552_v40 = vpop.f32.mrf.mxu0 }
 0x578   : > { %v1442_v41 = vpop.f32.mrf.mxu1  ;;  %v1554_v42 = vpop.f32.mrf.mxu0 }
 0x579   : > { %1446 = vst.msk [vmem:[#allocation2 + $0x8] sm:$0xff] %vm778_vm0, %v1442_v41 }
 0x580   : > { %v1444_v50 = vpop.f32.mrf.mxu1 }
 0x588   : > { %v1726_v51 = vpop.f32.mrf.mxu0 }
 0x589   : > { %v1730_v56 = vsel %vm3230_vm10, %v3228_v29, %v1726_v51  ;;  %v2715_v51 = vmov 32.0  }
 0x58a   : > { %1731 = vmax.xlane.f32.xlu2 %v1730_v56 }
 0x590   : > { %v1728_v52 = vpop.f32.mrf.mxu0 }
 0x595   : > { %v1615_v53 = vpop.f32.mrf.mxu1 }
 0x596   : > { %v1619_v55 = vsel %vm3230_vm10, %v3228_v29, %v1615_v53 }
 0x597   : > { %1620 = vmax.xlane.f32.xlu1 %v1619_v55 }
 0x59d   : > { %v1617_v57 = vpop.f32.mrf.mxu1 }
 0x5a2   : > { %1638 = vrot.lane.b32.xlu2 %v3224_v26, %s3509_s24 }
 0x5aa   : > { %1634 = vrot.lane.b32.xlu2 %v3247_v37, %s3509_s24 }
 0x5b0   : > { %1751 = vrot.lane.b32.xlu1 %v3205_v19, %s2710_s16 }
 0x5b2   : > { %1745 = vrot.lane.b32.xlu2 %v3247_v37, %s2710_s16 }
 0x5ba   : > { %1632 = vrot.lane.b32.xlu2 %v3259_v48, %s3509_s24 }
 0x5c2   : > { %1743 = vrot.lane.b32.xlu2 %v3259_v48, %s2710_s16  ;;  %v1645_v48 = vpop.permute.xlu0 %1644 }
 0x5c3   : > { %1654 = vmatpush.bf16.msrb.mxu3 %v1645_v48 }
 0x5ca   : > { %1630 = vrot.lane.b32.xlu2 %v3266_v49, %s3509_s24  ;;  %v1756_v59 = vpop.permute.xlu0 %1755 }
 0x5cb   : > { %1765 = vmatpush.bf16.msrb.mxu2 %v1756_v59 }
 0x5d2   : > { %1741 = vrot.lane.b32.xlu2 %v3266_v49, %s2710_s16 }
 0x5da   : > { %1114 = vrot.lane.b32.xlu2 %v3221_v22, %s2712_s2  ;;  %v1643_v22 = vpop.permute.xlu0 %1642 }
 0x5db   : > { %1655 = vmatpush.bf16.msrb.mxu3 %v1643_v22  ;;  %v2501_v22 = vld [vmem:[%s3481_s9 + $0x8] sm:$0xff] }
 0x5e2   : > { %v1754_v61 = vpop.permute.xlu0 %1753 }
 0x5e3   : > { %1766 = vmatpush.bf16.msrb.mxu2 %v1754_v61 }
 0x5ea   : > { %v1641_v44 = vpop.permute.xlu0 %1640 }
 0x5eb   : > { %1656 = vmatpush.bf16.msrb.mxu3 %v1641_v44 }
 0x5f2   : > { %v1750_v4 = vpop.permute.xlu0 %1749 }
 0x5fa   : > { %v1637_v2 = vpop.permute.xlu0 %1636 }
 0x5fd   : > { %v1732_v19 = vpop.xlane.xlu2 %1731 }
 0x5fe   : > { %v1733_v26 = vsub.f32 %v1730_v56, %v1732_v19 }
 0x600   : > { %v1734_v29 = vmul.f32 1.442695, %v1733_v26 }
 0x602   : > { %2605 = vpow2.f32 %v1734_v29  ;;  %v1748_v8 = vpop.permute.xlu0 %1747 }
 0x605   : > { %v1639_v23 = vpop.permute.xlu2 %1638 }
 0x606   : > { %1657 = vmatpush.bf16.msrb.mxu3 %v1639_v23 }
 0x608   : > { %v2606_v27 = vpop.eup %2605 }
 0x609   : > { %1736 = vadd.xlane.f32.xlu0 %v2606_v27 }
 0x60a   : > { %v1621_v37 = vpop.xlane.xlu1 %1620  ;;  %1658 = vmatpush.bf16.msrb.mxu3 %v1637_v2 }
 0x60b   : > { %v1622_v1 = vsub.f32 %v1619_v55, %v1621_v37 }
 0x60d   : > { %v1623_v58 = vmul.f32 1.442695, %v1622_v1  ;;  %v1635_v49 = vpop.permute.xlu2 %1634 }
 0x60e   : > { %1659 = vmatpush.bf16.msrb.mxu3 %v1635_v49 }
 0x60f   : > { %2607 = vpow2.f32 %v1623_v58 }
 0x615   : > { %v2608_v60 = vpop.eup %2607  ;;  %v1746_v25 = vpop.permute.xlu2 %1745 }
 0x616   : > { %1625 = vadd.xlane.f32.xlu1 %v2608_v60 }
 0x61d   : > { %1557 = vrot.lane.b32.xlu0 %v1552_v40, %s3495_s20  ;;  %v1633_v3 = vpop.permute.xlu2 %1632 }
 0x61e   : > { %1660 = vmatpush.bf16.msrb.mxu3 %v1633_v3 }
 0x622   : > { %v1752_v62 = vpop.permute.xlu1 %1751 }
 0x623   : > { %1767 = vmatpush.bf16.msrb.mxu2 %v1752_v62 }
 0x625   : > { %1226 = vrot.lane.b32.xlu0 %v3216_v0, %s2714_s26  ;;  %v1744_v7 = vpop.permute.xlu2 %1743 }
 0x627   : > { %1768 = vmatpush.bf16.msrb.mxu2 %v1750_v4 }
 0x62b   : > { %1769 = vmatpush.bf16.msrb.mxu2 %v1748_v8 }
 0x62d   : > { %v1631_v0 = vpop.permute.xlu2 %1630 }
 0x62e   : > { %1661 = vmatpush.bf16.msrb.mxu3 %v1631_v0 }
 0x62f   : > { %1002 = vrot.lane.b32.xlu1 %v3176_v63, %s3495_s20  ;;  %1770 = vmatpush.bf16.msrb.mxu2 %v1746_v25  ;;  %v2500_v25 = vld [vmem:[%s3481_s9] sm:$0xff] }
 0x632   : > { %1816 = vmatpush.bf16.msra.mxu3 %v2499_v21 }
 0x633   : > { %1771 = vmatpush.bf16.msrb.mxu2 %v1744_v7 }
 0x635   : > { %v1742_v9 = vpop.permute.xlu2 %1741 }
 0x636   : > { %1817 = vmatpush.bf16.msra.mxu3 %v2498_v24 }
 0x637   : > { %1772 = vmatpush.bf16.msrb.mxu2 %v1742_v9 }
 0x63d   : > { %v1115_v17 = vpop.permute.xlu2 %1114 }
 0x67c   : > { %v1737_v10 = vpop.xlane.xlu0 %1736 }
 0x67d   : > { %2609 = vrcp.f32 %v1737_v10 }
 0x683   : > { %v2610_v63 = vpop.eup %2609 }
 0x684   : > { %v1739_v11 = vmul.f32 %v2610_v63, %v2606_v27 }
 0x686   : > { %v1740_v12 = vpack.c.bf16 %v1739_v11, %v1739_v11 }
 0x688   : > { %1773 = vmatmul.bf16.vlgmr.msrb.gmra.mxu2 %v1740_v12 }
 0x689   : > { %v1626_v54 = vpop.xlane.xlu1 %1625 }
 0x68a   : > { %2611 = vrcp.f32 %v1626_v54 }
 0x68b   : > { %2613 = vrcp.f32 %v2715_v51 }
 0x68f   : > { %v1558_v34 = vpop.permute.xlu0 %1557 }
 0x690   : > { %v2612_v13 = vpop.eup %2611  ;;  %1560 = vst.msk [vmem:[#allocation2 + $0x8] sm:$0xff] %vm1005_vm11, %v1558_v34 }
 0x691   : > { %v1628_v14 = vmul.f32 %v2612_v13, %v2608_v60  ;;  %v2614_v56 = vpop.eup %2613 }
 0x692   : > { %v1835_v52 = vmul.f32 32.0, %v2614_v56  ;;  %vm1839_vm15 = vweird.f32 %v2614_v56 }
 0x693   : > { %v1629_v15 = vpack.c.bf16 %v1628_v14, %v1628_v14  ;;  %v2575_v14 = vld [vmem:[%s3479_s7] ss:$0 sm:$0xff] }
 0x694   : > { %v1836_v53 = vsub.f32 1.0, %v1835_v52 }
 0x695   : > { %1662 = vmatmul.bf16.vlgmr.msrb.gmra.mxu3 %v1629_v15 }
 0x696   : > { %v1837_v55 = vmul.f32 %v2614_v56, %v1836_v53  ;;  %1921 = vmatpush.bf16.msrb.mxu3 %v2501_v22 }
 0x697   : > { %v1227_v5 = vpop.permute.xlu0 %1226 }
 0x698   : > { %v1838_v57 = vadd.f32 %v2614_v56, %v1837_v55 }
 0x69a   : > { %v3379_v19 = vsel %vm1839_vm15, %v2614_v56, %v1838_v57  ;;  %1922 = vmatpush.bf16.msrb.mxu3 %v2500_v25 }
 0x6a1   : > { %v1003_v16 = vpop.permute.xlu1 %1002 }
 0x6a2   : > { %1006 = vst.msk [vmem:[#allocation2] sm:$0xff] %vm1005_vm11, %v1003_v16 }
 0x6a3   : > { %1118 = vst.msk [vmem:[#allocation2] sm:$0xff] %vm1117_vm12, %v1115_v17 }
 0x6a4   : > { %1230 = vst.msk [vmem:[#allocation2] sm:$0xff] %vm1229_vm13, %v1227_v5  ;;  %v2576_v5 = vld [vmem:[%s3480_s8] ss:$0 sm:$0xff] }
 0x6ab   : > { %v1783_v28 = vld [vmem:[#allocation2] sm:$0xff] }
 0x70b   : > { %v1774_v18 = vpop.f32.mrf.mxu2 }
 0x713   : > { %v1776_v46 = vpop.f32.mrf.mxu2 }
 0x718   : > { %v1663_v47 = vpop.f32.mrf.mxu3 }
 0x719   : > { %1668 = vrot.lane.b32.xlu2 %v1663_v47, %s2712_s2  ;;  %s3512_s2 = sshll.u32 %s2856_s17, 4  ;;  %s618_s17 = sand.u32 1, %s2689_s19  }
 0x71a   : > { %s639_s22 = scalar_lea.vmem %s3473_s1, %s3512_s2  ;;  %s2242_s2 = sshll.u32 %s618_s17, 4 }
 0x71b   : > { %v1824_v45 = vld [vmem:[%s639_s22] sm:$0xff]  ;;  %v1825_v40 = vld [vmem:[%s639_s22 + $0x8] sm:$0xff]  ;;  %s620_s27 = scalar_lea.vmem [#allocation3], %s2242_s2  ;;  %s2647_s22 = scalar_lea.hbm %s3487_s15, 32 }
 0x71c   : > { %s2077_s25 = sshll.u32 %s620_s27, 4  ;;  %s2078_s25 = int_to_ptr.vmem [resolvable:$true] %s2077_s25 }
 0x720   : > { %v1665_v20 = vpop.f32.mrf.mxu3 }
 0x721   : > { %1779 = vrot.lane.b32.xlu2 %v1774_v18, %s2714_s26  ;;  %s2506_s26 = sshll.u32 %s2697_s21, 4  ;;  %s2063_s21 = scalar_lea.sflag [#allocation4], %s618_s17 }
 0x722   : > { %s2076_s16 = scalar_lea.hbm %s3487_s15, %s2506_s26 }
 0x723   : > { %s2079_s29 = sshll.u32 %s2076_s16, 4  ;;  %s2080_s29 = int_to_ptr.hbm [resolvable:$true] %s2079_s29 }
 0x724   : > { %s2641_s24 = sshra.s32 %s2080_s29, 4  ;;  %s2642_s24 = int_to_ptr.hbm [resolvable:$true] %s2641_s24 }
 0x725   : > { %s2643_s2 = scalar_lea.hbm %s2642_s24, 16  ;;  %p2648_p1 = scmp.lt.s32.totalorder %s2642_s24, %s3487_s15 }
 0x726   : > { %p2644_p12 = scmp.ne.s32.totalorder %s2642_s24, %s2643_s2  ;;  %p2649_p2 = scmp.lt.s32.totalorder %s2647_s22, %s2643_s2 }
 0x728   : > { %p2645_p13 = pnand %p2644_p12, %p2837_p4  ;;  %p2650_p3 = por %p2649_p2, %p2648_p1 }
 0x72a   : > { %p2646_p0 = pneg %p2645_p13 }
 0x72c   : > { %p2651_p5 = pnand %p2650_p3, %p2646_p0 }
 0x773   : > { %v1669_v6 = vpop.permute.xlu2 %1668 }
 0x774   : > { %1671 = vst.msk [vmem:[#allocation2 + $0x8] sm:$0xff] %vm1117_vm12, %v1669_v6  ;;  %v2505_v6 = vld [vmem:[%s3483_s11 + $0x18] sm:$0xff] }
 0x775   : > { %1992 = vmatpush.bf16.msra.mxu1 %v2505_v6  ;;  %v2580_v6 = vld [vmem:[%s3486_s14] ss:$0 sm:$0xff] }
 0x77b   : > { %v1780_v43 = vpop.permute.xlu2 %1779 }
 0x77c   : > { %1782 = vst.msk [vmem:[#allocation2 + $0x8] sm:$0xff] %vm1229_vm13, %v1780_v43  ;;  %v2504_v43 = vld [vmem:[%s3483_s11 + $0x10] sm:$0xff] }
 0x77d   : > { %1993 = vmatpush.bf16.msra.mxu1 %v2504_v43 }
 0x783   : > { %v1784_v30 = vld [vmem:[#allocation2 + $0x8] sm:$0xff] }
 0x784   : > { %v1785_v31 = vpack.c.bf16 %v1784_v30, %v1783_v28  ;;  %v2503_v28 = vld [vmem:[%s3483_s11 + $0x8] sm:$0xff]  ;;  %v2502_v30 = vld [vmem:[%s3483_s11] sm:$0xff] }
 0x785   : > { %1994 = vmatpush.bf16.msra.mxu1 %v2503_v28 }
 0x786   : > { %2429 = vmatmul.msk.bf16.vlgmr.msra.gmra.mxu3 %vm1806_vm14, %v1785_v31  ;;  %v2577_v31 = vld [vmem:[%s3482_s10] ss:$0 sm:$0xff] }
 0x789   : > { %1995 = vmatpush.bf16.msra.mxu1 %v2502_v30 }
 0x809   : > { %v1819_v32 = vpop.f32.mrf.mxu3 }
 0x80a   : > { %v1820_v35 = vadd.f32 %v2574_v33, %v1819_v32 }
 0x80c   : > { %v1826_v36 = vadd.f32 %v1824_v45, %v1820_v35 }
 0x80e   : > { %v1828_v38 = vsel %vm1806_vm14, %v1826_v36, 0.0 }
 0x80f   : > { %1829 = vadd.xlane.f32.xlu1 %v1828_v38 }
 0x811   : > { %v1821_v39 = vpop.f32.mrf.mxu3 }
 0x812   : > { %v1822_v41 = vadd.f32 %v2574_v33, %v1821_v39 }
 0x814   : > { %v1827_v42 = vadd.f32 %v1825_v40, %v1822_v41 }
 0x816   : > { %v1831_v50 = vsel %vm1806_vm14, %v1827_v42, 0.0 }
 0x817   : > { %1832 = vadd.xlane.f32.xlu0 %v1831_v50 }
 0x882   : > { %v1830_v26 = vpop.xlane.xlu1 %1829 }
 0x883   : > { %v1841_v29 = vmul.f32 %v3379_v19, %v1830_v26 }
 0x885   : > { %v1843_v27 = vsub.f32 %v1826_v36, %v1841_v29 }
 0x887   : > { %v1845_v37 = vmul.f32 %v1843_v27, %v1843_v27 }
 0x889   : > { %v1847_v1 = vsel %vm1806_vm14, %v1845_v37, 0.0 }
 0x88a   : > { %v1833_v58 = vpop.xlane.xlu0 %1832  ;;  %1848 = vadd.xlane.f32.xlu2 %v1847_v1 }
 0x88b   : > { %v1842_v48 = vmul.f32 %v3379_v19, %v1833_v58 }
 0x88d   : > { %v1844_v60 = vsub.f32 %v1827_v42, %v1842_v48  ;;  %v2578_v48 = vld [vmem:[%s3484_s12] ss:$0 sm:$0xff] }
 0x88f   : > { %v1846_v23 = vmul.f32 %v1844_v60, %v1844_v60 }
 0x891   : > { %v1850_v59 = vsel %vm1806_vm14, %v1846_v23, 0.0 }
 0x892   : > { %1851 = vadd.xlane.f32.xlu1 %v1850_v59 }
 0x8fd   : > { %v1849_v49 = vpop.xlane.xlu2 %1848 }
 0x8fe   : > { %v1853_v61 = vmul.f32 %v1849_v49, %v3379_v19 }
 0x900   : > { %v1855_v62 = vadd.f32 1e-05, %v1853_v61 }
 0x902   : > { %2615 = vrsqrt.f32 %v1855_v62  ;;  %vm1863_vm1 = vweird.f32 %v1855_v62 }
 0x905   : > { %v1852_v44 = vpop.xlane.xlu1 %1851 }
 0x906   : > { %v1854_v3 = vmul.f32 %v1852_v44, %v3379_v19 }
 0x908   : > { %v2616_v4 = vpop.eup %2615  ;;  %v1856_v7 = vadd.f32 1e-05, %v1854_v3 }
 0x909   : > { %v1858_v2 = vmul.f32 %v2616_v4, %v1855_v62  ;;  %vm1864_vm0 = vweird.f32 %v2616_v4 }
 0x90a   : > { %2617 = vrsqrt.f32 %v1856_v7  ;;  %vm1865_vm2 = vmor %vm1863_vm1, %vm1864_vm0  ;;  %vm1873_vm4 = vweird.f32 %v1856_v7 }
 0x90b   : > { %v1859_v8 = vmul.f32 %v2616_v4, %v1858_v2 }
 0x90d   : > { %v1860_v0 = vmul.f32 0.5, %v1859_v8 }
 0x90f   : > { %v1861_v9 = vsub.f32 1.5, %v1860_v0 }
 0x910   : > { %v2618_v10 = vpop.eup %2617 }
 0x911   : > { %v1862_v63 = vmul.f32 %v2616_v4, %v1861_v9  ;;  %v1868_v11 = vmul.f32 %v2618_v10, %v1856_v7  ;;  %vm1874_vm3 = vweird.f32 %v2618_v10 }
 0x912   : > { %vm1875_vm5 = vmor %vm1873_vm4, %vm1874_vm3 }
 0x913   : > { %v1869_v12 = vmul.f32 %v2618_v10, %v1868_v11  ;;  %v1866_v54 = vsel %vm1865_vm2, %v2616_v4, %v1862_v63 }
 0x914   : > { %v1877_v15 = vmul.f32 %v1866_v54, %v1843_v27 }
 0x915   : > { %v1870_v34 = vmul.f32 0.5, %v1869_v12 }
 0x916   : > { %v1883_v18 = vmul.f32 %v2575_v14, %v1877_v15 }
 0x917   : > { %v1871_v13 = vsub.f32 1.5, %v1870_v34 }
 0x918   : > { %v1889_v20 = vadd.f32 %v2576_v5, %v1883_v18 }
 0x919   : > { %v1872_v16 = vmul.f32 %v2618_v10, %v1871_v13 }
 0x91b   : > { %v1876_v17 = vsel %vm1875_vm5, %v2618_v10, %v1872_v16 }
 0x91c   : > { %v1878_v46 = vmul.f32 %v1876_v17, %v1844_v60 }
 0x91e   : > { %v1884_v47 = vmul.f32 %v2575_v14, %v1878_v46 }
 0x920   : > { %v1890_v21 = vadd.f32 %v2576_v5, %v1884_v47 }
 0x922   : > { %v1891_v24 = vpack.c.bf16 %v1890_v21, %v1889_v20 }
 0x924   : > { %2438 = vmatmul.msk.bf16.vlgmr.msrb.gmra.mxu3 %vm1806_vm14, %v1891_v24 }
 0x9a7   : > { %v1924_v33 = vpop.f32.mrf.mxu3 }
 0x9a8   : > { %v1925_v32 = vadd.f32 %v2577_v31, %v1924_v33 }
 0x9aa   : > { %v1931_v45 = vmul.f32 0.044715, %v1925_v32  ;;  %v1929_v26 = vmul.f32 0.5, %v1925_v32 }
 0x9ac   : > { %v1933_v35 = vmul.f32 %v1931_v45, %v1925_v32 }
 0x9ae   : > { %v1935_v36 = vmul.f32 %v1933_v35, %v1925_v32 }
 0x9af   : > { %v1926_v38 = vpop.f32.mrf.mxu3 }
 0x9b0   : > { %v1937_v39 = vadd.f32 %v1935_v36, %v1925_v32  ;;  %v1927_v40 = vadd.f32 %v2577_v31, %v1926_v38 }
 0x9b2   : > { %v1932_v41 = vmul.f32 0.044715, %v1927_v40  ;;  %v1939_v42 = vmul.f32 0.7978846, %v1937_v39  ;;  %v1930_v29 = vmul.f32 0.5, %v1927_v40 }
 0x9b4   : > { %v1934_v50 = vmul.f32 %v1932_v41, %v1927_v40  ;;  %2619 = vtanh.f32 %v1939_v42 }
 0x9b6   : > { %v1936_v51 = vmul.f32 %v1934_v50, %v1927_v40 }
 0x9b8   : > { %v1938_v56 = vadd.f32 %v1936_v51, %v1927_v40 }
 0x9ba   : > { %v1940_v52 = vmul.f32 0.7978846, %v1938_v56  ;;  %v2620_v53 = vpop.eup %2619 }
 0x9bb   : > { %v1943_v55 = vadd.f32 1.0, %v2620_v53 }
 0x9bc   : > { %2621 = vtanh.f32 %v1940_v52 }
 0x9bd   : > { %v1945_v37 = vmul.f32 %v1943_v55, %v1929_v26 }
 0x9c2   : > { %v2622_v57 = vpop.eup %2621 }
 0x9c3   : > { %v1944_v27 = vadd.f32 1.0, %v2622_v57 }
 0x9c5   : > { %v1946_v1 = vmul.f32 %v1944_v27, %v1930_v29 }
 0x9c7   : > { %v1947_v58 = vpack.c.bf16 %v1946_v1, %v1945_v37 }
 0x9c9   : > { %2455 = vmatmul.msk.bf16.vlgmr.msra.gmra.mxu1 %vm1984_vm6, %v1947_v58 }
 0xa46   : > { %v1997_v60 = vpop.f32.mrf.mxu1 }
 0xa47   : > { %v1998_v23 = vadd.f32 %v2578_v48, %v1997_v60 }
 0xa49   : > { %v2002_v59 = vadd.f32 %v1998_v23, %v1889_v20 }
 0xa4b   : > { %v2004_v22 = vsel %vm1806_vm14, %v2002_v59, 0.0 }
 0xa4c   : > { %2005 = vadd.xlane.f32.xlu2 %v2004_v22 }
 0xa4e   : > { %v1999_v49 = vpop.f32.mrf.mxu1 }
 0xa4f   : > { %v2000_v61 = vadd.f32 %v2578_v48, %v1999_v49 }
 0xa51   : > { %v2003_v62 = vadd.f32 %v2000_v61, %v1890_v21  ;;  %v2579_v21 = vld [vmem:[%s3485_s13] ss:$0 sm:$0xff] }
 0xa53   : > { %v2007_v25 = vsel %vm1806_vm14, %v2003_v62, 0.0 }
 0xa54   : > { %2008 = vadd.xlane.f32.xlu0 %v2007_v25 }
 0xabf   : > { %v2006_v44 = vpop.xlane.xlu2 %2005 }
 0xac0   : > { %v2010_v3 = vmul.f32 %v2006_v44, %v3379_v19 }
 0xac2   : > { %v2012_v4 = vsub.f32 %v2002_v59, %v2010_v3 }
 0xac4   : > { %v2014_v7 = vmul.f32 %v2012_v4, %v2012_v4 }
 0xac6   : > { %v2016_v2 = vsel %vm1806_vm14, %v2014_v7, 0.0 }
 0xac7   : > { %v2009_v8 = vpop.xlane.xlu0 %2008  ;;  %2017 = vadd.xlane.f32.xlu1 %v2016_v2 }
 0xac8   : > { %v2011_v0 = vmul.f32 %v2009_v8, %v3379_v19 }
 0xaca   : > { %v2013_v9 = vsub.f32 %v2003_v62, %v2011_v0 }
 0xacc   : > { %v2015_v10 = vmul.f32 %v2013_v9, %v2013_v9 }
 0xace   : > { %v2019_v63 = vsel %vm1806_vm14, %v2015_v10, 0.0 }
 0xacf   : > { %2020 = vadd.xlane.f32.xlu2 %v2019_v63 }
 0xb3a   : > { %v2018_v11 = vpop.xlane.xlu1 %2017 }
 0xb3b   : > { %v2022_v12 = vmul.f32 %v2018_v11, %v3379_v19 }
 0xb3d   : > { %v2024_v54 = vadd.f32 1e-05, %v2022_v12 }
 0xb3f   : > { %2623 = vrsqrt.f32 %v2024_v54  ;;  %vm2032_vm8 = vweird.f32 %v2024_v54 }
 0xb42   : > { %v2021_v34 = vpop.xlane.xlu2 %2020 }
 0xb43   : > { %v2023_v13 = vmul.f32 %v2021_v34, %v3379_v19 }
 0xb45   : > { %v2624_v14 = vpop.eup %2623  ;;  %v2025_v15 = vadd.f32 1e-05, %v2023_v13 }
 0xb46   : > { %v2027_v16 = vmul.f32 %v2624_v14, %v2024_v54  ;;  %vm2033_vm7 = vweird.f32 %v2624_v14 }
 0xb47   : > { %2625 = vrsqrt.f32 %v2025_v15  ;;  %vm2034_vm9 = vmor %vm2032_vm8, %vm2033_vm7  ;;  %vm2042_vm11 = vweird.f32 %v2025_v15 }
 0xb48   : > { %v2028_v17 = vmul.f32 %v2624_v14, %v2027_v16 }
 0xb4a   : > { %v2029_v5 = vmul.f32 0.5, %v2028_v17 }
 0xb4c   : > { %v2030_v18 = vsub.f32 1.5, %v2029_v5 }
 0xb4d   : > { %v2626_v46 = vpop.eup %2625 }
 0xb4e   : > { %v2031_v47 = vmul.f32 %v2624_v14, %v2030_v18  ;;  %v2037_v20 = vmul.f32 %v2626_v46, %v2025_v15  ;;  %vm2043_vm10 = vweird.f32 %v2626_v46 }
 0xb4f   : > { %vm2044_vm12 = vmor %vm2042_vm11, %vm2043_vm10 }
 0xb50   : > { %v2035_v19 = vsel %vm2034_vm9, %v2624_v14, %v2031_v47  ;;  %v2038_v24 = vmul.f32 %v2626_v46, %v2037_v20 }
 0xb51   : > { %v2046_v43 = vmul.f32 %v2035_v19, %v2012_v4 }
 0xb52   : > { %v2039_v28 = vmul.f32 0.5, %v2038_v24 }
 0xb53   : > { %v2052_v30 = vmul.f32 %v2579_v21, %v2046_v43 }
 0xb54   : > { %v2040_v31 = vsub.f32 1.5, %v2039_v28 }
 0xb55   : > { %v2058_v33 = vadd.f32 %v2580_v6, %v2052_v30 }
 0xb56   : > { %v2041_v32 = vmul.f32 %v2626_v46, %v2040_v31 }
 0xb57   : > { %2060 = vst.msk [vmem:[%s620_s27] sm:$0xff] %vm1806_vm14, %v2058_v33 }
 0xb58   : > { %v2045_v45 = vsel %vm2044_vm12, %v2626_v46, %v2041_v32 }
 0xb59   : > { %v2047_v35 = vmul.f32 %v2045_v45, %v2013_v9 }
 0xb5b   : > { %v2053_v36 = vmul.f32 %v2579_v21, %v2047_v35 }
 0xb5d   : > { %v2059_v38 = vadd.f32 %v2580_v6, %v2053_v36 }
 0xb5f   : > { %2061 = vst.msk [vmem:[%s620_s27 + $0x8] sm:$0xff] %vm1806_vm14, %v2059_v38 }
 0xb60   : > { %2654 = shalt.err (!%p2651_p5)
}
 0xb61   : > { %s2716_s17 = smov 128   ;;  %s3513_s27 = smov 8  }
 0xb62   : > { %2507 = dma.vmem_to_hbm [thread:$0]  (%p2837_p4), %s2078_s25, 256, %s2080_s29, %s2063_s21, %s2716_s17, %s2716_s17, %s3513_s27  }
 0xb63 PF: > { %p2513_p6 = scmp.ge.s32.totalorder %s2705_s23, 2  ;;  %s2094_s20 = sand.u32 1, %s2685_s18  }
 0xb64   : > { %s2095_s0 = scalar_lea.sflag [#allocation4], %s2094_s20 }
 0xb65   : > { %p2510_p7 = pnand %p2513_p6, %p2844_p8 }
 0xb67   : > { %p2511_p9 = pneg %p2510_p7 }
 0xb69   : > { %2680 = dma.done.wait (%p2511_p9), %s2095_s0, 256  }
 0xb6a   : > { %2682 = vsyncadd (%p2511_p9), %s2095_s0, 4294967040  ;;  %s28_s23 = sadd.s32 1, %s2705_s23   ;;  %s3514_s24 = sld [smem:[#allocation6_spill]] }
 0xb6b   : > { %p25_p10 = scmp.ge.s32.totalorder %s28_s23, 4   ;;  %s3515_s20 = sld [smem:[#allocation9_spill]] }
 0xb6c   : > { %s3516_s21 = sld [smem:[#allocation7_spill]]  ;;  %s3518_s18 = smov %s2689_s19 }
 0xb6d   : > { %s3517_s22 = sld [smem:[#allocation8_spill]]  ;;  %27 = sbr.rel (!%p25_p10) target bundleno = 7 (0x7), region = 129 }
 0xb70   : > { %s3519_s19 = smov %s3514_s24 }
 0xb72   :  { %2101 = vsyncpa [#allocation4], 1 }
 0xb73   :  { %2103 = vsyncpa [#allocation4 + $0x1], 1 }

</bundles_post_ra>
